<compile_context>
chip_gen: v5e
topology: v5e:2x2
jax: 0.10.0
libtpu: 0.0.40
codegen_flags: <defaults>
</compile_context>

<pallas_src>
import functools

import jax
import jax.numpy as jnp
from jax.experimental import pallas as pl
from jax.experimental.pallas import tpu as pltpu

MATMUL_DTYPE = jnp.bfloat16   # MXU operand dtype (set to jnp.float32 for exact parity runs)
LN_EPS = 1e-5                 # PyTorch nn.LayerNorm default
NEG_INF = -1e9


# -----------------------------------------------------------------------------
# In-kernel building blocks (all values are VMEM-resident)
# -----------------------------------------------------------------------------
def _mha(xq, xk_c, xv_c, wqkv, wo, bo, bias, *, num_heads, qk_same):
    """Multi-head attention.

    xq   : (Nq, D) f32 query input (pre-projection).
    xk_c : (Nk, D) in wqkv.dtype key input (ignored when qk_same).
    xv_c : (Nk, D) in wqkv.dtype value input.
    wqkv : (D, 3D) packed q|k|v projection (qkv_bias=False).
    wo,bo: (D, D) / (1, D) output projection.
    bias : (1, Nk) f32 additive key bias (key padding / lane padding) or None.
    """
    Nq, D = xq.shape
    hd = D // num_heads
    scale = hd ** -0.5
    cd = wqkv.dtype

    xq_c = xq.astype(cd)
    if qk_same:
        # q and k share the same input -> single fused (D, 2D) projection.
        qk = jnp.dot(xq_c, wqkv[:, : 2 * D], preferred_element_type=jnp.float32)
        q, k = qk[:, :D], qk[:, D: 2 * D]
    else:
        q = jnp.dot(xq_c, wqkv[:, :D], preferred_element_type=jnp.float32)
        k = jnp.dot(xk_c, wqkv[:, D: 2 * D], preferred_element_type=jnp.float32)
    v = jnp.dot(xv_c, wqkv[:, 2 * D:], preferred_element_type=jnp.float32)

    # Fold the softmax scale into q once (f32); cast each matmul operand exactly once.
    qc = (q * scale).astype(cd)
    kc = k.astype(cd)
    vc = v.astype(cd)

    # Per-head q.k^T stacked along sublanes -> a single softmax chain over all heads.
    s = jnp.concatenate(
        [jax.lax.dot_general(qc[:, h * hd:(h + 1) * hd], kc[:, h * hd:(h + 1) * hd],
                             (((1,), (1,)), ((), ())),
                             preferred_element_type=jnp.float32)
         for h in range(num_heads)], axis=0)                    # (H*Nq, Nk) f32
    if bias is not None:
        s = s + bias                                            # broadcast (1, Nk)
    m = jnp.max(s, axis=-1, keepdims=True)
    p = jnp.exp(s - m)
    denom = jnp.sum(p, axis=-1, keepdims=True)
    p = p * pl.reciprocal(denom, approx=True)                   # EUP slot (free)

    # p @ v per head, concatenated along lanes -> (Nq, D), then ONE full-depth (K = D)
    # output projection instead of H partial K=hd matmuls + accumulate chain.
    o = jnp.concatenate(
        [jnp.dot(p[h * Nq:(h + 1) * Nq, :].astype(cd), vc[:, h * hd:(h + 1) * hd],
                 preferred_element_type=jnp.float32)
         for h in range(num_heads)], axis=-1)                   # (Nq, D) f32
    return jnp.dot(o.astype(cd), wo, preferred_element_type=jnp.float32) + bo


def _add_layernorm(x, y, g, b, eps):
    """LayerNorm(x + y) over the last axis, f32 VPU math."""
    z = x + y
    mu = jnp.mean(z, axis=-1, keepdims=True)
    var = jnp.mean(jnp.square(z - mu), axis=-1, keepdims=True)
    return (z - mu) * jax.lax.rsqrt(var + eps) * g + b


def _decoder_stack_kernel(*refs, num_heads, eps, has_sbias, has_cbias):
    """grid = (batch, layer).  The output block (constant index over the layer axis) is
    the VMEM-resident activation carry: init from tgt at layer 0, rewritten per layer,
    flushed to HBM only when the batch index changes."""
    it = iter(refs)
    tgt_ref = next(it)       # (Q, D)  f32
    mem_ref = next(it)       # (S, D)  MATMUL_DTYPE  (values)
    memp_ref = next(it)      # (S, D)  MATMUL_DTYPE  (memory + pos, keys)
    qpos_ref = next(it)      # (Q, D)  f32
    sbias_ref = next(it) if has_sbias else None   # (1, Q) f32
    cbias_ref = next(it) if has_cbias else None   # (1, S) f32
    (sa_wqkv, sa_wo, sa_bo, ln1_g, ln1_b,
     ca_wqkv, ca_wo, ca_bo, ln2_g, ln2_b,
     w1, b1, w2, b2, ln3_g, ln3_b, out_ref) = it

    layer = pl.program_id(1)

    @pl.when(layer == 0)
    def _():
        out_ref[0] = tgt_ref[...]

    x = out_ref[0]                       # (Q, D) f32 activation carry
    qpos = qpos_ref[...]
    cd = sa_wqkv.dtype
    sbias = sbias_ref[...] if has_sbias else None
    cbias = cbias_ref[...] if has_cbias else None

    # ---- self attention: q = k = x + query_pos, v = x (drop_path/dropout = identity) ----
    sa = _mha(x + qpos, None, x.astype(cd), sa_wqkv[...], sa_wo[...], sa_bo[...],
              sbias, num_heads=num_heads, qk_same=True)
    x1 = _add_layernorm(x, sa, ln1_g[...], ln1_b[...], eps)

    # ---- cross attention: q = x1 + query_pos, k = memory + pos (precomputed), v = memory -
    ca = _mha(x1 + qpos, memp_ref[...], mem_ref[...], ca_wqkv[...], ca_wo[...],
              ca_bo[...], cbias, num_heads=num_heads, qk_same=False)
    x2 = _add_layernorm(x1, ca, ln2_g[...], ln2_b[...], eps)

    # ---- feed-forward -------------------------------------------------------------------
    # TODO(synk): reference MLP source not provided; Linear-GELU(tanh)-Linear assumed.
    x2_c = x2.astype(cd)
    hid = jnp.dot(x2_c, w1[...], preferred_element_type=jnp.float32) + b1[...]
    hid = jax.nn.gelu(hid, approximate=True)
    y = jnp.dot(hid.astype(cd), w2[...], preferred_element_type=jnp.float32) + b2[...]
    out_ref[0] = _add_layernorm(x2, y, ln3_g[...], ln3_b[...], eps)


# -----------------------------------------------------------------------------
# pallas_call wrapper
# -----------------------------------------------------------------------------
_WEIGHT_NAMES = ("sa_wqkv", "sa_wo", "sa_bo", "ln1_g", "ln1_b",
                 "ca_wqkv", "ca_wo", "ca_bo", "ln2_g", "ln2_b",
                 "w1", "b1", "w2", "b2", "ln3_g", "ln3_b")


def _decoder_stack_call(params, tgt, mem_c, memp_c, qpos, sbias, cbias, *, num_heads):
    B, Q, D = tgt.shape
    S = mem_c.shape[1]
    L = params["sa_wqkv"].shape[0]
    has_sbias = sbias is not None
    has_cbias = cbias is not None

    in_specs = [
        pl.BlockSpec((None, Q, D), lambda b, l: (b, 0, 0)),          # tgt (carry init)
        pl.BlockSpec((None, S, D), lambda b, l: (b, 0, 0)),          # memory (values)
        pl.BlockSpec((None, S, D), lambda b, l: (b, 0, 0)),          # memory + pos (keys)
        pl.BlockSpec((None, Q, D),
                     (lambda b, l: (0, 0, 0)) if qpos.shape[0] == 1
                     else (lambda b, l: (b, 0, 0))),                 # query_pos (no bcast)
    ]
    args = [tgt, mem_c, memp_c, qpos]
    if has_sbias:
        in_specs.append(pl.BlockSpec((None, 1, Q), lambda b, l: (b, 0, 0)))
        args.append(sbias)
    if has_cbias:
        in_specs.append(pl.BlockSpec((None, 1, S), lambda b, l: (b, 0, 0)))
        args.append(cbias)
    for name in _WEIGHT_NAMES:                     # stacked (L, r, c) weights, pick layer l
        w = params[name]
        in_specs.append(pl.BlockSpec((None,) + w.shape[1:], lambda b, l: (l, 0, 0)))
        args.append(w)

    kern = functools.partial(_decoder_stack_kernel, num_heads=num_heads, eps=LN_EPS,
                             has_sbias=has_sbias, has_cbias=has_cbias)
    # NOTE: at real DETR sizes (D=256, S~850->896, Hd=2048, 6 layers) the per-step live set
    # is ~10-15 MiB, within v6e/v7x default scoped VMEM; on v5e set
    # pltpu.CompilerParams(vmem_limit_bytes=...) explicitly rather than shrinking tiles.
    return pl.pallas_call(
        kern,
        out_shape=jax.ShapeDtypeStruct((B, Q, D), jnp.float32),
        grid=(B, L),
        in_specs=in_specs,
        out_specs=pl.BlockSpec((1, Q, D), lambda b, l: (b, 0, 0)),   # constant over layer
        compiler_params=pltpu.CompilerParams(
            dimension_semantics=("parallel", "arbitrary")),          # batch across TCs (v7x)
    )(*args)


# -----------------------------------------------------------------------------
# Decoder forward (pre_norm=False, return_intermediate=False, eval mode)
# -----------------------------------------------------------------------------
def decoder_forward(params, tgt, memory, tgt_mask=None, memory_mask=None,
                    query_pos=None, pos=None, *, num_heads):
    # TODO(synk): MultiHeadAttention source not provided; tgt_mask / memory_mask are
    # interpreted as per-batch key-padding masks of shape (B, N) (True == masked).
    B, Q, D = tgt.shape
    S = memory.shape[1]
    assert D % num_heads == 0
    cd = params["sa_wqkv"].dtype

    tgt = tgt.astype(jnp.float32)
    mem_f = memory.astype(jnp.float32)
    memp_f = mem_f if pos is None else mem_f + pos.astype(jnp.float32)
    memp_f = jnp.broadcast_to(memp_f, (B, S, D))
    qpos = (jnp.zeros((1, Q, D), jnp.float32) if query_pos is None
            else query_pos.astype(jnp.float32))          # kept (1,Q,D): not broadcast to B

    # Pad key length S to a lane-full multiple of 128; padded keys masked via -inf bias.
    S_pad = ((S + 127) // 128) * 128
    mem_c = mem_f.astype(cd)
    memp_c = memp_f.astype(cd)
    if S_pad != S:
        zpad = jnp.zeros((B, S_pad - S, D), cd)
        mem_c = jnp.concatenate([mem_c, zpad], axis=1)
        memp_c = jnp.concatenate([memp_c, zpad], axis=1)

    sbias = None
    if tgt_mask is not None:
        m = tgt_mask.reshape(B, Q).astype(bool)
        sbias = jnp.where(m, NEG_INF, 0.0).astype(jnp.float32).reshape(B, 1, Q)

    cbias = None
    if memory_mask is not None or S_pad != S:
        if memory_mask is None:
            cbias = jnp.zeros((B, 1, S), jnp.float32)
        else:
            m = memory_mask.reshape(B, S).astype(bool)
            cbias = jnp.where(m, NEG_INF, 0.0).astype(jnp.float32).reshape(B, 1, S)
        if S_pad != S:
            cbias = jnp.concatenate(
                [cbias, jnp.full((B, 1, S_pad - S), NEG_INF, jnp.float32)], axis=-1)

    out = _decoder_stack_call(params, tgt, mem_c, memp_c, qpos, sbias, cbias,
                              num_heads=num_heads)
    # pre_norm=False -> self.norm is Identity; return_intermediate=False -> unsqueeze(0).
    return out[None]


# -----------------------------------------------------------------------------
# Deterministic parameter init (xavier_uniform weights; stacked along a layer axis)
# TODO(synk): MultiHeadAttention source not provided; qkv_bias=False with a biased output
#             projection is assumed.
# -----------------------------------------------------------------------------
def _xavier(key, shape):
    fan_in, fan_out = shape[-2], shape[-1]
    limit = (6.0 / (fan_in + fan_out)) ** 0.5
    return jax.random.uniform(key, shape, jnp.float32, -limit, limit)


def init_decoder(key, D, Hd, num_layers):
    L = num_layers
    ks = jax.random.split(key, 12)

    def attn(kq, kk, kv, ko, kb):
        wqkv = jnp.concatenate([_xavier(kq, (L, D, D)), _xavier(kk, (L, D, D)),
                                _xavier(kv, (L, D, D))], axis=-1)
        return (wqkv.astype(MATMUL_DTYPE),
                _xavier(ko, (L, D, D)).astype(MATMUL_DTYPE),
                0.02 * jax.random.normal(kb, (L, 1, D), jnp.float32))

    sa_wqkv, sa_wo, sa_bo = attn(*ks[0:5])
    ca_wqkv, ca_wo, ca_bo = attn(*ks[5:10])
    return dict(
        sa_wqkv=sa_wqkv, sa_wo=sa_wo, sa_bo=sa_bo,
        ln1_g=jnp.ones((L, 1, D), jnp.float32), ln1_b=jnp.zeros((L, 1, D), jnp.float32),
        ca_wqkv=ca_wqkv, ca_wo=ca_wo, ca_bo=ca_bo,
        ln2_g=jnp.ones((L, 1, D), jnp.float32), ln2_b=jnp.zeros((L, 1, D), jnp.float32),
        w1=_xavier(ks[10], (L, D, Hd)).astype(MATMUL_DTYPE),
        b1=jnp.zeros((L, 1, Hd), jnp.float32),
        w2=_xavier(ks[11], (L, Hd, D)).astype(MATMUL_DTYPE),
        b2=jnp.zeros((L, 1, D), jnp.float32),
        ln3_g=jnp.ones((L, 1, D), jnp.float32), ln3_b=jnp.zeros((L, 1, D), jnp.float32),
    )


# -----------------------------------------------------------------------------
# Pure-JAX f32 reference (same bf16-rounded weights) for correctness checking.
# -----------------------------------------------------------------------------
def _ref_mha(xq, xk, xv, wqkv, wo, bo, bias, num_heads):
    B, Nq, D = xq.shape
    Nk = xk.shape[1]
    hd = D // num_heads
    wqkv = wqkv.astype(jnp.float32)
    q = (xq @ wqkv[:, :D]).reshape(B, Nq, num_heads, hd).transpose(0, 2, 1, 3)
    k = (xk @ wqkv[:, D:2 * D]).reshape(B, Nk, num_heads, hd).transpose(0, 2, 1, 3)
    v = (xv @ wqkv[:, 2 * D:]).reshape(B, Nk, num_heads, hd).transpose(0, 2, 1, 3)
    s = jnp.einsum("bhqd,bhkd->bhqk", q, k) * (hd ** -0.5)
    if bias is not None:
        s = s + bias[:, None, :, :]
    a = jax.nn.softmax(s, axis=-1)
    o = jnp.einsum("bhqk,bhkd->bhqd", a, v).transpose(0, 2, 1, 3).reshape(B, Nq, D)
    return o @ wo.astype(jnp.float32) + bo


def _ref_ln(x, g, b):
    mu = jnp.mean(x, axis=-1, keepdims=True)
    var = jnp.mean(jnp.square(x - mu), axis=-1, keepdims=True)
    return (x - mu) * jax.lax.rsqrt(var + LN_EPS) * g + b


def ref_decoder_forward(params, tgt, memory, tgt_mask, memory_mask, query_pos, pos,
                        num_heads):
    B, Q, D = tgt.shape
    S = memory.shape[1]
    L = params["sa_wqkv"].shape[0]
    mem = memory.astype(jnp.float32)
    qpos = (jnp.zeros((1, Q, D), jnp.float32) if query_pos is None
            else query_pos.astype(jnp.float32))
    memp = mem if pos is None else mem + pos.astype(jnp.float32)
    sbias = None
    if tgt_mask is not None:
        sbias = jnp.where(tgt_mask.reshape(B, Q).astype(bool), NEG_INF, 0.0
                          ).astype(jnp.float32).reshape(B, 1, Q)
    cbias = None
    if memory_mask is not None:
        cbias = jnp.where(memory_mask.reshape(B, S).astype(bool), NEG_INF, 0.0
                          ).astype(jnp.float32).reshape(B, 1, S)
    out = tgt.astype(jnp.float32)
    for i in range(L):
        qk = out + qpos
        sa = _ref_mha(qk, qk, out, params["sa_wqkv"][i], params["sa_wo"][i],
                      params["sa_bo"][i], sbias, num_heads)
        x1 = _ref_ln(out + sa, params["ln1_g"][i], params["ln1_b"][i])
        ca = _ref_mha(x1 + qpos, memp, mem, params["ca_wqkv"][i], params["ca_wo"][i],
                      params["ca_bo"][i], cbias, num_heads)
        x2 = _ref_ln(x1 + ca, params["ln2_g"][i], params["ln2_b"][i])
        hid = jax.nn.gelu(x2 @ params["w1"][i].astype(jnp.float32) + params["b1"][i],
                          approximate=True)
        y = hid @ params["w2"][i].astype(jnp.float32) + params["b2"][i]
        out = _ref_ln(x2 + y, params["ln3_g"][i], params["ln3_b"][i])
    return out[None]


# -----------------------------------------------------------------------------
if __name__ == "__main__":
    # Small, lane-dense shapes: embed_dim 128 (full-128-lane stores), 4 heads, hidden 256,
    # 2 decoder layers, 8 object queries, memory length 64 (padded to 128 keys), batch 2.
    B, Q, S = 2, 8, 64
    D, num_heads, num_hidden, num_layers = 128, 4, 256, 2

    key = jax.random.PRNGKey(0)
    k_tgt, k_mem, k_qp, k_pos, k_par = jax.random.split(key, 5)
    tgt = jax.random.normal(k_tgt, (B, Q, D), jnp.float32)
    memory = jax.random.normal(k_mem, (B, S, D), jnp.float32)
    query_pos = 0.5 * jax.random.normal(k_qp, (1, Q, D), jnp.float32)  # shared queries
    pos = 0.5 * jax.random.normal(k_pos, (B, S, D), jnp.float32)
    # key-padding mask: last 8 memory positions of batch element 1 are padding (True=mask)
    memory_mask = jnp.zeros((B, S), jnp.bool_).at[1, -8:].set(True)

    params = init_decoder(k_par, D, num_hidden, num_layers)

    out = decoder_forward(params, tgt, memory, tgt_mask=None, memory_mask=memory_mask,
                          query_pos=query_pos, pos=pos, num_heads=num_heads)
    out = jax.block_until_ready(out)

    assert out.shape == (1, B, Q, D)
    assert bool(jnp.all(jnp.isfinite(out)))

    # Sanity check vs pure-JAX f32 reference (same bf16-rounded weights).  Tolerances are
    # loose because the kernel uses bf16 MXU operands + approximate EUP reciprocal.
    ref = ref_decoder_forward(params, tgt, memory, None, memory_mask, query_pos, pos,
                              num_heads)
    max_err = float(jnp.max(jnp.abs(out - ref)))
    mean_err = float(jnp.mean(jnp.abs(out - ref)))
    assert max_err < 0.2 and mean_err < 0.02, f"max {max_err}, mean {mean_err}"

    print("KERNEL_OK")
</pallas_src>

<mosaic_0001>
module attributes {stable_mosaic.version = 11 : i64} {
  func.func @_decoder_stack_kernel(%arg0: i32, %arg1: i32, %arg2: memref<1x8x128xf32, #tpu.memory_space<vmem>>, %arg3: memref<1x128x128xbf16, #tpu.memory_space<vmem>>, %arg4: memref<1x128x128xbf16, #tpu.memory_space<vmem>>, %arg5: memref<1x8x128xf32, #tpu.memory_space<vmem>>, %arg6: memref<1x1x128xf32, #tpu.memory_space<vmem>>, %arg7: memref<1x128x384xbf16, #tpu.memory_space<vmem>>, %arg8: memref<1x128x128xbf16, #tpu.memory_space<vmem>>, %arg9: memref<1x1x128xf32, #tpu.memory_space<vmem>>, %arg10: memref<1x1x128xf32, #tpu.memory_space<vmem>>, %arg11: memref<1x1x128xf32, #tpu.memory_space<vmem>>, %arg12: memref<1x128x384xbf16, #tpu.memory_space<vmem>>, %arg13: memref<1x128x128xbf16, #tpu.memory_space<vmem>>, %arg14: memref<1x1x128xf32, #tpu.memory_space<vmem>>, %arg15: memref<1x1x128xf32, #tpu.memory_space<vmem>>, %arg16: memref<1x1x128xf32, #tpu.memory_space<vmem>>, %arg17: memref<1x128x256xbf16, #tpu.memory_space<vmem>>, %arg18: memref<1x1x256xf32, #tpu.memory_space<vmem>>, %arg19: memref<1x256x128xbf16, #tpu.memory_space<vmem>>, %arg20: memref<1x1x128xf32, #tpu.memory_space<vmem>>, %arg21: memref<1x1x128xf32, #tpu.memory_space<vmem>>, %arg22: memref<1x1x128xf32, #tpu.memory_space<vmem>>, %arg23: memref<1x8x128xf32, #tpu.memory_space<vmem>>) attributes {dimension_semantics = [#tpu.dimension_semantics<parallel>, #tpu.dimension_semantics<arbitrary>], iteration_bounds = array<i64: 2, 2>, scalar_prefetch = 0 : i64, scratch_operands = 0 : i64, tpu.core_type = #tpu.core_type<tc>, window_params = [{transform_indices = @transform_0, window_bounds = array<i64: 1, 8, 128>}, {transform_indices = @transform_1, window_bounds = array<i64: 1, 128, 128>}, {transform_indices = @transform_2, window_bounds = array<i64: 1, 128, 128>}, {pipeline_mode = #tpu.pipeline_mode<synchronous>, transform_indices = @transform_3, window_bounds = array<i64: 1, 8, 128>}, {transform_indices = @transform_4, window_bounds = array<i64: 1, 1, 128>}, {transform_indices = @transform_5, window_bounds = array<i64: 1, 128, 384>}, {transform_indices = @transform_6, window_bounds = array<i64: 1, 128, 128>}, {transform_indices = @transform_7, window_bounds = array<i64: 1, 1, 128>}, {transform_indices = @transform_8, window_bounds = array<i64: 1, 1, 128>}, {transform_indices = @transform_9, window_bounds = array<i64: 1, 1, 128>}, {transform_indices = @transform_10, window_bounds = array<i64: 1, 128, 384>}, {transform_indices = @transform_11, window_bounds = array<i64: 1, 128, 128>}, {transform_indices = @transform_12, window_bounds = array<i64: 1, 1, 128>}, {transform_indices = @transform_13, window_bounds = array<i64: 1, 1, 128>}, {transform_indices = @transform_14, window_bounds = array<i64: 1, 1, 128>}, {transform_indices = @transform_15, window_bounds = array<i64: 1, 128, 256>}, {transform_indices = @transform_16, window_bounds = array<i64: 1, 1, 256>}, {transform_indices = @transform_17, window_bounds = array<i64: 1, 256, 128>}, {transform_indices = @transform_18, window_bounds = array<i64: 1, 1, 128>}, {transform_indices = @transform_19, window_bounds = array<i64: 1, 1, 128>}, {transform_indices = @transform_20, window_bounds = array<i64: 1, 1, 128>}, {transform_indices = @transform_21, window_bounds = array<i64: 1, 8, 128>}]} {
    %c0_i32 = arith.constant 0 : i32
    %0 = arith.cmpi eq, %arg1, %c0_i32 : i32
    %1 = arith.extui %0 : i1 to i32
    %c0_i32_0 = arith.constant 0 : i32
    %2 = arith.cmpi ne, %1, %c0_i32_0 : i32
    scf.if %2 {
      %c0_115 = arith.constant 0 : index
      %c0_116 = arith.constant 0 : index
      %c0_117 = arith.constant 0 : index
      %255 = vector.load %arg2[%c0_115, %c0_116, %c0_117] : memref<1x8x128xf32, #tpu.memory_space<vmem>>, vector<1x8x128xf32>
      %256 = vector.shape_cast %255 : vector<1x8x128xf32> to vector<8x128xf32>
      %c0_118 = arith.constant 0 : index
      %c0_119 = arith.constant 0 : index
      %c0_120 = arith.constant 0 : index
      %257 = vector.load %arg23[%c0_118, %c0_119, %c0_120] : memref<1x8x128xf32, #tpu.memory_space<vmem>>, vector<1x8x128xf32>
      %258 = vector.shape_cast %257 : vector<1x8x128xf32> to vector<8x128xf32>
      %259 = vector.shape_cast %256 : vector<8x128xf32> to vector<1x8x128xf32>
      tpu.vector_store %arg23[%c0_118, %c0_119, %c0_120], %259 {strides = array<i32>} : memref<1x8x128xf32, #tpu.memory_space<vmem>>, vector<1x8x128xf32>,
    } else {
    }
    %c0 = arith.constant 0 : index
    %c0_1 = arith.constant 0 : index
    %c0_2 = arith.constant 0 : index
    %3 = vector.load %arg23[%c0, %c0_1, %c0_2] : memref<1x8x128xf32, #tpu.memory_space<vmem>>, vector<1x8x128xf32>
    %4 = vector.shape_cast %3 : vector<1x8x128xf32> to vector<8x128xf32>
    %c0_3 = arith.constant 0 : index
    %c0_4 = arith.constant 0 : index
    %c0_5 = arith.constant 0 : index
    %5 = vector.load %arg5[%c0_3, %c0_4, %c0_5] : memref<1x8x128xf32, #tpu.memory_space<vmem>>, vector<1x8x128xf32>
    %6 = vector.shape_cast %5 : vector<1x8x128xf32> to vector<8x128xf32>
    %c0_6 = arith.constant 0 : index
    %c0_7 = arith.constant 0 : index
    %c0_8 = arith.constant 0 : index
    %7 = vector.load %arg6[%c0_6, %c0_7, %c0_8] : memref<1x1x128xf32, #tpu.memory_space<vmem>>, vector<1x1x128xf32>
    %8 = vector.shape_cast %7 : vector<1x1x128xf32> to vector<1x128xf32>
    %9 = arith.addf %4, %6 : vector<8x128xf32>
    %10 = arith.truncf %4 : vector<8x128xf32> to vector<8x128xbf16>
    %c0_9 = arith.constant 0 : index
    %c0_10 = arith.constant 0 : index
    %c0_11 = arith.constant 0 : index
    %11 = vector.load %arg7[%c0_9, %c0_10, %c0_11] : memref<1x128x384xbf16, #tpu.memory_space<vmem>>, vector<1x128x384xbf16>
    %12 = vector.shape_cast %11 : vector<1x128x384xbf16> to vector<128x384xbf16>
    %c0_12 = arith.constant 0 : index
    %c0_13 = arith.constant 0 : index
    %c0_14 = arith.constant 0 : index
    %13 = vector.load %arg8[%c0_12, %c0_13, %c0_14] : memref<1x128x128xbf16, #tpu.memory_space<vmem>>, vector<1x128x128xbf16>
    %14 = vector.shape_cast %13 : vector<1x128x128xbf16> to vector<128x128xbf16>
    %c0_15 = arith.constant 0 : index
    %c0_16 = arith.constant 0 : index
    %c0_17 = arith.constant 0 : index
    %15 = vector.load %arg9[%c0_15, %c0_16, %c0_17] : memref<1x1x128xf32, #tpu.memory_space<vmem>>, vector<1x1x128xf32>
    %16 = vector.shape_cast %15 : vector<1x1x128xf32> to vector<1x128xf32>
    %17 = arith.truncf %9 : vector<8x128xf32> to vector<8x128xbf16>
    %18 = vector.extract_strided_slice %12 {offsets = [0, 0], sizes = [128, 256], strides = [1, 1]} : vector<128x384xbf16> to vector<128x256xbf16>
    %cst = arith.constant dense<0.000000e+00> : vector<8x256xf32>
    %19 = tpu.matmul %17, %18, %cst {dimension_numbers = #tpu.dot_dimension_numbers<[1], [0], [0], [1], [0, 0, 1, 1], [], []>} : vector<8x128xbf16>, vector<128x256xbf16>, vector<8x256xf32> -> vector<8x256xf32>
    %20 = vector.extract_strided_slice %19 {offsets = [0, 0], sizes = [8, 128], strides = [1, 1]} : vector<8x256xf32> to vector<8x128xf32>
    %21 = vector.extract_strided_slice %19 {offsets = [0, 128], sizes = [8, 128], strides = [1, 1]} : vector<8x256xf32> to vector<8x128xf32>
    %22 = vector.extract_strided_slice %12 {offsets = [0, 256], sizes = [128, 128], strides = [1, 1]} : vector<128x384xbf16> to vector<128x128xbf16>
    %cst_18 = arith.constant dense<0.000000e+00> : vector<8x128xf32>
    %23 = tpu.matmul %10, %22, %cst_18 {dimension_numbers = #tpu.dot_dimension_numbers<[1], [0], [0], [1], [0, 0, 1, 1], [], []>} : vector<8x128xbf16>, vector<128x128xbf16>, vector<8x128xf32> -> vector<8x128xf32>
    %cst_19 = arith.constant 0.176776692 : f32
    %24 = vector.broadcast %cst_19 : f32 to vector<8x128xf32>
    %25 = arith.mulf %20, %24 : vector<8x128xf32>
    %26 = arith.truncf %25 : vector<8x128xf32> to vector<8x128xbf16>
    %27 = arith.truncf %21 : vector<8x128xf32> to vector<8x128xbf16>
    %28 = arith.truncf %23 : vector<8x128xf32> to vector<8x128xbf16>
    %29 = vector.extract_strided_slice %26 {offsets = [0, 0], sizes = [8, 32], strides = [1, 1]} : vector<8x128xbf16> to vector<8x32xbf16>
    %30 = vector.extract_strided_slice %27 {offsets = [0, 0], sizes = [8, 32], strides = [1, 1]} : vector<8x128xbf16> to vector<8x32xbf16>
    %cst_20 = arith.constant dense<0.000000e+00> : vector<8x8xf32>
    %31 = tpu.matmul %29, %30, %cst_20 {dimension_numbers = #tpu.dot_dimension_numbers<[1], [1], [0], [0], [0, 0, 1, 0], [], []>} : vector<8x32xbf16>, vector<8x32xbf16>, vector<8x8xf32> -> vector<8x8xf32>
    %32 = vector.extract_strided_slice %26 {offsets = [0, 32], sizes = [8, 32], strides = [1, 1]} : vector<8x128xbf16> to vector<8x32xbf16>
    %33 = vector.extract_strided_slice %27 {offsets = [0, 32], sizes = [8, 32], strides = [1, 1]} : vector<8x128xbf16> to vector<8x32xbf16>
    %cst_21 = arith.constant dense<0.000000e+00> : vector<8x8xf32>
    %34 = tpu.matmul %32, %33, %cst_21 {dimension_numbers = #tpu.dot_dimension_numbers<[1], [1], [0], [0], [0, 0, 1, 0], [], []>} : vector<8x32xbf16>, vector<8x32xbf16>, vector<8x8xf32> -> vector<8x8xf32>
    %35 = vector.extract_strided_slice %26 {offsets = [0, 64], sizes = [8, 32], strides = [1, 1]} : vector<8x128xbf16> to vector<8x32xbf16>
    %36 = vector.extract_strided_slice %27 {offsets = [0, 64], sizes = [8, 32], strides = [1, 1]} : vector<8x128xbf16> to vector<8x32xbf16>
    %cst_22 = arith.constant dense<0.000000e+00> : vector<8x8xf32>
    %37 = tpu.matmul %35, %36, %cst_22 {dimension_numbers = #tpu.dot_dimension_numbers<[1], [1], [0], [0], [0, 0, 1, 0], [], []>} : vector<8x32xbf16>, vector<8x32xbf16>, vector<8x8xf32> -> vector<8x8xf32>
    %38 = vector.extract_strided_slice %26 {offsets = [0, 96], sizes = [8, 32], strides = [1, 1]} : vector<8x128xbf16> to vector<8x32xbf16>
    %39 = vector.extract_strided_slice %27 {offsets = [0, 96], sizes = [8, 32], strides = [1, 1]} : vector<8x128xbf16> to vector<8x32xbf16>
    %cst_23 = arith.constant dense<0.000000e+00> : vector<8x8xf32>
    %40 = tpu.matmul %38, %39, %cst_23 {dimension_numbers = #tpu.dot_dimension_numbers<[1], [1], [0], [0], [0, 0, 1, 0], [], []>} : vector<8x32xbf16>, vector<8x32xbf16>, vector<8x8xf32> -> vector<8x8xf32>
    %41 = tpu.concatenate %31, %34, %37, %40 in 0 : vector<8x8xf32>, vector<8x8xf32>, vector<8x8xf32>, vector<8x8xf32> -> vector<32x8xf32>
    %cst_24 = arith.constant dense<0xFF800000> : vector<32xf32>
    %42 = vector.multi_reduction <maximumf>, %41, %cst_24 [1] : vector<32x8xf32> to vector<32xf32>
    %43 = vector.shape_cast %42 : vector<32xf32> to vector<32x1xf32>
    %44 = vector.broadcast %43 : vector<32x1xf32> to vector<32x8xf32>
    %45 = arith.subf %41, %44 : vector<32x8xf32>
    %46 = math.exp %45 : vector<32x8xf32>
    %cst_25 = arith.constant dense<0.000000e+00> : vector<32xf32>
    %47 = vector.multi_reduction <add>, %46, %cst_25 [1] : vector<32x8xf32> to vector<32xf32>
    %48 = vector.shape_cast %47 : vector<32xf32> to vector<32x1xf32>
    %49 = tpu.reciprocal %48 {approx = true} : vector<32x1xf32> -> vector<32x1xf32>
    %50 = vector.broadcast %49 : vector<32x1xf32> to vector<32x8xf32>
    %51 = arith.mulf %46, %50 : vector<32x8xf32>
    %52 = vector.extract_strided_slice %51 {offsets = [0, 0], sizes = [8, 8], strides = [1, 1]} : vector<32x8xf32> to vector<8x8xf32>
    %53 = arith.truncf %52 : vector<8x8xf32> to vector<8x8xbf16>
    %54 = vector.extract_strided_slice %28 {offsets = [0, 0], sizes = [8, 32], strides = [1, 1]} : vector<8x128xbf16> to vector<8x32xbf16>
    %cst_26 = arith.constant dense<0.000000e+00> : vector<8x32xf32>
    %55 = tpu.matmul %53, %54, %cst_26 {dimension_numbers = #tpu.dot_dimension_numbers<[1], [0], [0], [1], [0, 0, 1, 1], [], []>} : vector<8x8xbf16>, vector<8x32xbf16>, vector<8x32xf32> -> vector<8x32xf32>
    %56 = vector.extract_strided_slice %51 {offsets = [8, 0], sizes = [8, 8], strides = [1, 1]} : vector<32x8xf32> to vector<8x8xf32>
    %57 = arith.truncf %56 : vector<8x8xf32> to vector<8x8xbf16>
    %58 = vector.extract_strided_slice %28 {offsets = [0, 32], sizes = [8, 32], strides = [1, 1]} : vector<8x128xbf16> to vector<8x32xbf16>
    %cst_27 = arith.constant dense<0.000000e+00> : vector<8x32xf32>
    %59 = tpu.matmul %57, %58, %cst_27 {dimension_numbers = #tpu.dot_dimension_numbers<[1], [0], [0], [1], [0, 0, 1, 1], [], []>} : vector<8x8xbf16>, vector<8x32xbf16>, vector<8x32xf32> -> vector<8x32xf32>
    %60 = vector.extract_strided_slice %51 {offsets = [16, 0], sizes = [8, 8], strides = [1, 1]} : vector<32x8xf32> to vector<8x8xf32>
    %61 = arith.truncf %60 : vector<8x8xf32> to vector<8x8xbf16>
    %62 = vector.extract_strided_slice %28 {offsets = [0, 64], sizes = [8, 32], strides = [1, 1]} : vector<8x128xbf16> to vector<8x32xbf16>
    %cst_28 = arith.constant dense<0.000000e+00> : vector<8x32xf32>
    %63 = tpu.matmul %61, %62, %cst_28 {dimension_numbers = #tpu.dot_dimension_numbers<[1], [0], [0], [1], [0, 0, 1, 1], [], []>} : vector<8x8xbf16>, vector<8x32xbf16>, vector<8x32xf32> -> vector<8x32xf32>
    %64 = vector.extract_strided_slice %51 {offsets = [24, 0], sizes = [8, 8], strides = [1, 1]} : vector<32x8xf32> to vector<8x8xf32>
    %65 = arith.truncf %64 : vector<8x8xf32> to vector<8x8xbf16>
    %66 = vector.extract_strided_slice %28 {offsets = [0, 96], sizes = [8, 32], strides = [1, 1]} : vector<8x128xbf16> to vector<8x32xbf16>
    %cst_29 = arith.constant dense<0.000000e+00> : vector<8x32xf32>
    %67 = tpu.matmul %65, %66, %cst_29 {dimension_numbers = #tpu.dot_dimension_numbers<[1], [0], [0], [1], [0, 0, 1, 1], [], []>} : vector<8x8xbf16>, vector<8x32xbf16>, vector<8x32xf32> -> vector<8x32xf32>
    %68 = tpu.concatenate %55, %59, %63, %67 in 1 : vector<8x32xf32>, vector<8x32xf32>, vector<8x32xf32>, vector<8x32xf32> -> vector<8x128xf32>
    %69 = arith.truncf %68 : vector<8x128xf32> to vector<8x128xbf16>
    %cst_30 = arith.constant dense<0.000000e+00> : vector<8x128xf32>
    %70 = tpu.matmul %69, %14, %cst_30 {dimension_numbers = #tpu.dot_dimension_numbers<[1], [0], [0], [1], [0, 0, 1, 1], [], []>} : vector<8x128xbf16>, vector<128x128xbf16>, vector<8x128xf32> -> vector<8x128xf32>
    %71 = vector.broadcast %16 : vector<1x128xf32> to vector<8x128xf32>
    %72 = arith.addf %70, %71 : vector<8x128xf32>
    %c0_31 = arith.constant 0 : index
    %c0_32 = arith.constant 0 : index
    %c0_33 = arith.constant 0 : index
    %73 = vector.load %arg10[%c0_31, %c0_32, %c0_33] : memref<1x1x128xf32, #tpu.memory_space<vmem>>, vector<1x1x128xf32>
    %74 = vector.shape_cast %73 : vector<1x1x128xf32> to vector<1x128xf32>
    %c0_34 = arith.constant 0 : index
    %c0_35 = arith.constant 0 : index
    %c0_36 = arith.constant 0 : index
    %75 = vector.load %arg11[%c0_34, %c0_35, %c0_36] : memref<1x1x128xf32, #tpu.memory_space<vmem>>, vector<1x1x128xf32>
    %76 = vector.shape_cast %75 : vector<1x1x128xf32> to vector<1x128xf32>
    %77 = arith.addf %4, %72 : vector<8x128xf32>
    %cst_37 = arith.constant dense<0.000000e+00> : vector<8xf32>
    %78 = vector.multi_reduction <add>, %77, %cst_37 [1] : vector<8x128xf32> to vector<8xf32>
    %79 = vector.shape_cast %78 : vector<8xf32> to vector<8x1xf32>
    %cst_38 = arith.constant 1.280000e+02 : f32
    %80 = vector.broadcast %cst_38 : f32 to vector<8x1xf32>
    %81 = arith.divf %79, %80 : vector<8x1xf32>
    %82 = vector.broadcast %81 : vector<8x1xf32> to vector<8x128xf32>
    %83 = arith.subf %77, %82 : vector<8x128xf32>
    %84 = arith.mulf %83, %83 : vector<8x128xf32>
    %cst_39 = arith.constant dense<0.000000e+00> : vector<8xf32>
    %85 = vector.multi_reduction <add>, %84, %cst_39 [1] : vector<8x128xf32> to vector<8xf32>
    %86 = vector.shape_cast %85 : vector<8xf32> to vector<8x1xf32>
    %cst_40 = arith.constant 1.280000e+02 : f32
    %87 = vector.broadcast %cst_40 : f32 to vector<8x1xf32>
    %88 = arith.divf %86, %87 : vector<8x1xf32>
    %89 = vector.broadcast %81 : vector<8x1xf32> to vector<8x128xf32>
    %90 = arith.subf %77, %89 : vector<8x128xf32>
    %cst_41 = arith.constant 9.99999974E-6 : f32
    %91 = vector.broadcast %cst_41 : f32 to vector<8x1xf32>
    %92 = arith.addf %88, %91 : vector<8x1xf32>
    %93 = math.rsqrt %92 : vector<8x1xf32>
    %94 = vector.broadcast %93 : vector<8x1xf32> to vector<8x128xf32>
    %95 = arith.mulf %90, %94 : vector<8x128xf32>
    %96 = vector.broadcast %74 : vector<1x128xf32> to vector<8x128xf32>
    %97 = arith.mulf %95, %96 : vector<8x128xf32>
    %98 = vector.broadcast %76 : vector<1x128xf32> to vector<8x128xf32>
    %99 = arith.addf %97, %98 : vector<8x128xf32>
    %100 = arith.addf %99, %6 : vector<8x128xf32>
    %c0_42 = arith.constant 0 : index
    %c0_43 = arith.constant 0 : index
    %c0_44 = arith.constant 0 : index
    %101 = vector.load %arg4[%c0_42, %c0_43, %c0_44] : memref<1x128x128xbf16, #tpu.memory_space<vmem>>, vector<1x128x128xbf16>
    %102 = vector.shape_cast %101 : vector<1x128x128xbf16> to vector<128x128xbf16>
    %c0_45 = arith.constant 0 : index
    %c0_46 = arith.constant 0 : index
    %c0_47 = arith.constant 0 : index
    %103 = vector.load %arg3[%c0_45, %c0_46, %c0_47] : memref<1x128x128xbf16, #tpu.memory_space<vmem>>, vector<1x128x128xbf16>
    %104 = vector.shape_cast %103 : vector<1x128x128xbf16> to vector<128x128xbf16>
    %c0_48 = arith.constant 0 : index
    %c0_49 = arith.constant 0 : index
    %c0_50 = arith.constant 0 : index
    %105 = vector.load %arg12[%c0_48, %c0_49, %c0_50] : memref<1x128x384xbf16, #tpu.memory_space<vmem>>, vector<1x128x384xbf16>
    %106 = vector.shape_cast %105 : vector<1x128x384xbf16> to vector<128x384xbf16>
    %c0_51 = arith.constant 0 : index
    %c0_52 = arith.constant 0 : index
    %c0_53 = arith.constant 0 : index
    %107 = vector.load %arg13[%c0_51, %c0_52, %c0_53] : memref<1x128x128xbf16, #tpu.memory_space<vmem>>, vector<1x128x128xbf16>
    %108 = vector.shape_cast %107 : vector<1x128x128xbf16> to vector<128x128xbf16>
    %c0_54 = arith.constant 0 : index
    %c0_55 = arith.constant 0 : index
    %c0_56 = arith.constant 0 : index
    %109 = vector.load %arg14[%c0_54, %c0_55, %c0_56] : memref<1x1x128xf32, #tpu.memory_space<vmem>>, vector<1x1x128xf32>
    %110 = vector.shape_cast %109 : vector<1x1x128xf32> to vector<1x128xf32>
    %111 = arith.truncf %100 : vector<8x128xf32> to vector<8x128xbf16>
    %112 = vector.extract_strided_slice %106 {offsets = [0, 0], sizes = [128, 128], strides = [1, 1]} : vector<128x384xbf16> to vector<128x128xbf16>
    %cst_57 = arith.constant dense<0.000000e+00> : vector<8x128xf32>
    %113 = tpu.matmul %111, %112, %cst_57 {dimension_numbers = #tpu.dot_dimension_numbers<[1], [0], [0], [1], [0, 0, 1, 1], [], []>} : vector<8x128xbf16>, vector<128x128xbf16>, vector<8x128xf32> -> vector<8x128xf32>
    %114 = vector.extract_strided_slice %106 {offsets = [0, 128], sizes = [128, 128], strides = [1, 1]} : vector<128x384xbf16> to vector<128x128xbf16>
    %cst_58 = arith.constant dense<0.000000e+00> : vector<128x128xf32>
    %115 = tpu.matmul %102, %114, %cst_58 {dimension_numbers = #tpu.dot_dimension_numbers<[1], [0], [0], [1], [0, 0, 1, 1], [], []>} : vector<128x128xbf16>, vector<128x128xbf16>, vector<128x128xf32> -> vector<128x128xf32>
    %116 = vector.extract_strided_slice %106 {offsets = [0, 256], sizes = [128, 128], strides = [1, 1]} : vector<128x384xbf16> to vector<128x128xbf16>
    %cst_59 = arith.constant dense<0.000000e+00> : vector<128x128xf32>
    %117 = tpu.matmul %104, %116, %cst_59 {dimension_numbers = #tpu.dot_dimension_numbers<[1], [0], [0], [1], [0, 0, 1, 1], [], []>} : vector<128x128xbf16>, vector<128x128xbf16>, vector<128x128xf32> -> vector<128x128xf32>
    %cst_60 = arith.constant 0.176776692 : f32
    %118 = vector.broadcast %cst_60 : f32 to vector<8x128xf32>
    %119 = arith.mulf %113, %118 : vector<8x128xf32>
    %120 = arith.truncf %119 : vector<8x128xf32> to vector<8x128xbf16>
    %121 = arith.truncf %115 : vector<128x128xf32> to vector<128x128xbf16>
    %122 = arith.truncf %117 : vector<128x128xf32> to vector<128x128xbf16>
    %123 = vector.extract_strided_slice %120 {offsets = [0, 0], sizes = [8, 32], strides = [1, 1]} : vector<8x128xbf16> to vector<8x32xbf16>
    %124 = vector.extract_strided_slice %121 {offsets = [0, 0], sizes = [128, 32], strides = [1, 1]} : vector<128x128xbf16> to vector<128x32xbf16>
    %cst_61 = arith.constant dense<0.000000e+00> : vector<8x128xf32>
    %125 = tpu.matmul %123, %124, %cst_61 {dimension_numbers = #tpu.dot_dimension_numbers<[1], [1], [0], [0], [0, 0, 1, 0], [], []>} : vector<8x32xbf16>, vector<128x32xbf16>, vector<8x128xf32> -> vector<8x128xf32>
    %126 = vector.extract_strided_slice %120 {offsets = [0, 32], sizes = [8, 32], strides = [1, 1]} : vector<8x128xbf16> to vector<8x32xbf16>
    %127 = vector.extract_strided_slice %121 {offsets = [0, 32], sizes = [128, 32], strides = [1, 1]} : vector<128x128xbf16> to vector<128x32xbf16>
    %cst_62 = arith.constant dense<0.000000e+00> : vector<8x128xf32>
    %128 = tpu.matmul %126, %127, %cst_62 {dimension_numbers = #tpu.dot_dimension_numbers<[1], [1], [0], [0], [0, 0, 1, 0], [], []>} : vector<8x32xbf16>, vector<128x32xbf16>, vector<8x128xf32> -> vector<8x128xf32>
    %129 = vector.extract_strided_slice %120 {offsets = [0, 64], sizes = [8, 32], strides = [1, 1]} : vector<8x128xbf16> to vector<8x32xbf16>
    %130 = vector.extract_strided_slice %121 {offsets = [0, 64], sizes = [128, 32], strides = [1, 1]} : vector<128x128xbf16> to vector<128x32xbf16>
    %cst_63 = arith.constant dense<0.000000e+00> : vector<8x128xf32>
    %131 = tpu.matmul %129, %130, %cst_63 {dimension_numbers = #tpu.dot_dimension_numbers<[1], [1], [0], [0], [0, 0, 1, 0], [], []>} : vector<8x32xbf16>, vector<128x32xbf16>, vector<8x128xf32> -> vector<8x128xf32>
    %132 = vector.extract_strided_slice %120 {offsets = [0, 96], sizes = [8, 32], strides = [1, 1]} : vector<8x128xbf16> to vector<8x32xbf16>
    %133 = vector.extract_strided_slice %121 {offsets = [0, 96], sizes = [128, 32], strides = [1, 1]} : vector<128x128xbf16> to vector<128x32xbf16>
    %cst_64 = arith.constant dense<0.000000e+00> : vector<8x128xf32>
    %134 = tpu.matmul %132, %133, %cst_64 {dimension_numbers = #tpu.dot_dimension_numbers<[1], [1], [0], [0], [0, 0, 1, 0], [], []>} : vector<8x32xbf16>, vector<128x32xbf16>, vector<8x128xf32> -> vector<8x128xf32>
    %135 = tpu.concatenate %125, %128, %131, %134 in 0 : vector<8x128xf32>, vector<8x128xf32>, vector<8x128xf32>, vector<8x128xf32> -> vector<32x128xf32>
    %136 = vector.broadcast %8 : vector<1x128xf32> to vector<32x128xf32>
    %137 = arith.addf %135, %136 : vector<32x128xf32>
    %cst_65 = arith.constant dense<0xFF800000> : vector<32xf32>
    %138 = vector.multi_reduction <maximumf>, %137, %cst_65 [1] : vector<32x128xf32> to vector<32xf32>
    %139 = vector.shape_cast %138 : vector<32xf32> to vector<32x1xf32>
    %140 = vector.broadcast %139 : vector<32x1xf32> to vector<32x128xf32>
    %141 = arith.subf %137, %140 : vector<32x128xf32>
    %142 = math.exp %141 : vector<32x128xf32>
    %cst_66 = arith.constant dense<0.000000e+00> : vector<32xf32>
    %143 = vector.multi_reduction <add>, %142, %cst_66 [1] : vector<32x128xf32> to vector<32xf32>
    %144 = vector.shape_cast %143 : vector<32xf32> to vector<32x1xf32>
    %145 = tpu.reciprocal %144 {approx = true} : vector<32x1xf32> -> vector<32x1xf32>
    %146 = vector.broadcast %145 : vector<32x1xf32> to vector<32x128xf32>
    %147 = arith.mulf %142, %146 : vector<32x128xf32>
    %148 = vector.extract_strided_slice %147 {offsets = [0, 0], sizes = [8, 128], strides = [1, 1]} : vector<32x128xf32> to vector<8x128xf32>
    %149 = arith.truncf %148 : vector<8x128xf32> to vector<8x128xbf16>
    %150 = vector.extract_strided_slice %122 {offsets = [0, 0], sizes = [128, 32], strides = [1, 1]} : vector<128x128xbf16> to vector<128x32xbf16>
    %cst_67 = arith.constant dense<0.000000e+00> : vector<8x32xf32>
    %151 = tpu.matmul %149, %150, %cst_67 {dimension_numbers = #tpu.dot_dimension_numbers<[1], [0], [0], [1], [0, 0, 1, 1], [], []>} : vector<8x128xbf16>, vector<128x32xbf16>, vector<8x32xf32> -> vector<8x32xf32>
    %152 = vector.extract_strided_slice %147 {offsets = [8, 0], sizes = [8, 128], strides = [1, 1]} : vector<32x128xf32> to vector<8x128xf32>
    %153 = arith.truncf %152 : vector<8x128xf32> to vector<8x128xbf16>
    %154 = vector.extract_strided_slice %122 {offsets = [0, 32], sizes = [128, 32], strides = [1, 1]} : vector<128x128xbf16> to vector<128x32xbf16>
    %cst_68 = arith.constant dense<0.000000e+00> : vector<8x32xf32>
    %155 = tpu.matmul %153, %154, %cst_68 {dimension_numbers = #tpu.dot_dimension_numbers<[1], [0], [0], [1], [0, 0, 1, 1], [], []>} : vector<8x128xbf16>, vector<128x32xbf16>, vector<8x32xf32> -> vector<8x32xf32>
    %156 = vector.extract_strided_slice %147 {offsets = [16, 0], sizes = [8, 128], strides = [1, 1]} : vector<32x128xf32> to vector<8x128xf32>
    %157 = arith.truncf %156 : vector<8x128xf32> to vector<8x128xbf16>
    %158 = vector.extract_strided_slice %122 {offsets = [0, 64], sizes = [128, 32], strides = [1, 1]} : vector<128x128xbf16> to vector<128x32xbf16>
    %cst_69 = arith.constant dense<0.000000e+00> : vector<8x32xf32>
    %159 = tpu.matmul %157, %158, %cst_69 {dimension_numbers = #tpu.dot_dimension_numbers<[1], [0], [0], [1], [0, 0, 1, 1], [], []>} : vector<8x128xbf16>, vector<128x32xbf16>, vector<8x32xf32> -> vector<8x32xf32>
    %160 = vector.extract_strided_slice %147 {offsets = [24, 0], sizes = [8, 128], strides = [1, 1]} : vector<32x128xf32> to vector<8x128xf32>
    %161 = arith.truncf %160 : vector<8x128xf32> to vector<8x128xbf16>
    %162 = vector.extract_strided_slice %122 {offsets = [0, 96], sizes = [128, 32], strides = [1, 1]} : vector<128x128xbf16> to vector<128x32xbf16>
    %cst_70 = arith.constant dense<0.000000e+00> : vector<8x32xf32>
    %163 = tpu.matmul %161, %162, %cst_70 {dimension_numbers = #tpu.dot_dimension_numbers<[1], [0], [0], [1], [0, 0, 1, 1], [], []>} : vector<8x128xbf16>, vector<128x32xbf16>, vector<8x32xf32> -> vector<8x32xf32>
    %164 = tpu.concatenate %151, %155, %159, %163 in 1 : vector<8x32xf32>, vector<8x32xf32>, vector<8x32xf32>, vector<8x32xf32> -> vector<8x128xf32>
    %165 = arith.truncf %164 : vector<8x128xf32> to vector<8x128xbf16>
    %cst_71 = arith.constant dense<0.000000e+00> : vector<8x128xf32>
    %166 = tpu.matmul %165, %108, %cst_71 {dimension_numbers = #tpu.dot_dimension_numbers<[1], [0], [0], [1], [0, 0, 1, 1], [], []>} : vector<8x128xbf16>, vector<128x128xbf16>, vector<8x128xf32> -> vector<8x128xf32>
    %167 = vector.broadcast %110 : vector<1x128xf32> to vector<8x128xf32>
    %168 = arith.addf %166, %167 : vector<8x128xf32>
    %c0_72 = arith.constant 0 : index
    %c0_73 = arith.constant 0 : index
    %c0_74 = arith.constant 0 : index
    %169 = vector.load %arg15[%c0_72, %c0_73, %c0_74] : memref<1x1x128xf32, #tpu.memory_space<vmem>>, vector<1x1x128xf32>
    %170 = vector.shape_cast %169 : vector<1x1x128xf32> to vector<1x128xf32>
    %c0_75 = arith.constant 0 : index
    %c0_76 = arith.constant 0 : index
    %c0_77 = arith.constant 0 : index
    %171 = vector.load %arg16[%c0_75, %c0_76, %c0_77] : memref<1x1x128xf32, #tpu.memory_space<vmem>>, vector<1x1x128xf32>
    %172 = vector.shape_cast %171 : vector<1x1x128xf32> to vector<1x128xf32>
    %173 = arith.addf %99, %168 : vector<8x128xf32>
    %cst_78 = arith.constant dense<0.000000e+00> : vector<8xf32>
    %174 = vector.multi_reduction <add>, %173, %cst_78 [1] : vector<8x128xf32> to vector<8xf32>
    %175 = vector.shape_cast %174 : vector<8xf32> to vector<8x1xf32>
    %cst_79 = arith.constant 1.280000e+02 : f32
    %176 = vector.broadcast %cst_79 : f32 to vector<8x1xf32>
    %177 = arith.divf %175, %176 : vector<8x1xf32>
    %178 = vector.broadcast %177 : vector<8x1xf32> to vector<8x128xf32>
    %179 = arith.subf %173, %178 : vector<8x128xf32>
    %180 = arith.mulf %179, %179 : vector<8x128xf32>
    %cst_80 = arith.constant dense<0.000000e+00> : vector<8xf32>
    %181 = vector.multi_reduction <add>, %180, %cst_80 [1] : vector<8x128xf32> to vector<8xf32>
    %182 = vector.shape_cast %181 : vector<8xf32> to vector<8x1xf32>
    %cst_81 = arith.constant 1.280000e+02 : f32
    %183 = vector.broadcast %cst_81 : f32 to vector<8x1xf32>
    %184 = arith.divf %182, %183 : vector<8x1xf32>
    %185 = vector.broadcast %177 : vector<8x1xf32> to vector<8x128xf32>
    %186 = arith.subf %173, %185 : vector<8x128xf32>
    %cst_82 = arith.constant 9.99999974E-6 : f32
    %187 = vector.broadcast %cst_82 : f32 to vector<8x1xf32>
    %188 = arith.addf %184, %187 : vector<8x1xf32>
    %189 = math.rsqrt %188 : vector<8x1xf32>
    %190 = vector.broadcast %189 : vector<8x1xf32> to vector<8x128xf32>
    %191 = arith.mulf %186, %190 : vector<8x128xf32>
    %192 = vector.broadcast %170 : vector<1x128xf32> to vector<8x128xf32>
    %193 = arith.mulf %191, %192 : vector<8x128xf32>
    %194 = vector.broadcast %172 : vector<1x128xf32> to vector<8x128xf32>
    %195 = arith.addf %193, %194 : vector<8x128xf32>
    %196 = arith.truncf %195 : vector<8x128xf32> to vector<8x128xbf16>
    %c0_83 = arith.constant 0 : index
    %c0_84 = arith.constant 0 : index
    %c0_85 = arith.constant 0 : index
    %197 = vector.load %arg17[%c0_83, %c0_84, %c0_85] : memref<1x128x256xbf16, #tpu.memory_space<vmem>>, vector<1x128x256xbf16>
    %198 = vector.shape_cast %197 : vector<1x128x256xbf16> to vector<128x256xbf16>
    %cst_86 = arith.constant dense<0.000000e+00> : vector<8x256xf32>
    %199 = tpu.matmul %196, %198, %cst_86 {dimension_numbers = #tpu.dot_dimension_numbers<[1], [0], [0], [1], [0, 0, 1, 1], [], []>} : vector<8x128xbf16>, vector<128x256xbf16>, vector<8x256xf32> -> vector<8x256xf32>
    %c0_87 = arith.constant 0 : index
    %c0_88 = arith.constant 0 : index
    %c0_89 = arith.constant 0 : index
    %200 = vector.load %arg18[%c0_87, %c0_88, %c0_89] : memref<1x1x256xf32, #tpu.memory_space<vmem>>, vector<1x1x256xf32>
    %201 = vector.shape_cast %200 : vector<1x1x256xf32> to vector<1x256xf32>
    %202 = vector.broadcast %201 : vector<1x256xf32> to vector<8x256xf32>
    %203 = arith.addf %199, %202 : vector<8x256xf32>
    %204 = arith.mulf %203, %203 : vector<8x256xf32>
    %205 = arith.mulf %203, %204 : vector<8x256xf32>
    %cst_90 = arith.constant 4.471500e-02 : f32
    %206 = vector.broadcast %cst_90 : f32 to vector<8x256xf32>
    %207 = arith.mulf %206, %205 : vector<8x256xf32>
    %208 = arith.addf %203, %207 : vector<8x256xf32>
    %cst_91 = arith.constant 0.797884583 : f32
    %209 = vector.broadcast %cst_91 : f32 to vector<8x256xf32>
    %210 = arith.mulf %209, %208 : vector<8x256xf32>
    %211 = math.tanh %210 : vector<8x256xf32>
    %cst_92 = arith.constant 1.000000e+00 : f32
    %212 = vector.broadcast %cst_92 : f32 to vector<8x256xf32>
    %213 = arith.addf %212, %211 : vector<8x256xf32>
    %cst_93 = arith.constant 5.000000e-01 : f32
    %214 = vector.broadcast %cst_93 : f32 to vector<8x256xf32>
    %215 = arith.mulf %214, %213 : vector<8x256xf32>
    %216 = arith.mulf %203, %215 : vector<8x256xf32>
    %217 = arith.truncf %216 : vector<8x256xf32> to vector<8x256xbf16>
    %c0_94 = arith.constant 0 : index
    %c0_95 = arith.constant 0 : index
    %c0_96 = arith.constant 0 : index
    %218 = vector.load %arg19[%c0_94, %c0_95, %c0_96] : memref<1x256x128xbf16, #tpu.memory_space<vmem>>, vector<1x256x128xbf16>
    %219 = vector.shape_cast %218 : vector<1x256x128xbf16> to vector<256x128xbf16>
    %cst_97 = arith.constant dense<0.000000e+00> : vector<8x128xf32>
    %220 = tpu.matmul %217, %219, %cst_97 {dimension_numbers = #tpu.dot_dimension_numbers<[1], [0], [0], [1], [0, 0, 1, 1], [], []>} : vector<8x256xbf16>, vector<256x128xbf16>, vector<8x128xf32> -> vector<8x128xf32>
    %c0_98 = arith.constant 0 : index
    %c0_99 = arith.constant 0 : index
    %c0_100 = arith.constant 0 : index
    %221 = vector.load %arg20[%c0_98, %c0_99, %c0_100] : memref<1x1x128xf32, #tpu.memory_space<vmem>>, vector<1x1x128xf32>
    %222 = vector.shape_cast %221 : vector<1x1x128xf32> to vector<1x128xf32>
    %223 = vector.broadcast %222 : vector<1x128xf32> to vector<8x128xf32>
    %224 = arith.addf %220, %223 : vector<8x128xf32>
    %c0_101 = arith.constant 0 : index
    %c0_102 = arith.constant 0 : index
    %c0_103 = arith.constant 0 : index
    %225 = vector.load %arg21[%c0_101, %c0_102, %c0_103] : memref<1x1x128xf32, #tpu.memory_space<vmem>>, vector<1x1x128xf32>
    %226 = vector.shape_cast %225 : vector<1x1x128xf32> to vector<1x128xf32>
    %c0_104 = arith.constant 0 : index
    %c0_105 = arith.constant 0 : index
    %c0_106 = arith.constant 0 : index
    %227 = vector.load %arg22[%c0_104, %c0_105, %c0_106] : memref<1x1x128xf32, #tpu.memory_space<vmem>>, vector<1x1x128xf32>
    %228 = vector.shape_cast %227 : vector<1x1x128xf32> to vector<1x128xf32>
    %229 = arith.addf %195, %224 : vector<8x128xf32>
    %cst_107 = arith.constant dense<0.000000e+00> : vector<8xf32>
    %230 = vector.multi_reduction <add>, %229, %cst_107 [1] : vector<8x128xf32> to vector<8xf32>
    %231 = vector.shape_cast %230 : vector<8xf32> to vector<8x1xf32>
    %cst_108 = arith.constant 1.280000e+02 : f32
    %232 = vector.broadcast %cst_108 : f32 to vector<8x1xf32>
    %233 = arith.divf %231, %232 : vector<8x1xf32>
    %234 = vector.broadcast %233 : vector<8x1xf32> to vector<8x128xf32>
    %235 = arith.subf %229, %234 : vector<8x128xf32>
    %236 = arith.mulf %235, %235 : vector<8x128xf32>
    %cst_109 = arith.constant dense<0.000000e+00> : vector<8xf32>
    %237 = vector.multi_reduction <add>, %236, %cst_109 [1] : vector<8x128xf32> to vector<8xf32>
    %238 = vector.shape_cast %237 : vector<8xf32> to vector<8x1xf32>
    %cst_110 = arith.constant 1.280000e+02 : f32
    %239 = vector.broadcast %cst_110 : f32 to vector<8x1xf32>
    %240 = arith.divf %238, %239 : vector<8x1xf32>
    %241 = vector.broadcast %233 : vector<8x1xf32> to vector<8x128xf32>
    %242 = arith.subf %229, %241 : vector<8x128xf32>
    %cst_111 = arith.constant 9.99999974E-6 : f32
    %243 = vector.broadcast %cst_111 : f32 to vector<8x1xf32>
    %244 = arith.addf %240, %243 : vector<8x1xf32>
    %245 = math.rsqrt %244 : vector<8x1xf32>
    %246 = vector.broadcast %245 : vector<8x1xf32> to vector<8x128xf32>
    %247 = arith.mulf %242, %246 : vector<8x128xf32>
    %248 = vector.broadcast %226 : vector<1x128xf32> to vector<8x128xf32>
    %249 = arith.mulf %247, %248 : vector<8x128xf32>
    %250 = vector.broadcast %228 : vector<1x128xf32> to vector<8x128xf32>
    %251 = arith.addf %249, %250 : vector<8x128xf32>
    %c0_112 = arith.constant 0 : index
    %c0_113 = arith.constant 0 : index
    %c0_114 = arith.constant 0 : index
    %252 = vector.load %arg23[%c0_112, %c0_113, %c0_114] : memref<1x8x128xf32, #tpu.memory_space<vmem>>, vector<1x8x128xf32>
    %253 = vector.shape_cast %252 : vector<1x8x128xf32> to vector<8x128xf32>
    %254 = vector.shape_cast %251 : vector<8x128xf32> to vector<1x8x128xf32>
    tpu.vector_store %arg23[%c0_112, %c0_113, %c0_114], %254 {strides = array<i32>} : memref<1x8x128xf32, #tpu.memory_space<vmem>>, vector<1x8x128xf32>,
    return
  }
  func.func @transform_0(%arg0: i32, %arg1: i32) -> (i32, i32, i32) {
    %c0_i32 = arith.constant 0 : i32
    %c0_i32_0 = arith.constant 0 : i32
    %c0_i32_1 = arith.constant 0 : i32
    return %arg0, %c0_i32, %c0_i32_0 : i32, i32, i32
  }
  func.func @transform_1(%arg0: i32, %arg1: i32) -> (i32, i32, i32) {
    %c0_i32 = arith.constant 0 : i32
    %c0_i32_0 = arith.constant 0 : i32
    %c0_i32_1 = arith.constant 0 : i32
    return %arg0, %c0_i32, %c0_i32_0 : i32, i32, i32
  }
  func.func @transform_2(%arg0: i32, %arg1: i32) -> (i32, i32, i32) {
    %c0_i32 = arith.constant 0 : i32
    %c0_i32_0 = arith.constant 0 : i32
    %c0_i32_1 = arith.constant 0 : i32
    return %arg0, %c0_i32, %c0_i32_0 : i32, i32, i32
  }
  func.func @transform_3(%arg0: i32, %arg1: i32) -> (i32, i32, i32) {
    %c0_i32 = arith.constant 0 : i32
    %c0_i32_0 = arith.constant 0 : i32
    %c0_i32_1 = arith.constant 0 : i32
    %c0_i32_2 = arith.constant 0 : i32
    return %c0_i32, %c0_i32_0, %c0_i32_1 : i32, i32, i32
  }
  func.func @transform_4(%arg0: i32, %arg1: i32) -> (i32, i32, i32) {
    %c0_i32 = arith.constant 0 : i32
    %c0_i32_0 = arith.constant 0 : i32
    %c0_i32_1 = arith.constant 0 : i32
    return %arg0, %c0_i32, %c0_i32_0 : i32, i32, i32
  }
  func.func @transform_5(%arg0: i32, %arg1: i32) -> (i32, i32, i32) {
    %c0_i32 = arith.constant 0 : i32
    %c0_i32_0 = arith.constant 0 : i32
    %c0_i32_1 = arith.constant 0 : i32
    return %arg1, %c0_i32, %c0_i32_0 : i32, i32, i32
  }
  func.func @transform_6(%arg0: i32, %arg1: i32) -> (i32, i32, i32) {
    %c0_i32 = arith.constant 0 : i32
    %c0_i32_0 = arith.constant 0 : i32
    %c0_i32_1 = arith.constant 0 : i32
    return %arg1, %c0_i32, %c0_i32_0 : i32, i32, i32
  }
  func.func @transform_7(%arg0: i32, %arg1: i32) -> (i32, i32, i32) {
    %c0_i32 = arith.constant 0 : i32
    %c0_i32_0 = arith.constant 0 : i32
    %c0_i32_1 = arith.constant 0 : i32
    return %arg1, %c0_i32, %c0_i32_0 : i32, i32, i32
  }
  func.func @transform_8(%arg0: i32, %arg1: i32) -> (i32, i32, i32) {
    %c0_i32 = arith.constant 0 : i32
    %c0_i32_0 = arith.constant 0 : i32
    %c0_i32_1 = arith.constant 0 : i32
    return %arg1, %c0_i32, %c0_i32_0 : i32, i32, i32
  }
  func.func @transform_9(%arg0: i32, %arg1: i32) -> (i32, i32, i32) {
    %c0_i32 = arith.constant 0 : i32
    %c0_i32_0 = arith.constant 0 : i32
    %c0_i32_1 = arith.constant 0 : i32
    return %arg1, %c0_i32, %c0_i32_0 : i32, i32, i32
  }
  func.func @transform_10(%arg0: i32, %arg1: i32) -> (i32, i32, i32) {
    %c0_i32 = arith.constant 0 : i32
    %c0_i32_0 = arith.constant 0 : i32
    %c0_i32_1 = arith.constant 0 : i32
    return %arg1, %c0_i32, %c0_i32_0 : i32, i32, i32
  }
  func.func @transform_11(%arg0: i32, %arg1: i32) -> (i32, i32, i32) {
    %c0_i32 = arith.constant 0 : i32
    %c0_i32_0 = arith.constant 0 : i32
    %c0_i32_1 = arith.constant 0 : i32
    return %arg1, %c0_i32, %c0_i32_0 : i32, i32, i32
  }
  func.func @transform_12(%arg0: i32, %arg1: i32) -> (i32, i32, i32) {
    %c0_i32 = arith.constant 0 : i32
    %c0_i32_0 = arith.constant 0 : i32
    %c0_i32_1 = arith.constant 0 : i32
    return %arg1, %c0_i32, %c0_i32_0 : i32, i32, i32
  }
  func.func @transform_13(%arg0: i32, %arg1: i32) -> (i32, i32, i32) {
    %c0_i32 = arith.constant 0 : i32
    %c0_i32_0 = arith.constant 0 : i32
    %c0_i32_1 = arith.constant 0 : i32
    return %arg1, %c0_i32, %c0_i32_0 : i32, i32, i32
  }
  func.func @transform_14(%arg0: i32, %arg1: i32) -> (i32, i32, i32) {
    %c0_i32 = arith.constant 0 : i32
    %c0_i32_0 = arith.constant 0 : i32
    %c0_i32_1 = arith.constant 0 : i32
    return %arg1, %c0_i32, %c0_i32_0 : i32, i32, i32
  }
  func.func @transform_15(%arg0: i32, %arg1: i32) -> (i32, i32, i32) {
    %c0_i32 = arith.constant 0 : i32
    %c0_i32_0 = arith.constant 0 : i32
    %c0_i32_1 = arith.constant 0 : i32
    return %arg1, %c0_i32, %c0_i32_0 : i32, i32, i32
  }
  func.func @transform_16(%arg0: i32, %arg1: i32) -> (i32, i32, i32) {
    %c0_i32 = arith.constant 0 : i32
    %c0_i32_0 = arith.constant 0 : i32
    %c0_i32_1 = arith.constant 0 : i32
    return %arg1, %c0_i32, %c0_i32_0 : i32, i32, i32
  }
  func.func @transform_17(%arg0: i32, %arg1: i32) -> (i32, i32, i32) {
    %c0_i32 = arith.constant 0 : i32
    %c0_i32_0 = arith.constant 0 : i32
    %c0_i32_1 = arith.constant 0 : i32
    return %arg1, %c0_i32, %c0_i32_0 : i32, i32, i32
  }
  func.func @transform_18(%arg0: i32, %arg1: i32) -> (i32, i32, i32) {
    %c0_i32 = arith.constant 0 : i32
    %c0_i32_0 = arith.constant 0 : i32
    %c0_i32_1 = arith.constant 0 : i32
    return %arg1, %c0_i32, %c0_i32_0 : i32, i32, i32
  }
  func.func @transform_19(%arg0: i32, %arg1: i32) -> (i32, i32, i32) {
    %c0_i32 = arith.constant 0 : i32
    %c0_i32_0 = arith.constant 0 : i32
    %c0_i32_1 = arith.constant 0 : i32
    return %arg1, %c0_i32, %c0_i32_0 : i32, i32, i32
  }
  func.func @transform_20(%arg0: i32, %arg1: i32) -> (i32, i32, i32) {
    %c0_i32 = arith.constant 0 : i32
    %c0_i32_0 = arith.constant 0 : i32
    %c0_i32_1 = arith.constant 0 : i32
    return %arg1, %c0_i32, %c0_i32_0 : i32, i32, i32
  }
  func.func @transform_21(%arg0: i32, %arg1: i32) -> (i32, i32, i32) {
    %c0_i32 = arith.constant 0 : i32
    %c0_i32_0 = arith.constant 0 : i32
    %c0_i32_1 = arith.constant 0 : i32
    return %arg0, %c0_i32, %c0_i32_0 : i32, i32, i32
  }
}

</mosaic_0001>

<bundles_post_ra>
// kernel: tpu_custom_call.1
= control target key start
LH: loop header
LB: loop body
LE: loop exit
PB: predicated region body
PF: predicated region fallthrough
CT: control target
= control target key end

     0   :  { %s6015_s0 = inlined_call_operand.hbm [shape: f32[2,8,128], index: 0, kind: input, shape index: {}]   ;;  %s6016_s1 = inlined_call_operand.hbm [shape: bf16[2,128,128], index: 1, kind: input, shape index: {}]   ;;  %s6017_s2 = inlined_call_operand.hbm [shape: bf16[2,128,128], index: 2, kind: input, shape index: {}]   ;;  %s6018_s3 = inlined_call_operand.hbm [shape: f32[1,8,128], index: 3, kind: input, shape index: {}]   ;;  %s6019_s4 = inlined_call_operand.vmem [shape: f32[2,1,128], index: 4, kind: input, shape index: {}]   ;;  %s6020_s5 = inlined_call_operand.hbm [shape: bf16[2,128,384], index: 5, kind: input, shape index: {}]   ;;  %s6021_s6 = inlined_call_operand.hbm [shape: bf16[2,128,128], index: 6, kind: input, shape index: {}]   ;;  %s6022_s7 = inlined_call_operand.hbm [shape: f32[2,1,128], index: 7, kind: input, shape index: {}]   ;;  %s6023_s8 = inlined_call_operand.hbm [shape: f32[2,1,128], index: 8, kind: input, shape index: {}]   ;;  %s6024_s9 = inlined_call_operand.vmem [shape: f32[2,1,128], index: 9, kind: input, shape index: {}]   ;;  %s6025_s10 = inlined_call_operand.hbm [shape: bf16[2,128,384], index: 10, kind: input, shape index: {}]   ;;  %s6026_s11 = inlined_call_operand.hbm [shape: bf16[2,128,128], index: 11, kind: input, shape index: {}]   ;;  %s6027_s12 = inlined_call_operand.vmem [shape: f32[2,1,128], index: 12, kind: input, shape index: {}]   ;;  %s6028_s13 = inlined_call_operand.vmem [shape: f32[2,1,128], index: 13, kind: input, shape index: {}]   ;;  %s6029_s14 = inlined_call_operand.hbm [shape: f32[2,1,128], index: 14, kind: input, shape index: {}]   ;;  %s6030_s15 = inlined_call_operand.hbm [shape: bf16[2,128,256], index: 15, kind: input, shape index: {}]   ;;  %s6031_s16 = inlined_call_operand.vmem [shape: f32[2,1,256], index: 16, kind: input, shape index: {}]   ;;  %s6032_s17 = inlined_call_operand.hbm [shape: bf16[2,256,128], index: 17, kind: input, shape index: {}]   ;;  %s6033_s18 = inlined_call_operand.vmem [shape: f32[2,1,128], index: 18, kind: input, shape index: {}]   ;;  %s6034_s19 = inlined_call_operand.vmem [shape: f32[2,1,128], index: 19, kind: input, shape index: {}]   ;;  %s6035_s20 = inlined_call_operand.vmem [shape: f32[2,1,128], index: 20, kind: input, shape index: {}]   ;;  %s6036_s21 = inlined_call_operand.hbm [shape: f32[2,8,128], index: 21, kind: output, shape index: {}]  }
   0x1   :  { %6075 = sst [smem:[#allocation57_spill]] %s6015_s0 }
   0x2   :  { %6076 = sst [smem:[#allocation58_spill]] %s6016_s1 }
   0x3   :  { %6077 = sst [smem:[#allocation59_spill]] %s6017_s2 }
   0x4   :  { %6078 = sst [smem:[#allocation60_spill]] %s6018_s3 }
   0x5   :  { %6079 = sst [smem:[#allocation61_spill]] %s6019_s4 }
   0x6   :  { %6080 = sst [smem:[#allocation62_spill]] %s6020_s5 }
   0x7   :  { %6081 = sst [smem:[#allocation63_spill]] %s6021_s6 }
   0x8   :  { %6082 = sst [smem:[#allocation64_spill]] %s6022_s7 }
   0x9   :  { %6083 = sst [smem:[#allocation65_spill]] %s6023_s8 }
   0xa   :  { %6084 = sst [smem:[#allocation66_spill]] %s6024_s9 }
   0xb   :  { %6085 = sst [smem:[#allocation67_spill]] %s6025_s10 }
   0xc   :  { %6086 = sst [smem:[#allocation68_spill]] %s6026_s11 }
   0xd   :  { %6087 = sst [smem:[#allocation69_spill]] %s6027_s12 }
   0xe   :  { %6088 = sst [smem:[#allocation70_spill]] %s6028_s13 }
   0xf   :  { %6089 = sst [smem:[#allocation71_spill]] %s6029_s14 }
  0x10   :  { %6090 = sst [smem:[#allocation72_spill]] %s6030_s15 }
  0x11   :  { %6091 = sst [smem:[#allocation73_spill]] %s6031_s16 }
  0x12   :  { %6092 = sst [smem:[#allocation74_spill]] %s6032_s17 }
  0x13   :  { %6093 = sst [smem:[#allocation75_spill]] %s6033_s18 }
  0x14   :  { %6094 = sst [smem:[#allocation76_spill]] %s6034_s19 }
  0x15   :  { %6095 = sst [smem:[#allocation77_spill]] %s6035_s20 }
  0x16   :  { %6096 = sst [smem:[#allocation78_spill]] %s6036_s21 }
  0x17   :  { %26 = vsyncpa [#allocation3], 0 }
  0x18   :  { %28 = vsyncpa [#allocation3 + $0x1], 0 }
  0x19   :  { %29 = vsyncpa [#allocation6], 0 }
  0x1a   :  { %31 = vsyncpa [#allocation6 + $0x1], 0 }
  0x1b   :  { %32 = vsyncpa [#allocation9], 0 }
  0x1c   :  { %33 = vsyncpa [#allocation4], 0 }
  0x1d   :  { %35 = vsyncpa [#allocation4 + $0x1], 0  ;;  %s5057_s2 = smov 0   ;;  %s5059_s25 = smov 0  }
  0x1e   :  { %s5061_s26 = smov 0   ;;  %s5063_s27 = smov 0  }
  0x1f   :  { %s5065_s3 = smov 0   ;;  %s5067_s28 = smov 0  }
  0x20   :  { %s5069_s29 = smov 0   ;;  %s5071_s0 = smov 0  }
  0x21   :  { %s5073_s4 = smov 0   ;;  %s5075_s30 = smov 0  }
  0x22   :  { %s5077_s5 = smov 0  }
  0x23 LB: > { %6097 = sst [smem:[#allocation33_spill]] %s4898_s25  ;;  %s5113_s22 = sadd.s32 4294967295, %s4934_s5   ;;  %s4934_s5 = sphi %s5077_s5, %s41_s5   ;;  %s4930_s30 = sphi %s5075_s30, %s6198_s30   ;;  %s4926_s4 = sphi %s5073_s4, %s6197_s4   ;;  %s4922_s0 = sphi %s5071_s0, %s6196_s0   ;;  %s4918_s29 = sphi %s5069_s29, %s6195_s29   ;;  %s4914_s28 = sphi %s5067_s28, %s6194_s28   ;;  %s4910_s3 = sphi %s5065_s3, %s6193_s3   ;;  %s4906_s27 = sphi %s5063_s27, %s6192_s27   ;;  %s4902_s26 = sphi %s5061_s26, %s6191_s26   ;;  %s4898_s25 = sphi %s5059_s25, %s6190_s25   ;;  %s4894_s2 = sphi %s5057_s2, %s6189_s2  }
  0x24   : > { %6098 = sst [smem:[#allocation34_spill]] %s4902_s26  ;;  %s3582_s23 = sadd.s32 4294967294, %s4934_s5  }
  0x25   : > { %6099 = sst [smem:[#allocation35_spill]] %s4906_s27  ;;  %s50_s1 = sadd.s32 1, %s4926_s4 }
  0x26   : > { %6100 = sst [smem:[#allocation36_spill]] %s4910_s3  ;;  %s53_s24 = sadd.s32 1, %s4930_s30 }
  0x27   : > { %6101 = sst [smem:[#allocation37_spill]] %s4914_s28  ;;  %p51_p0 = scmp.ge.s32.totalorder %s50_s1, 2 }
  0x28   : > { %6102 = sst [smem:[#allocation38_spill]] %s4918_s29  ;;  %s60_s21 = sadd.s32 1, %s4914_s28 }
  0x29   : > { %6103 = sst [smem:[#allocation39_spill]] %s4922_s0  ;;  %p6041_p1 = scmp.ne.s32.totalorder %s4914_s28, %s4910_s3 }
  0x2a   : > { %6104 = sst [smem:[#allocation40_spill]] %s4926_s4  ;;  %p68_p2 = scmp.eq.s32.totalorder %s4934_s5, 0 }
  0x2b   : > { %6105 = sst [smem:[#allocation41_spill]] %s4930_s30  ;;  %s6200_s1 = smov (%p51_p0, %s50_s1), 0 }
  0x2c   : > { %6106 = sst [smem:[#allocation42_spill]] %s4934_s5  ;;  %s6202_s24 = smov (!%p51_p0, %s53_s24), %s4930_s30 }
  0x2d   : > { %6107 = sst [smem:[#allocation43_spill]] %s5113_s22  ;;  %p5130_p3 = por %p68_p2, %p6041_p1 }
  0x2e   : > { %6108 = sst [smem:[#allocation44_spill]] %s6200_s1  ;;  %p6040_p4 = scmp.ne.s32.totalorder %s4910_s3, %s4906_s27 }
  0x2f   : > { %s6109_s20 = scalar_select %p5130_p3, 1, 0 }
  0x30   : > { %p55_p5 = scmp.ge.s32.totalorder %s6202_s24, 2  ;;  %p74_p6 = scmp.eq.s32.totalorder %s5113_s22, 0 }
  0x31   : > { %s182_s19 = ssub.s32 %s4926_s4, %s6200_s1  ;;  %s185_s18 = sadd.s32 1, %s4902_s26 }
  0x32   : > { %s6204_s24 = smov (%p55_p5, %s6202_s24), 0  ;;  %p5147_p7 = por %p74_p6, %p6040_p4 }
  0x33   : > { %6110 = sst [smem:[#allocation45_spill]] %s6204_s24  ;;  %p183_p8 = scmp.eq.s32.totalorder %s182_s19, 0 }
  0x34   : > { %s6111_s16 = scalar_select %p5147_p7, 1, 0 }
  0x35   : > { %s57_s13 = ssub.s32 %s4930_s30, %s6204_s24  ;;  %p192_p9 = scmp.ne.s32.totalorder %s4902_s26, %s4898_s25 }
  0x36   : > { %6112 = sst [smem:[#allocation46_spill]] %s6111_s16  ;;  %p58_p10 = scmp.eq.s32.totalorder %s57_s13, 0 }
  0x37   : > { %p198_p11 = scmp.ne.s32.totalorder %s4898_s25, %s4894_s2  ;;  %p5165_p12 = por %p192_p9, %p68_p2 }
  0x38   : > { %s5158_s1 = scalar_select %p183_p8, %s4902_s26, %s185_s18  }
  0x39   : > { %s5161_s12 = scalar_select %p58_p10, %s4914_s28, %s60_s21  }
  0x3a   : > { %6113 = sst [smem:[#allocation47_spill]] %s5158_s1  ;;  %p5171_p13 = por %p198_p11, %p74_p6 }
  0x3b   : > { %6114 = sst [smem:[#allocation48_spill]] %s5161_s12  ;;  %p612_p0 = scmp.eq.s32.totalorder %s5113_s22, 3 }
  0x3c   : > { %s6116_s29 = scalar_select %p5171_p13, 1, 0 }
  0x3d   : > { %p618_p5 = scmp.eq.s32.totalorder %s3582_s23, 3  ;;  %p3583_p4 = scmp.ge.s32.totalorder %s4934_s5, 1 }
  0x3e   : > { %6117 = sst [smem:[#allocation49_spill]] %s6116_s29  ;;  %p625_p1 = scmp.lt.s32.totalorder %s4934_s5, 5 }
  0x3f   : > { %p6118_p7 = scmp.ne.s32.totalorder %s4914_s28, %s4910_s3  ;;  %p6121_p10 = scmp.ne.s32.totalorder %s4910_s3, %s4906_s27 }
  0x40   : > { %p5192_p2 = pnand %p3583_p4, %p625_p1  ;;  %s6126_s24 = sld [smem:[#allocation60_spill]] }
  0x41   : > { %p5181_p8 = por %p612_p0, %p6118_p7  ;;  %p5188_p3 = por %p618_p5, %p6121_p10 }
  0x42   : > { %s6124_s19 = scalar_select %p5192_p2, 1, 0 }
  0x43   : > { %s6119_s13 = scalar_select %p5181_p8, 1, 0 }
  0x44   : > { %s6122_s18 = scalar_select %p5188_p3, 1, 0 }
  0x45   : > { %6120 = sst [smem:[#allocation50_spill]] %s6119_s13  ;;  %p4237_p9 = pneg %p5192_p2 }
  0x46   : > { %6123 = sst [smem:[#allocation51_spill]] %s6122_s18  ;;  %s637_s23 = sshll.u32 %s6126_s24, 4  ;;  %s638_s23 = int_to_ptr.hbm [resolvable:$true] %s637_s23 }
  0x47   : > { %6125 = sst [smem:[#allocation52_spill]] %s6124_s19  ;;  %s4936_s12 = smov [#allocation8]  }
  0x48   : > { %s639_s1 = sshll.u32 %s4936_s12, 4  ;;  %p4238_p7 = pnand %p4237_p9, %p74_p6  ;;  %s640_s1 = int_to_ptr.vmem [resolvable:$true] %s639_s1 }
  0x49   : > { %p3585_p11 = scmp.ge.s32.totalorder %s4934_s5, 4 }
  0x4a   : > { %4240 = dma.hbm_to_vmem [thread:$0]  (!%p4238_p7), %s638_s23, 128, %s640_s1, [#allocation9]  }
  0x4b   : > { %646 = sbr.rel (%p3585_p11) target bundleno = 134 (0x86), region = 20  ;;  %s650_s18 = sand.u32 (!%p3585_p11), 1, %s4934_s5  }
  0x4c   : > { %s652_s21 = sand.u32 (!%p3585_p11), 1, %s4914_s28   ;;  %s3587_s24 = sshll.u32 (!%p3585_p11), %s4930_s30, 3 }
  0x4d   : > { %s3586_s2 = sshll.u32 (!%p3585_p11), %s652_s21, 3  ;;  %s6127_s0 = sld [smem:[#allocation57_spill]] (!%p3585_p11) }
  0x4e   : > { %s654_s29 = scalar_lea.vmem (!%p3585_p11), [#allocation2], %s3586_s2  ;;  %s3588_s1 = sshll.u32 (!%p3585_p11), %s652_s21, 6 }
  0x4f   : > { %s662_s25 = sshll.u32 (!%p3585_p11), %s654_s29, 4  ;;  %s5210_s23 = scalar_lea.sflag (!%p3585_p11), [#allocation3], %s650_s18  ;;  %s663_s25 = int_to_ptr.vmem [resolvable:$true] %s662_s25 }
  0x50   : > { %p6128_p1 = scmp.ne.s32.totalorder %s6109_s20, 0  ;;  %s673_s28 = scalar_lea.vmem [#allocation5], %s3588_s1 }
  0x51   : > { %s681_s5 = sshll.u32 %s673_s28, 4  ;;  %s695_s3 = scalar_lea.vmem [#allocation7], %s3588_s1  ;;  %s682_s5 = int_to_ptr.vmem [resolvable:$true] %s681_s5 }
  0x52   : > { %s703_s22 = sshll.u32 %s695_s3, 4  ;;  %s4084_s27 = sshll.u32 %s4930_s30, 6  ;;  %s704_s22 = int_to_ptr.vmem [resolvable:$true] %s703_s22 }
  0x53   : > { %s658_s12 = scalar_lea.hbm %s6127_s0, %s3587_s24  ;;  %s6129_s13 = sld [smem:[#allocation58_spill]] }
  0x54   : > { %s660_s16 = sshll.u32 %s658_s12, 4  ;;  %s5222_s19 = scalar_lea.sflag [#allocation6], %s650_s18  ;;  %s661_s16 = int_to_ptr.hbm [resolvable:$true] %s660_s16 }
  0x55   : > { %4209 = dma.hbm_to_vmem [thread:$0]  (%p6128_p1), %s661_s16, 128, %s663_s25, %s5210_s23  }
  0x56   : > { %s6130_s16 = sld [smem:[#allocation59_spill]]  ;;  %s6064_s3 = smov 64  }
  0x57   : > { %s6066_s28 = smov 4   ;;  %s5231_s29 = sand.u32 1, %s4902_s26  }
  0x58   : > { %s4202_s18 = smul.u32 192, %s5231_s29  ;;  %s6063_s20 = sshll.u32 %s5231_s29, 6 }
  0x59   : > { %s678_s21 = scalar_lea.hbm %s6129_s13, %s4084_s27  ;;  %s6132_s6 = sld [smem:[#allocation63_spill]] }
  0x5a   : > { %s679_s2 = sshll.u32 %s678_s21, 4  ;;  %s745_s21 = scalar_lea.vmem [#allocation11], %s6063_s20  ;;  %s680_s2 = int_to_ptr.hbm [resolvable:$true] %s679_s2 }
  0x5b   : > { %4210 = dma.hbm_to_vmem [thread:$0]  (%p6128_p1), %s680_s2, 1024, %s682_s5, %s5222_s19, %s6064_s3, %s6064_s3, %s6066_s28  }
  0x5c   : > { %s700_s25 = scalar_lea.hbm %s6130_s16, %s4084_s27  ;;  %s4203_s27 = smul.u32 192, %s4926_s4 }
  0x5d   : > { %s701_s1 = sshll.u32 %s700_s25, 4  ;;  %s723_s5 = scalar_lea.vmem [#allocation10], %s4202_s18  ;;  %s702_s1 = int_to_ptr.hbm [resolvable:$true] %s701_s1 }
  0x5e   : > { %4211 = dma.hbm_to_vmem [thread:$0]  (%p6128_p1), %s702_s1, 1024, %s704_s22, %s5222_s19, %s6064_s3, %s6064_s3, %s6066_s28  }
  0x5f   : > { %s731_s0 = sshll.u32 %s723_s5, 4  ;;  %s6131_s2 = sld [smem:[#allocation62_spill]]  ;;  %s732_s0 = int_to_ptr.vmem [resolvable:$true] %s731_s0 }
  0x60   : > { %s4939_s16 = smov 192   ;;  %s4940_s25 = smov 12  }
  0x61   : > { %s6062_s22 = sshll.u32 %s4926_s4, 6  ;;  %s6133_s7 = sld [smem:[#allocation64_spill]] }
  0x62   : > { %s750_s13 = scalar_lea.hbm %s6132_s6, %s6062_s22  ;;  %s766_s5 = scalar_lea.vmem [#allocation12], %s5231_s29 }
  0x63   : > { %s773_s22 = sshll.u32 %s766_s5, 4  ;;  %s6134_s8 = sld [smem:[#allocation65_spill]]  ;;  %s774_s22 = int_to_ptr.vmem [resolvable:$true] %s773_s22 }
  0x64   : > { %s6135_s10 = sld [smem:[#allocation67_spill]] }
  0x65   : > { %s728_s24 = scalar_lea.hbm %s6131_s2, %s4203_s27  ;;  %s753_s2 = sshll.u32 %s745_s21, 4  ;;  %s754_s2 = int_to_ptr.vmem [resolvable:$true] %s753_s2 }
  0x66   : > { %s729_s12 = sshll.u32 %s728_s24, 4  ;;  %s751_s24 = sshll.u32 %s750_s13, 4  ;;  %s730_s12 = int_to_ptr.hbm [resolvable:$true] %s729_s12  ;;  %s752_s24 = int_to_ptr.hbm [resolvable:$true] %s751_s24 }
  0x67   : > { %4212 = dma.hbm_to_vmem [thread:$0]  (%p5165_p12), %s730_s12, 3072, %s732_s0, %s5210_s23, %s4939_s16, %s4939_s16, %s4940_s25  }
  0x68   : > { %4213 = dma.hbm_to_vmem [thread:$0]  (%p5165_p12), %s752_s24, 1024, %s754_s2, %s5222_s19, %s6064_s3, %s6064_s3, %s6066_s28  }
  0x69   : > { %s769_s1 = scalar_lea.hbm %s6133_s7, %s4926_s4  ;;  %s786_s2 = scalar_lea.hbm %s6134_s8, %s4926_s4 }
  0x6a   : > { %s771_s20 = sshll.u32 %s769_s1, 4  ;;  %s783_s24 = scalar_lea.vmem [#allocation13], %s5231_s29  ;;  %s772_s20 = int_to_ptr.hbm [resolvable:$true] %s771_s20 }
  0x6b   : > { %4214 = dma.hbm_to_vmem [thread:$0]  (%p5165_p12), %s772_s20, 16, %s774_s22, %s5210_s23  }
  0x6c   : > { %s790_s3 = sshll.u32 %s783_s24, 4  ;;  %s788_s0 = sshll.u32 %s786_s2, 4  ;;  %s791_s3 = int_to_ptr.vmem [resolvable:$true] %s790_s3  ;;  %s789_s0 = int_to_ptr.hbm [resolvable:$true] %s788_s0 }
  0x6d   : > { %4215 = dma.hbm_to_vmem [thread:$0]  (%p5165_p12), %s789_s0, 16, %s791_s3, %s5222_s19  }
  0x6e   : > { %s812_s20 = scalar_lea.hbm %s6135_s10, %s4203_s27  ;;  %s807_s22 = scalar_lea.vmem [#allocation14], %s4202_s18 }
  0x6f   : > { %s815_s5 = sshll.u32 %s807_s22, 4  ;;  %s813_s13 = sshll.u32 %s812_s20, 4  ;;  %s816_s5 = int_to_ptr.vmem [resolvable:$true] %s815_s5  ;;  %s814_s13 = int_to_ptr.hbm [resolvable:$true] %s813_s13 }
  0x70   : > { %4216 = dma.hbm_to_vmem [thread:$0]  (%p5165_p12), %s814_s13, 3072, %s816_s5, %s5210_s23, %s4939_s16, %s4939_s16, %s4940_s25  }
  0x71   : > { %s6136_s3 = sshll.u32 %s4926_s4, 6  ;;  %s6137_s11 = sld [smem:[#allocation68_spill]] }
  0x72   : > { %s6138_s24 = sshll.u32 %s5231_s29, 6  ;;  %s6139_s1 = smov 64  }
  0x73   : > { %s829_s18 = scalar_lea.vmem [#allocation15], %s6138_s24  ;;  %s6140_s14 = sld [smem:[#allocation71_spill]] }
  0x74   : > { %s837_s0 = sshll.u32 %s829_s18, 4  ;;  %s862_s25 = scalar_lea.vmem [#allocation16], %s5231_s29  ;;  %s838_s0 = int_to_ptr.vmem [resolvable:$true] %s837_s0 }
  0x75   : > { %s869_s5 = sshll.u32 %s862_s25, 4  ;;  %s4088_s21 = sshll.u32 %s4926_s4, 7  ;;  %s870_s5 = int_to_ptr.vmem [resolvable:$true] %s869_s5 }
  0x76   : > { %s6141_s15 = sld [smem:[#allocation72_spill]]  ;;  %s4941_s20 = smov 128  }
  0x77   : > { %s834_s27 = scalar_lea.hbm %s6137_s11, %s6136_s3  ;;  %s3602_s3 = sshll.u32 %s5231_s29, 7 }
  0x78   : > { %s835_s12 = sshll.u32 %s834_s27, 4  ;;  %s880_s18 = scalar_lea.vmem [#allocation17], %s3602_s3  ;;  %s836_s12 = int_to_ptr.hbm [resolvable:$true] %s835_s12 }
  0x79   : > { %4217 = dma.hbm_to_vmem [thread:$0]  (%p5165_p12), %s836_s12, 1024, %s838_s0, %s5222_s19, %s6139_s1, %s6139_s1, %s6066_s28  }
  0x7a   : > { %s865_s16 = scalar_lea.hbm %s6140_s14, %s4926_s4  ;;  %s888_s0 = sshll.u32 %s880_s18, 4  ;;  %s889_s0 = int_to_ptr.vmem [resolvable:$true] %s888_s0 }
  0x7b   : > { %s867_s13 = sshll.u32 %s865_s16, 4  ;;  %s4942_s22 = smov 8   ;;  %s868_s13 = int_to_ptr.hbm [resolvable:$true] %s867_s13 }
  0x7c   : > { %4218 = dma.hbm_to_vmem [thread:$0]  (%p5165_p12), %s868_s13, 16, %s870_s5, %s5210_s23  }
  0x7d   : > { %s885_s24 = scalar_lea.hbm %s6141_s15, %s4088_s21  ;;  %s6142_s17 = sld [smem:[#allocation74_spill]] }
  0x7e   : > { %s886_s12 = sshll.u32 %s885_s24, 4  ;;  %s909_s5 = scalar_lea.vmem [#allocation18], %s3602_s3  ;;  %s887_s12 = int_to_ptr.hbm [resolvable:$true] %s886_s12 }
  0x7f   : > { %4219 = dma.hbm_to_vmem [thread:$0]  (%p5165_p12), %s887_s12, 2048, %s889_s0, %s5222_s19, %s4941_s20, %s4941_s20, %s4942_s22  }
  0x80   : > { %s917_s13 = sshll.u32 %s909_s5, 4  ;;  %s6143_s2 = smov 4   ;;  %s918_s13 = int_to_ptr.vmem [resolvable:$true] %s917_s13 }
  0x83   : > { %s914_s25 = scalar_lea.hbm %s6142_s17, %s4088_s21 }
  0x84   : > { %s915_s28 = sshll.u32 %s914_s25, 4  ;;  %s916_s28 = int_to_ptr.hbm [resolvable:$true] %s915_s28 }
  0x85   : > { %4220 = dma.hbm_to_vmem [thread:$0]  (%p5165_p12), %s916_s28, 2048, %s918_s13, %s5210_s23, %s6139_s1, %s6139_s1, %s6143_s2  }
  0x86 PF: > { %947 = sbr.rel (%p5192_p2) target bundleno = 3441 (0xd71), region = 104 }
  0x8b   : > { %s6145_s24 = sld [smem:[#allocation43_spill]] }
  0x8c   : > { %s6146_s19 = sld [smem:[#allocation36_spill]] }
  0x8d   : > { %s6147_s18 = sld [smem:[#allocation46_spill]] }
  0x91   : > { %s949_s0 = sand.u32 1, %s6145_s24  }
  0x92   : > { %s5340_s12 = sand.u32 1, %s6146_s19   ;;  %s5343_s21 = scalar_lea.sflag [#allocation3], %s949_s0 }
  0x93   : > { %s6067_s3 = sshll.u32 %s5340_s12, 3  ;;  %p6148_p4 = scmp.ne.s32.totalorder %s6147_s18, 0 }
  0x94   : > { %s5347_s9 = scalar_lea.vmem [#allocation2], %s6067_s3 }
  0x95   : > { %4841 = dma.done.wait (%p6148_p4), %s5343_s21, 128  }
  0x96   : > { %4843 = vsyncadd (%p6148_p4), %s5343_s21, 4294967168  ;;  %s3610_s23 = sshll.u32 %s5340_s12, 6  ;;  %s5356_s28 = scalar_lea.sflag [#allocation6], %s949_s0 }
  0x97   : > { %s5358_s1 = scalar_lea.vmem [#allocation5], %s3610_s23 }
  0x98   : > { %4845 = dma.done.wait (%p6148_p4), %s5356_s28, 2048  }
  0x99   : > { %4847 = vsyncadd (%p6148_p4), %s5356_s28, 4294965248  ;;  %s5366_s20 = scalar_lea.vmem [#allocation7], %s3610_s23 }
  0x9a   : > { %4849 = dma.done.wait (%p74_p6), [#allocation9], 128  }
  0x9b   : > { %4851 = vsyncadd (%p74_p6), [#allocation9], 4294967168  ;;  %s6149_s22 = sld [smem:[#allocation33_spill]] }
  0xa1   : > { %s5373_s29 = sand.u32 1, %s6149_s22  }
  0xa2   : > { %s4206_s25 = smul.u32 192, %s5373_s29 }
  0xa4   : > { %s5376_s5 = scalar_lea.vmem [#allocation10], %s4206_s25 }
  0xa5   : > { %4853 = dma.done.wait (%p5171_p13), %s5343_s21, 3072  }
  0xa6   : > { %4855 = vsyncadd (%p5171_p13), %s5343_s21, 4294964224  ;;  %s3613_s13 = sshll.u32 %s5373_s29, 6 }
  0xa7   : > { %s5385_s2 = scalar_lea.vmem [#allocation11], %s3613_s13 }
  0xa8   : > { %4857 = dma.done.wait (%p5171_p13), %s5356_s28, 1024  }
  0xa9   : > { %4859 = vsyncadd (%p5171_p13), %s5356_s28, 4294966272 }
  0xaa   : > { %4861 = dma.done.wait (%p5171_p13), %s5343_s21, 16  }
  0xab   : > { %4863 = vsyncadd (%p5171_p13), %s5343_s21, 4294967280 }
  0xac   : > { %4865 = dma.done.wait (%p5171_p13), %s5356_s28, 16  }
  0xad   : > { %4867 = vsyncadd (%p5171_p13), %s5356_s28, 4294967280  ;;  %s5407_s19 = scalar_lea.vmem [#allocation14], %s4206_s25 }
  0xae   : > { %4869 = dma.done.wait (%p5171_p13), %s5343_s21, 3072  }
  0xaf   : > { %4871 = vsyncadd (%p5171_p13), %s5343_s21, 4294964224  ;;  %s5415_s18 = scalar_lea.vmem [#allocation15], %s3613_s13 }
  0xb0   : > { %6151 = sst [smem:[#allocation53_spill]] %s5415_s18 }
  0xb1   : > { %4873 = dma.done.wait (%p5171_p13), %s5356_s28, 1024  }
  0xb2   : > { %4875 = vsyncadd (%p5171_p13), %s5356_s28, 4294966272 }
  0xb3   : > { %4877 = dma.done.wait (%p5171_p13), %s5343_s21, 16  }
  0xb4   : > { %4879 = vsyncadd (%p5171_p13), %s5343_s21, 4294967280  ;;  %s3615_s23 = sshll.u32 %s5373_s29, 7 }
  0xb5   : > { %s5431_s22 = scalar_lea.vmem [#allocation17], %s3615_s23 }
  0xb6   : > { %6152 = sst [smem:[#allocation54_spill]] %s5431_s22 }
  0xb7   : > { %4881 = dma.done.wait (%p5171_p13), %s5356_s28, 2048  }
  0xb8   : > { %4883 = vsyncadd (%p5171_p13), %s5356_s28, 4294965248  ;;  %s5439_s25 = scalar_lea.vmem [#allocation18], %s3615_s23 }
  0xb9   : > { %6153 = sst [smem:[#allocation55_spill]] %s5439_s25 }
  0xba   : > { %4885 = dma.done.wait (%p5171_p13), %s5343_s21, 2048  }
  0xbb   : > { %4887 = vsyncadd (%p5171_p13), %s5343_s21, 4294965248  ;;  %s6154_s13 = sld [smem:[#allocation39_spill]]  ;;  %s6165_s15 = sshll.u32 %s5340_s12, 3 }
  0xbc   : > { %s6155_s0 = sld [smem:[#allocation38_spill]]  ;;  %s5491_s17 = scalar_lea.vmem [#allocation19], %s6165_s15 }
  0xbd   : > { %s6160_s30 = sld [smem:[#allocation70_spill]] }
  0xbe   : > { %s6161_s25 = sld [smem:[#allocation73_spill]] }
  0xbf   : > { %s6162_s21 = sld [smem:[#allocation75_spill]] }
  0xc0   : > { %s6163_s16 = sld [smem:[#allocation76_spill]] }
  0xc1   : > { %p1202_p6 = scmp.lt.s32.totalorder %s6154_s13, 1  ;;  %s6164_s11 = sld [smem:[#allocation77_spill]] }
  0xc2   : > { %p1205_p12 = scmp.lt.s32.totalorder %s6155_s0, 1  ;;  %p3619_p13 = scmp.ne.s32.totalorder %s6155_s0, 0 }
  0xc3   : > { %s6206_s13 = smov (!%p1202_p6, %s6154_s13), 1 }
  0xc4   : > { %6156 = sst [smem:[#allocation56_spill]] %s6206_s13 }
  0xc5   : > { %s5453_s28 = scalar_select %p1205_p12, %s6155_s0, 1 }
  0xc6   : > { %1231 = sbr.rel (%p3619_p13) target bundleno = 205 (0xcd), region = 160 }
  0xc7   : > { %s1213_s24 = scalar_lea.vmem %s6160_s30, %s5453_s28  ;;  %s3618_s23 = sshll.u32 %s5453_s28, 1 }
  0xc8   : > { %s5475_s22 = scalar_lea.vmem %s6161_s25, %s3618_s23  ;;  %s1220_s13 = scalar_lea.vmem %s6162_s21, %s5453_s28 }
  0xc9   : > { %s1223_s7 = scalar_lea.vmem %s6163_s16, %s5453_s28  ;;  %s1226_s14 = scalar_lea.vmem %s6164_s11, %s5453_s28 }
  0xcb   : > { %v1232_v0 = vld [vmem:[%s5347_s9] sm:$0xff] }
  0xcc   : > { %1233 = vst [vmem:[%s5491_s17] sm:$0xff] %v1232_v0 }
  0xcd PF: > { %v3678_v1 = vld [vmem:[%s5376_s5 + $0xa8] sm:$0xf]  ;;  %v4112_v2 = vld [vmem:[%s5376_s5 + $0xb0] sm:$0xf0]  ;;  %v4111_v3 = vld [vmem:[%s5376_s5 + $0xac] sm:$0xf] }
  0xce   : > { %v3679_v4 = vor.u32 %v4112_v2, %v3678_v1  ;;  %v3680_v5 = vld [vmem:[%s5376_s5 + $0xb4] sm:$0xf0]  ;;  %v3670_v6 = vld [vmem:[%s5376_s5 + $0x90] sm:$0xf]  ;;  %v4109_v7 = vld [vmem:[%s5376_s5 + $0x98] sm:$0xf0] }
  0xcf   : > { %v3683_v8 = vor.u32 %v4111_v3, %v3680_v5  ;;  %v4108_v9 = vld [vmem:[%s5376_s5 + $0x94] sm:$0xf]  ;;  %v3672_v10 = vld [vmem:[%s5376_s5 + $0x9c] sm:$0xf0]  ;;  %v3671_v11 = vor.u32 %v4109_v7, %v3670_v6  ;;  %v3662_v13 = vld [vmem:[%s5376_s5 + $0x78] sm:$0xf] }
  0xd0   : > { %1369 = vmatpush.bf16.msra.mxu0 %v3679_v4  ;;  %v3675_v12 = vor.u32 %v4108_v9, %v3672_v10  ;;  %v4106_v14 = vld [vmem:[%s5376_s5 + $0x80] sm:$0xf0]  ;;  %v4105_v15 = vld [vmem:[%s5376_s5 + $0x7c] sm:$0xf]  ;;  %v3664_v16 = vld [vmem:[%s5376_s5 + $0x84] sm:$0xf0] }
  0xd1   : > { %1382 = vmatpush.bf16.msra.mxu1 %v3683_v8  ;;  %v3663_v17 = vor.u32 %v4106_v14, %v3662_v13  ;;  %v3667_v18 = vor.u32 %v4105_v15, %v3664_v16  ;;  %v3654_v19 = vld [vmem:[%s5376_s5 + $0x60] sm:$0xf]  ;;  %v4103_v20 = vld [vmem:[%s5376_s5 + $0x68] sm:$0xf0]  ;;  %v4102_v21 = vld [vmem:[%s5376_s5 + $0x64] sm:$0xf] }
  0xd2   : > { %v3656_v22 = vld [vmem:[%s5376_s5 + $0x6c] sm:$0xf0]  ;;  %v3646_v23 = vld [vmem:[%s5376_s5 + $0x48] sm:$0xf]  ;;  %v4100_v24 = vld [vmem:[%s5376_s5 + $0x50] sm:$0xf0]  ;;  %v3655_v25 = vor.u32 %v4103_v20, %v3654_v19 }
  0xd3   : > { %v4099_v26 = vld [vmem:[%s5376_s5 + $0x4c] sm:$0xf]  ;;  %v3648_v27 = vld [vmem:[%s5376_s5 + $0x54] sm:$0xf0]  ;;  %v3659_v28 = vor.u32 %v4102_v21, %v3656_v22  ;;  %v3647_v29 = vor.u32 %v4100_v24, %v3646_v23  ;;  %v3638_v31 = vld [vmem:[%s5376_s5 + $0x30] sm:$0xf] }
  0xd4   : > { %1370 = vmatpush.bf16.msra.mxu0 %v3671_v11  ;;  %v3651_v30 = vor.u32 %v4099_v26, %v3648_v27  ;;  %v4097_v32 = vld [vmem:[%s5376_s5 + $0x38] sm:$0xf0]  ;;  %v4096_v33 = vld [vmem:[%s5376_s5 + $0x34] sm:$0xf]  ;;  %v3640_v34 = vld [vmem:[%s5376_s5 + $0x3c] sm:$0xf0] }
  0xd5   : > { %1383 = vmatpush.bf16.msra.mxu1 %v3675_v12  ;;  %v3639_v35 = vor.u32 %v4097_v32, %v3638_v31  ;;  %v3643_v36 = vor.u32 %v4096_v33, %v3640_v34  ;;  %v3630_v37 = vld [vmem:[%s5376_s5 + $0x18] sm:$0xf]  ;;  %v4094_v38 = vld [vmem:[%s5376_s5 + $0x20] sm:$0xf0]  ;;  %v4093_v39 = vld [vmem:[%s5376_s5 + $0x1c] sm:$0xf] }
  0xd6   : > { %v3632_v40 = vld [vmem:[%s5376_s5 + $0x24] sm:$0xf0]  ;;  %v3631_v41 = vor.u32 %v4094_v38, %v3630_v37  ;;  %v1235_v43 = vld [vmem:[#allocation8] sm:$0xff]  ;;  %v3622_v45 = vld [vmem:[%s5376_s5] sm:$0xf]  ;;  %vm1460_vm0 = vcmask 261120  }
  0xd7   : > { %v5525_v42 = vld [vmem:[%s5491_s17] sm:$0xff]  ;;  %v3635_v44 = vor.u32 %v4093_v39, %v3632_v40  ;;  %s4943_s26 = smov 32   ;;  %s4944_s4 = smov 64   ;;  %v4113_v5 = vld [vmem:[%s5376_s5 + $0xb8] sm:$0xf0]  ;;  %vm1555_vm1 = vcmask 64512  }
  0xd8   : > { %1371 = vmatpush.bf16.msra.mxu0 %v3663_v17  ;;  %v4091_v46 = vld [vmem:[%s5376_s5 + $0x8] sm:$0xf0]  ;;  %v4090_v47 = vld [vmem:[%s5376_s5 + $0x4] sm:$0xf]  ;;  %v3624_v48 = vld [vmem:[%s5376_s5 + $0xc] sm:$0xf0]  ;;  %v1237_v49 = vadd.f32 %v1235_v43, %v5525_v42 }
  0xd9   : > { %1384 = vmatpush.bf16.msra.mxu1 %v3667_v18  ;;  %v3623_v50 = vor.u32 %v4091_v46, %v3622_v45  ;;  %v3627_v51 = vor.u32 %v4090_v47, %v3624_v48  ;;  %s4945_s30 = smov 96   ;;  %v3714_v4 = vld [vmem:[%s5376_s5 + $0xb0] sm:$0xf]  ;;  %v3710_v6 = vld [vmem:[%s5376_s5 + $0x98] sm:$0xf]  ;;  %vm1604_vm2 = vcmask 1043456  }
  0xda   : > { %v1288_v52 = vpack.c.bf16 %v1237_v49, %v1237_v49  ;;  %v3715_v7 = vor.u32 %v4113_v5, %v3714_v4  ;;  %v4110_v8 = vld [vmem:[%s5376_s5 + $0xa0] sm:$0xf0]  ;;  %v3706_v18 = vld [vmem:[%s5376_s5 + $0x80] sm:$0xf]  ;;  %v4107_v19 = vld [vmem:[%s5376_s5 + $0x88] sm:$0xf0] }
  0xdb   : > { %v3711_v9 = vor.u32 %v4110_v8, %v3710_v6  ;;  %v3707_v20 = vor.u32 %v4107_v19, %v3706_v18  ;;  %v3702_v21 = vld [vmem:[%s5376_s5 + $0x68] sm:$0xf]  ;;  %v4104_v22 = vld [vmem:[%s5376_s5 + $0x70] sm:$0xf0]  ;;  %v3698_v24 = vld [vmem:[%s5376_s5 + $0x50] sm:$0xf] }
  0xdc   : > { %1372 = vmatpush.bf16.msra.mxu0 %v3655_v25  ;;  %1443 = vmatpush.bf16.msra.mxu2 %v3715_v7  ;;  %v3703_v23 = vor.u32 %v4104_v22, %v3702_v21  ;;  %v4101_v25 = vld [vmem:[%s5376_s5 + $0x58] sm:$0xf0]  ;;  %v3694_v27 = vld [vmem:[%s5376_s5 + $0x38] sm:$0xf]  ;;  %v4095_v31 = vld [vmem:[%s5376_s5 + $0x28] sm:$0xf0] }
  0xdd   : > { %1385 = vmatpush.bf16.msra.mxu1 %v3659_v28  ;;  %v3699_v26 = vor.u32 %v4101_v25, %v3698_v24  ;;  %v4098_v28 = vld [vmem:[%s5376_s5 + $0x40] sm:$0xf0]  ;;  %v3686_v33 = vld [vmem:[%s5376_s5 + $0x8] sm:$0xf]  ;;  %v4092_v34 = vld [vmem:[%s5376_s5 + $0x10] sm:$0xf0] }
  0xde   : > { %vm1703_vm3 = vcmask 523264   ;;  %vm1705_vm4 = vcmask 785408   ;;  %s6166_s9 = scalar_lea.vmem [#allocation12], %s5373_s29  ;;  %s6171_s21 = sld [smem:[#allocation61_spill]] }
  0xdf   : > { %s6173_s27 = sld [smem:[#allocation53_spill]] }
  0xe0   : > { %1373 = vmatpush.bf16.msra.mxu0 %v3647_v29  ;;  %1444 = vmatpush.bf16.msra.mxu2 %v3711_v9  ;;  %v3695_v29 = vor.u32 %v4098_v28, %v3694_v27  ;;  %s6174_s3 = sld [smem:[#allocation54_spill]] }
  0xe1   : > { %1386 = vmatpush.bf16.msra.mxu1 %v3651_v30  ;;  %v3690_v30 = vld [vmem:[%s5376_s5 + $0x20] sm:$0xf]  ;;  %s6175_s8 = sld [smem:[#allocation69_spill]] }
  0xe2   : > { %v3691_v32 = vor.u32 %v4095_v31, %v3690_v30  ;;  %s6177_s11 = sld [smem:[#allocation55_spill]] }
  0xe4   : > { %1374 = vmatpush.bf16.msra.mxu0 %v3639_v35  ;;  %1445 = vmatpush.bf16.msra.mxu2 %v3707_v20  ;;  %v3687_v35 = vor.u32 %v4092_v34, %v3686_v33 }
  0xe5   : > { %1387 = vmatpush.bf16.msra.mxu1 %v3643_v36  ;;  %v1238_v36 = vpack.c.bf16 %v5525_v42, %v5525_v42 }
  0xe7   : > { %s6176_s10 = scalar_lea.vmem %s6175_s8, %s5453_s28 }
  0xe8   : > { %1375 = vmatpush.bf16.msra.mxu0 %v3631_v41  ;;  %1446 = vmatpush.bf16.msra.mxu2 %v3703_v23 }
  0xe9   : > { %1388 = vmatpush.bf16.msra.mxu1 %v3635_v44 }
  0xec   : > { %1376 = vmatpush.bf16.msra.mxu0 %v3623_v50  ;;  %1447 = vmatpush.bf16.msra.mxu2 %v3699_v26 }
  0xed   : > { %1389 = vmatpush.bf16.msra.mxu1 %v3627_v51 }
  0xef   : > { %1377 = vmatmul.bf16.vlgmr.msra.gmra.mxu0 %v1288_v52 }
  0xf0   : > { %1390 = vmatmul.bf16.vlgmr.msra.gmra.mxu1 %v1288_v52  ;;  %1448 = vmatpush.bf16.msra.mxu2 %v3695_v29 }
  0xf4   : > { %1449 = vmatpush.bf16.msra.mxu2 %v3691_v32 }
  0xf8   : > { %1450 = vmatpush.bf16.msra.mxu2 %v3687_v35 }
  0xfb   : > { %1451 = vmatmul.bf16.vlgmr.msra.gmra.mxu2 %v1238_v36  ;;  %v4159_v36 = vld [vmem:[%s5407_s19 + $0xac] sm:$0xf] }
 0x16c   : > { %v1378_v53 = vpop.f32.mrf.mxu0 }
 0x16d   : > { %v1456_v54 = vmul.f32 0.17677669, %v1378_v53  ;;  %v1391_v55 = vpop.f32.mrf.mxu1 }
 0x16e   : > { %v1458_v56 = vpack.c.bf16 %v1391_v55, %v1391_v55 }
 0x16f   : > { %v1457_v57 = vpack.c.bf16 %v1456_v54, %v1456_v54 }
 0x170   : > { %v1486_v58 = vunpack.c.l.b16 %v1458_v56  ;;  %v1465_v59 = vsel %vm1460_vm0, %v1458_v56, 0 }
 0x171   : > { %1474 = vmatpush.bf16.xpose.msrb.mxu0 %v1465_v59  ;;  %v1481_v61 = vunpack.c.l.b16 %v1457_v57 }
 0x172   : > { %v1487_v60 = vpack.c.b16 %v1486_v58, %v1486_v58 }
 0x173   : > { %v1482_v0 = vpack.c.b16 %v1481_v61, %v1481_v61 }
 0x174   : > { %1534 = vrot.lane.b32.xlu2 %v1487_v60, %s4943_s26  ;;  %1511 = vrot.lane.b32.xlu1 %v1487_v60, %s4944_s4  ;;  %v1380_v62 = vpop.f32.mrf.mxu0 }
 0x175   : > { %1488 = vrot.lane.b32.xlu0 %v1487_v60, %s4945_s30  ;;  %v1393_v63 = vpop.f32.mrf.mxu1 }
 0x178   : > { %3716 = vmatmul.msk.bf16.vlgmr.msrb.gmra.mxu0 %vm1460_vm0, %v1457_v57 }
 0x17c   : > { %1532 = vrot.lane.b32.xlu2 %v1482_v0, %s4943_s26  ;;  %1509 = vrot.lane.b32.xlu1 %v1482_v0, %s4944_s4 }
 0x17d   : > { %1483 = vrot.lane.b32.xlu0 %v1482_v0, %s4945_s30 }
 0x17e   : > { %v1452_v51 = vpop.f32.mrf.mxu2 }
 0x17f   : > { %v1459_v55 = vpack.c.bf16 %v1452_v51, %v1452_v51  ;;  %v3836_v51 = vld [vmem:[%s5407_s19 + $0x6c] sm:$0xf0] }
 0x181   : > { %v1606_v56 = vsel %vm1604_vm2, %v1459_v55, 0  ;;  %v1623_v57 = vunpack.c.l.b16 %v1459_v55  ;;  %v4147_v55 = vld [vmem:[%s5407_s19 + $0x4c] sm:$0xf] }
 0x182   : > { %1615 = vmatpush.bf16.msrb.mxu1 %v1606_v56  ;;  %v3832_v56 = vld [vmem:[%s5407_s19 + $0x54] sm:$0xf0] }
 0x183   : > { %v1624_v60 = vpack.c.b16 %v1623_v57, %v1623_v57  ;;  %v3835_v57 = vor.u32 %v4147_v55, %v3832_v56 }
 0x186   : > { %v1454_v54 = vpop.f32.mrf.mxu2 }
 0x187   : > { %v4118_v54 = vld [vmem:[%s5385_s2 + $0x20] sm:$0xff] }
 0x1ce   : > { %v1535_v1 = vpop.permute.xlu2 %1534 }
 0x1cf   : > { %v1540_v2 = vsel %vm1460_vm0, %v1535_v1, 0 }
 0x1d0   : > { %1549 = vmatpush.bf16.xpose.msra.mxu0 %v1540_v2 }
 0x1d6   : > { %v1533_v3 = vpop.permute.xlu2 %1532 }
 0x1d7   : > { %3719 = vmatmul.msk.bf16.vlgmr.msra.gmra.mxu0 %vm1460_vm0, %v1533_v3 }
 0x1e6   : > { %v1512_v10 = vpop.permute.xlu1 %1511 }
 0x1e7   : > { %v1489_v11 = vpop.permute.xlu0 %1488  ;;  %v1517_v12 = vsel %vm1460_vm0, %v1512_v10, 0 }
 0x1e8   : > { %v1494_v13 = vsel %vm1460_vm0, %v1489_v11, 0 }
 0x1e9   : > { %1503 = vmatpush.bf16.xpose.msra.mxu3 %v1494_v13 }
 0x1ee   : > { %v1510_v17 = vpop.permute.xlu1 %1509 }
 0x1ef   : > { %v1484_v14 = vpop.permute.xlu0 %1483 }
 0x1f0   : > { %3717 = vmatmul.msk.bf16.vlgmr.msra.gmra.mxu3 %vm1460_vm0, %v1484_v14 }
 0x1f1   : > { %1526 = vmatpush.bf16.xpose.msrb.mxu3 %v1517_v12 }
 0x1f5   : > { %v5549_v15 = vpop.f32.mrf.mxu0 }
 0x1f6   : > { %v1556_v40 = vsel %vm1555_vm1, %v5549_v15, -inf }
 0x1fd   : > { %v1478_v16 = vpop.f32.mrf.mxu0 }
 0x200   : > { %3718 = vmatmul.msk.bf16.vlgmr.msrb.gmra.mxu3 %vm1460_vm0, %v1510_v17 }
 0x254   : > { %v1551_v37 = vpop.f32.mrf.mxu0 }
 0x255   : > { %v1565_v38 = vsel %vm1555_vm1, %v1551_v37, -inf }
 0x256   : > { %1566 = vmax.xlane.f32.xlu2 %v1565_v38  ;;  %v4156_v38 = vld [vmem:[%s5407_s19 + $0x94] sm:$0xf] }
 0x25c   : > { %v1553_v39 = vpop.f32.mrf.mxu0 }
 0x25e   : > { %1557 = vmax.xlane.f32.xlu2 %v1556_v40 }
 0x273   : > { %v1505_v41 = vpop.f32.mrf.mxu3 }
 0x274   : > { %v1559_v43 = vsel %vm1555_vm1, %v1505_v41, -inf }
 0x275   : > { %1560 = vmax.xlane.f32.xlu0 %v1559_v43  ;;  %v4121_v43 = vld [vmem:[%s5385_s2 + $0x38] sm:$0xff] }
 0x276   : > { %1759 = vmatpush.bf16.msra.mxu1 %v4121_v43 }
 0x27b   : > { %v1507_v44 = vpop.f32.mrf.mxu3 }
 0x283   : > { %v1528_v45 = vpop.f32.mrf.mxu3 }
 0x284   : > { %v1562_v46 = vsel %vm1555_vm1, %v1528_v45, -inf }
 0x285   : > { %1563 = vmax.xlane.f32.xlu1 %v1562_v46  ;;  %v4153_v46 = vld [vmem:[%s5407_s19 + $0x7c] sm:$0xf] }
 0x28b   : > { %v1530_v47 = vpop.f32.mrf.mxu3 }
 0x28c   : > { %v3840_v47 = vld [vmem:[%s5407_s19 + $0x84] sm:$0xf0] }
 0x2c9   : > { %v1567_v48 = vpop.xlane.xlu2 %1566 }
 0x2ca   : > { %v1571_v49 = vsub.f32 %v1551_v37, %v1567_v48  ;;  %v3848_v37 = vld [vmem:[%s5407_s19 + $0xb4] sm:$0xf0]  ;;  %v3843_v48 = vor.u32 %v4153_v46, %v3840_v47 }
 0x2cb   : > { %v3851_v40 = vor.u32 %v4159_v36, %v3848_v37 }
 0x2cc   : > { %v1578_v50 = vmul.f32 1.442695, %v1571_v49  ;;  %v4119_v49 = vld [vmem:[%s5385_s2 + $0x28] sm:$0xff] }
 0x2ce   : > { %4357 = vpow2.f32 %v1578_v50  ;;  %v4150_v50 = vld [vmem:[%s5407_s19 + $0x64] sm:$0xf] }
 0x2d1   : > { %v1558_v5 = vpop.xlane.xlu2 %1557 }
 0x2d2   : > { %v1568_v6 = vsub.f32 %v5549_v15, %v1558_v5 }
 0x2d4   : > { %v4358_v52 = vpop.eup %4357  ;;  %v1572_v7 = vmul.f32 1.442695, %v1568_v6  ;;  %v4122_v6 = vld [vmem:[%s5366_s20] sm:$0xff] }
 0x2d5   : > { %v1589_v53 = vsel %vm1555_vm1, %v4358_v52, 0.0 }
 0x2d6   : > { %1590 = vadd.xlane.f32.xlu2 %v1589_v53  ;;  %v3839_v53 = vor.u32 %v4150_v50, %v3836_v51 }
 0x2e8   : > { %v1561_v58 = vpop.xlane.xlu0 %1560 }
 0x2e9   : > { %v1569_v59 = vsub.f32 %v1505_v41, %v1561_v58  ;;  %v3844_v41 = vld [vmem:[%s5407_s19 + $0x9c] sm:$0xf0]  ;;  %v4117_v58 = vld [vmem:[%s5385_s2 + $0x18] sm:$0xff] }
 0x2ea   : > { %v3847_v44 = vor.u32 %v4156_v38, %v3844_v41 }
 0x2eb   : > { %v1574_v61 = vmul.f32 1.442695, %v1569_v59  ;;  %v4144_v59 = vld [vmem:[%s5407_s19 + $0x34] sm:$0xf] }
 0x2ed   : > { %4359 = vpow2.f32 %v1574_v61 }
 0x2ee   : > { %1669 = vrot.lane.b32.xlu2 %v1624_v60, %s4943_s26 }
 0x2f3   : > { %v4360_v62 = vpop.eup %4359 }
 0x2f4   : > { %v1583_v63 = vsel %vm1555_vm1, %v4360_v62, 0.0 }
 0x2f5   : > { %1584 = vadd.xlane.f32.xlu0 %v1583_v63 }
 0x2f8   : > { %v1564_v0 = vpop.xlane.xlu1 %1563 }
 0x2f9   : > { %v1570_v1 = vsub.f32 %v1528_v45, %v1564_v0  ;;  %v4120_v45 = vld [vmem:[%s5385_s2 + $0x30] sm:$0xff]  ;;  %v4141_v0 = vld [vmem:[%s5407_s19 + $0x1c] sm:$0xf] }
 0x2fa   : > { %1760 = vmatpush.bf16.msra.mxu1 %v4120_v45 }
 0x2fb   : > { %v1576_v2 = vmul.f32 1.442695, %v1570_v1  ;;  %v3824_v1 = vld [vmem:[%s5407_s19 + $0x24] sm:$0xf0] }
 0x2fd   : > { %4361 = vpow2.f32 %v1576_v2  ;;  %v3827_v2 = vor.u32 %v4141_v0, %v3824_v1 }
 0x2fe   : > { %4363 = vpow2.f32 %v1572_v7  ;;  %1761 = vmatpush.bf16.msra.mxu1 %v4119_v49  ;;  %v4116_v7 = vld [vmem:[%s5385_s2 + $0x10] sm:$0xff] }
 0x302   : > { %1762 = vmatpush.bf16.msra.mxu1 %v4118_v54 }
 0x303   : > { %v4362_v3 = vpop.eup %4361 }
 0x304   : > { %v1586_v4 = vsel %vm1555_vm1, %v4362_v3, 0.0  ;;  %v4364_v8 = vpop.eup %4363 }
 0x305   : > { %1587 = vadd.xlane.f32.xlu1 %v1586_v4  ;;  %v1580_v9 = vsel %vm1555_vm1, %v4364_v8, 0.0  ;;  %v3820_v4 = vld [vmem:[%s5407_s19 + $0xc] sm:$0xf0] }
 0x306   : > { %1763 = vmatpush.bf16.msra.mxu1 %v4117_v58 }
 0x309   : > { %1625 = vrot.lane.b32.xlu0 %v1624_v60, %s4945_s30 }
 0x30a   : > { %1764 = vmatpush.bf16.msra.mxu1 %v4116_v7 }
 0x31e   : > { %1647 = vrot.lane.b32.xlu1 %v1624_v60, %s4944_s4  ;;  %v3828_v60 = vld [vmem:[%s5407_s19 + $0x3c] sm:$0xf0] }
 0x31f   : > { %v3831_v61 = vor.u32 %v4144_v59, %v3828_v60 }
 0x333   : > { %1581 = vadd.xlane.f32.xlu0 %v1580_v9  ;;  %v4114_v9 = vld [vmem:[%s5385_s2] sm:$0xff] }
 0x349   : > { %v1591_v10 = vpop.xlane.xlu2 %1590 }
 0x34a   : > { %4365 = vrcp.f32 %v1591_v10  ;;  %v4123_v10 = vld [vmem:[%s5366_s20 + $0x8] sm:$0xff] }
 0x350   : > { %v4366_v11 = vpop.eup %4365 }
 0x351   : > { %v1599_v12 = vmul.f32 %v4366_v11, %v4358_v52  ;;  %v1670_v13 = vpop.permute.xlu2 %1669  ;;  %v4124_v11 = vld [vmem:[%s5366_s20 + $0x10] sm:$0xff] }
 0x352   : > { %v1675_v14 = vsel %vm1604_vm2, %v1670_v13, 0 }
 0x353   : > { %v1668_v16 = vpack.c.bf16 %v1599_v12, %v1599_v12  ;;  %1684 = vmatpush.bf16.msrb.mxu0 %v1675_v14  ;;  %v4125_v14 = vld [vmem:[%s5366_s20 + $0x18] sm:$0xff] }
 0x356   : > { %3723 = vmatmul.msk.bf16.vlgmr.msrb.gmra.mxu0 %vm1555_vm1, %v1668_v16 }
 0x368   : > { %v1585_v17 = vpop.xlane.xlu0 %1584 }
 0x369   : > { %4367 = vrcp.f32 %v1585_v17 }
 0x36f   : > { %v4368_v15 = vpop.eup %4367 }
 0x370   : > { %v1597_v18 = vmul.f32 %v4368_v15, %v4360_v62 }
 0x372   : > { %v1621_v21 = vpack.c.bf16 %v1597_v18, %v1597_v18 }
 0x378   : > { %v1588_v22 = vpop.xlane.xlu1 %1587 }
 0x379   : > { %4369 = vrcp.f32 %v1588_v22  ;;  %v4128_v22 = vld [vmem:[%s5366_s20 + $0x30] sm:$0xff] }
 0x37b   : > { %v1626_v19 = vpop.permute.xlu0 %1625 }
 0x37c   : > { %v1631_v20 = vsel %vm1604_vm2, %v1626_v19, 0 }
 0x37d   : > { %1640 = vmatpush.bf16.msrb.mxu2 %v1631_v20  ;;  %v4126_v20 = vld [vmem:[%s5366_s20 + $0x20] sm:$0xff] }
 0x37f   : > { %v4370_v23 = vpop.eup %4369 }
 0x380   : > { %3721 = vmatmul.msk.bf16.vlgmr.msrb.gmra.mxu2 %vm1555_vm1, %v1621_v21  ;;  %v1598_v24 = vmul.f32 %v4370_v23, %v4362_v3  ;;  %v4138_v3 = vld [vmem:[%s5407_s19 + $0x4] sm:$0xf]  ;;  %v4127_v21 = vld [vmem:[%s5366_s20 + $0x28] sm:$0xff]  ;;  %v4129_v23 = vld [vmem:[%s5366_s20 + $0x38] sm:$0xff]  ;;  %s6167_s20 = scalar_lea.vmem [#allocation13], %s5373_s29 }
 0x381   : > { %v3823_v5 = vor.u32 %v4138_v3, %v3820_v4 }
 0x382   : > { %v1646_v27 = vpack.c.bf16 %v1598_v24, %v1598_v24 }
 0x390   : > { %v1648_v25 = vpop.permute.xlu1 %1647 }
 0x391   : > { %v1653_v26 = vsel %vm1604_vm2, %v1648_v25, 0 }
 0x392   : > { %1662 = vmatpush.bf16.msra.mxu3 %v1653_v26 }
 0x395   : > { %3722 = vmatmul.msk.bf16.vlgmr.msra.gmra.mxu3 %vm1555_vm1, %v1646_v27 }
 0x396   : > { %2034 = vmatpush.bf16.msrb.mxu3 %v3851_v40 }
 0x39a   : > { %2035 = vmatpush.bf16.msrb.mxu3 %v3847_v44  ;;  %v4347_v44 = vld [vmem:[%s6166_s9] ss:$0 sm:$0xff]  ;;  %s6181_s9 = sld [smem:[#allocation39_spill]] }
 0x39e   : > { %2036 = vmatpush.bf16.msrb.mxu3 %v3843_v48 }
 0x3a2   : > { %2037 = vmatpush.bf16.msrb.mxu3 %v3839_v53 }
 0x3a6   : > { %v1582_v28 = vpop.xlane.xlu0 %1581  ;;  %2038 = vmatpush.bf16.msrb.mxu3 %v3835_v57 }
 0x3a7   : > { %4371 = vrcp.f32 %v1582_v28 }
 0x3aa   : > { %2039 = vmatpush.bf16.msrb.mxu3 %v3831_v61 }
 0x3ad   : > { %v4372_v29 = vpop.eup %4371 }
 0x3ae   : > { %v1596_v30 = vmul.f32 %v4372_v29, %v4364_v8  ;;  %2040 = vmatpush.bf16.msrb.mxu3 %v3827_v2  ;;  %v4115_v8 = vld [vmem:[%s5385_s2 + $0x8] sm:$0xff] }
 0x3af   : > { %1765 = vmatpush.bf16.msra.mxu1 %v4115_v8 }
 0x3b0   : > { %v1600_v31 = vpack.c.bf16 %v1596_v30, %v1596_v30 }
 0x3b2   : > { %3720 = vmatmul.msk.bf16.vlgmr.msrb.gmra.mxu1 %vm1555_vm1, %v1600_v31  ;;  %2041 = vmatpush.bf16.msrb.mxu3 %v3823_v5 }
 0x3b3   : > { %1766 = vmatpush.bf16.msra.mxu1 %v4114_v9 }
 0x3b5   : > { %2042 = vmatmul.bf16.vlgmr.msrb.gmra.mxu3 %v4122_v6 }
 0x3c5   : > { %2047 = vmatmul.bf16.gmra.mxu3 %v4123_v10 }
 0x3d3   : > { %v1686_v32 = vpop.f32.mrf.mxu0 }
 0x3d5   : > { %2052 = vmatmul.bf16.gmra.mxu3 %v4124_v11 }
 0x3db   : > { %v1688_v33 = vpop.f32.mrf.mxu0 }
 0x3e5   : > { %2057 = vmatmul.bf16.gmra.mxu3 %v4125_v14 }
 0x3f5   : > { %2062 = vmatmul.bf16.gmra.mxu3 %v4126_v20 }
 0x403   : > { %v1642_v34 = vpop.f32.mrf.mxu2 }
 0x404   : > { %1691 = vrot.lane.b32.xlu1 %v1642_v34, %s4943_s26 }
 0x405   : > { %2067 = vmatmul.bf16.gmra.mxu3 %v4127_v21  ;;  %v4946_v21 = vmov 128.0  }
 0x406   : > { %4373 = vrcp.f32 %v4946_v21  ;;  %v4148_v21 = vld [vmem:[%s5407_s19 + $0x50] sm:$0xf0] }
 0x40b   : > { %v1644_v35 = vpop.f32.mrf.mxu2 }
 0x40c   : > { %1699 = vrot.lane.b32.xlu1 %v1686_v32, %s4945_s30 }
 0x415   : > { %2072 = vmatmul.bf16.gmra.mxu3 %v4128_v22 }
 0x418   : > { %v1664_v39 = vpop.f32.mrf.mxu3 }
 0x419   : > { %1695 = vrot.lane.b32.xlu2 %v1664_v39, %s4944_s4 }
 0x420   : > { %v1666_v52 = vpop.f32.mrf.mxu3 }
 0x425   : > { %2077 = vmatmul.bf16.gmra.mxu3 %v4129_v23  ;;  %v3914_v23 = vld [vmem:[%s5407_s19 + $0xb0] sm:$0xf] }
 0x42f   : > { %v1617_v62 = vpop.f32.mrf.mxu1 }
 0x437   : > { %v1619_v63 = vpop.f32.mrf.mxu1 }
 0x438   : > { %v2043_v24 = vpop.f32.mrf.mxu3 }
 0x439   : > { %v2230_v27 = vpack.c.bf16 %v2043_v24, %v2043_v24  ;;  %v4161_v24 = vld [vmem:[%s5407_s19 + $0xb8] sm:$0xf0] }
 0x43b   : > { %v2278_v28 = vunpack.c.l.b16 %v2230_v27  ;;  %v4158_v27 = vld [vmem:[%s5407_s19 + $0xa0] sm:$0xf0] }
 0x440   : > { %v2045_v25 = vpop.f32.mrf.mxu3 }
 0x441   : > { %v2231_v29 = vpack.c.bf16 %v2045_v25, %v2045_v25  ;;  %v3915_v25 = vor.u32 %v4161_v24, %v3914_v23  ;;  %v3766_v24 = vld [vmem:[%s5407_s19 + $0x30] sm:$0xf] }
 0x443   : > { %v2279_v31 = vunpack.c.l.b16 %v2231_v29  ;;  %2179 = vmatpush.bf16.msra.mxu0 %v3915_v25  ;;  %v4374_v29 = vpop.eup %4373  ;;  %v4145_v25 = vld [vmem:[%s5407_s19 + $0x38] sm:$0xf0] }
 0x444   : > { %vm1782_vm5 = vweird.f32 %v4374_v29 }
 0x445   : > { %v5625_v33 = vpack.c.b16 %v2279_v31, %v2278_v28  ;;  %v4155_v31 = vld [vmem:[%s5407_s19 + $0x88] sm:$0xf0] }
 0x448   : > { %v2048_v26 = vpop.f32.mrf.mxu3 }
 0x449   : > { %v2232_v30 = vpack.c.bf16 %v2048_v26, %v2048_v26  ;;  %v3910_v26 = vld [vmem:[%s5407_s19 + $0x98] sm:$0xf] }
 0x44a   : > { %v3911_v28 = vor.u32 %v4158_v27, %v3910_v26  ;;  %v3762_v26 = vld [vmem:[%s5407_s19 + $0x18] sm:$0xf]  ;;  %v4142_v27 = vld [vmem:[%s5407_s19 + $0x20] sm:$0xf0] }
 0x44b   : > { %v2280_v34 = vunpack.c.l.b16 %v2232_v30  ;;  %v3906_v30 = vld [vmem:[%s5407_s19 + $0x80] sm:$0xf] }
 0x44c   : > { %2180 = vmatpush.bf16.msra.mxu0 %v3911_v28  ;;  %v3763_v28 = vor.u32 %v4142_v27, %v3762_v26 }
 0x450   : > { %v2050_v32 = vpop.f32.mrf.mxu3 }
 0x451   : > { %v2233_v35 = vpack.c.bf16 %v2050_v32, %v2050_v32 }
 0x453   : > { %v2281_v36 = vunpack.c.l.b16 %v2233_v35  ;;  %v3907_v35 = vor.u32 %v4155_v31, %v3906_v30  ;;  %v4139_v30 = vld [vmem:[%s5407_s19 + $0x8] sm:$0xf0] }
 0x455   : > { %v5627_v37 = vpack.c.b16 %v2281_v36, %v2280_v34  ;;  %v1778_v34 = vmul.f32 128.0, %v4374_v29  ;;  %v3902_v36 = vld [vmem:[%s5407_s19 + $0x68] sm:$0xf]  ;;  %2181 = vmatpush.bf16.msra.mxu0 %v3907_v35 }
 0x458   : > { %v2053_v38 = vpop.f32.mrf.mxu3 }
 0x459   : > { %v2234_v39 = vpack.c.bf16 %v2053_v38, %v2053_v38  ;;  %v4152_v38 = vld [vmem:[%s5407_s19 + $0x70] sm:$0xf0] }
 0x45b   : > { %v2282_v41 = vunpack.c.l.b16 %v2234_v39  ;;  %v1779_v39 = vsub.f32 1.0, %v1778_v34  ;;  %v4133_v34 = vld [vmem:[%s5358_s1 + $0x18] sm:$0xff] }
 0x460   : > { %v2055_v40 = vpop.f32.mrf.mxu3 }
 0x461   : > { %v2235_v43 = vpack.c.bf16 %v2055_v40, %v2055_v40  ;;  %v3903_v40 = vor.u32 %v4152_v38, %v3902_v36 }
 0x463   : > { %v2283_v45 = vunpack.c.l.b16 %v2235_v43  ;;  %v4149_v43 = vld [vmem:[%s5407_s19 + $0x58] sm:$0xf0]  ;;  %2182 = vmatpush.bf16.msra.mxu0 %v3903_v40 }
 0x465   : > { %v5631_v47 = vpack.c.b16 %v2283_v45, %v2282_v41  ;;  %v3898_v41 = vld [vmem:[%s5407_s19 + $0x50] sm:$0xf]  ;;  %v1780_v45 = vmul.f32 %v4374_v29, %v1779_v39  ;;  %v4134_v39 = vld [vmem:[%s5358_s1 + $0x20] sm:$0xff] }
 0x468   : > { %v2058_v50 = vpop.f32.mrf.mxu3 }
 0x469   : > { %v2236_v52 = vpack.c.bf16 %v2058_v50, %v2058_v50 }
 0x46b   : > { %v2284_v54 = vunpack.c.l.b16 %v2236_v52 }
 0x470   : > { %v2060_v53 = vpop.f32.mrf.mxu3 }
 0x471   : > { %v2237_v55 = vpack.c.bf16 %v2060_v53, %v2060_v53  ;;  %v3894_v53 = vld [vmem:[%s5407_s19 + $0x38] sm:$0xf] }
 0x473   : > { %v1696_v16 = vpop.permute.xlu2 %1695  ;;  %v2285_v56 = vunpack.c.l.b16 %v2237_v55 }
 0x475   : > { %v5637_v57 = vpack.c.b16 %v2285_v56, %v2284_v54  ;;  %v4146_v54 = vld [vmem:[%s5407_s19 + $0x40] sm:$0xf0] }
 0x476   : > { %v1692_v12 = vpop.permute.xlu1 %1691  ;;  %v3895_v56 = vor.u32 %v4146_v54, %v3894_v53  ;;  %v4136_v54 = vld [vmem:[%s5358_s1 + $0x30] sm:$0xff] }
 0x477   : > { %v1702_v13 = vsel %vm1460_vm0, %v1617_v62, %v1692_v12 }
 0x478   : > { %v1704_v17 = vsel %vm1703_vm3, %v1702_v13, %v1696_v16  ;;  %v2063_v58 = vpop.f32.mrf.mxu3 }
 0x479   : > { %v2238_v59 = vpack.c.bf16 %v2063_v58, %v2063_v58  ;;  %v3890_v58 = vld [vmem:[%s5407_s19 + $0x20] sm:$0xf] }
 0x47b   : > { %v2286_v61 = vunpack.c.l.b16 %v2238_v59  ;;  %v4143_v59 = vld [vmem:[%s5407_s19 + $0x28] sm:$0xf0] }
 0x47e   : > { %v1700_v15 = vpop.permute.xlu1 %1699 }
 0x47f   : > { %v1706_v18 = vsel %vm1705_vm4, %v1704_v17, %v1700_v15 }
 0x480   : > { %v1707_v19 = vpack.c.bf16 %v1706_v18, %v1706_v18  ;;  %v2065_v60 = vpop.f32.mrf.mxu3 }
 0x481   : > { %v2239_v62 = vpack.c.bf16 %v2065_v60, %v2065_v60 }
 0x482   : > { %1767 = vmatmul.bf16.vlgmr.msra.gmra.mxu1 %v1707_v19 }
 0x483   : > { %v2287_v63 = vunpack.c.l.b16 %v2239_v62 }
 0x485   : > { %v5639_v0 = vpack.c.b16 %v2287_v63, %v2286_v61  ;;  %v3891_v61 = vor.u32 %v4143_v59, %v3890_v58  ;;  %v2315_v63 = vsel %vm1460_vm0, %v5637_v57, 0 }
 0x487   : > { %v2318_v52 = vsel %vm1460_vm0, %v5639_v0, 0 }
 0x4ff   : > { %v1768_v46 = vpop.f32.mrf.mxu1 }
 0x500   : > { %v1769_v48 = vadd.f32 %v4347_v44, %v1768_v46  ;;  %v3899_v46 = vor.u32 %v4149_v43, %v3898_v41 }
 0x502   : > { %v5634_v49 = vadd.f32 %v1769_v48, %v5525_v42  ;;  %v2068_v42 = vpop.f32.mrf.mxu3  ;;  %v1781_v48 = vadd.f32 %v4374_v29, %v1780_v45  ;;  %2183 = vmatpush.bf16.msra.mxu0 %v3899_v46 }
 0x503   : > { %v2240_v14 = vpack.c.bf16 %v2068_v42, %v2068_v42  ;;  %v3886_v42 = vld [vmem:[%s5407_s19 + $0x8] sm:$0xf] }
 0x504   : > { %1775 = vadd.xlane.f32.xlu2 %v5634_v49  ;;  %v5679_v50 = vsel %vm1782_vm5, %v4374_v29, %v1781_v48  ;;  %v3758_v29 = vld [vmem:[%s5407_s19] sm:$0xf] }
 0x505   : > { %v2288_v18 = vunpack.c.l.b16 %v2240_v14  ;;  %v4154_v14 = vld [vmem:[%s5407_s19 + $0x80] sm:$0xf0]  ;;  %v3759_v31 = vor.u32 %v4139_v30, %v3758_v29 }
 0x506   : > { %2184 = vmatpush.bf16.msra.mxu0 %v3895_v56 }
 0x507   : > { %v1770_v51 = vpop.f32.mrf.mxu1 }
 0x50a   : > { %v2070_v1 = vpop.f32.mrf.mxu3  ;;  %2185 = vmatpush.bf16.msra.mxu0 %v3891_v61 }
 0x50b   : > { %v2241_v16 = vpack.c.bf16 %v2070_v1, %v2070_v1  ;;  %v4140_v1 = vld [vmem:[%s5407_s19 + $0x10] sm:$0xf0] }
 0x50d   : > { %v2289_v19 = vunpack.c.l.b16 %v2241_v16 }
 0x50f   : > { %v5648_v20 = vpack.c.b16 %v2289_v19, %v2288_v18  ;;  %v3770_v19 = vld [vmem:[%s5407_s19 + $0x48] sm:$0xf] }
 0x510   : > { %v3771_v23 = vor.u32 %v4148_v21, %v3770_v19 }
 0x511   : > { %v2321_v44 = vsel %vm1460_vm0, %v5648_v20, 0 }
 0x512   : > { %v2073_v2 = vpop.f32.mrf.mxu3 }
 0x513   : > { %v2242_v3 = vpack.c.bf16 %v2073_v2, %v2073_v2  ;;  %v4130_v2 = vld [vmem:[%s5358_s1] sm:$0xff] }
 0x515   : > { %v2290_v5 = vunpack.c.l.b16 %v2242_v3  ;;  %v2312_v3 = vsel %vm1460_vm0, %v5631_v47, 0 }
 0x51a   : > { %v2075_v4 = vpop.f32.mrf.mxu3 }
 0x51b   : > { %v2243_v6 = vpack.c.bf16 %v2075_v4, %v2075_v4  ;;  %v2309_v4 = vsel %vm1460_vm0, %v5627_v37, 0 }
 0x51d   : > { %v2291_v7 = vunpack.c.l.b16 %v2243_v6  ;;  %v4160_v6 = vld [vmem:[%s5407_s19 + $0xb0] sm:$0xf0] }
 0x51f   : > { %v2300_v8 = vpack.c.b16 %v2291_v7, %v2290_v5  ;;  %v3786_v5 = vld [vmem:[%s5407_s19 + $0xa8] sm:$0xf] }
 0x520   : > { %v3787_v7 = vor.u32 %v4160_v6, %v3786_v5  ;;  %v4137_v5 = vld [vmem:[%s5358_s1 + $0x38] sm:$0xff] }
 0x521   : > { %2359 = vrot.lane.b32.xlu2 %v2300_v8, %s4945_s30  ;;  %v2324_v32 = vsel %vm1460_vm0, %v2300_v8, 0 }
 0x522   : > { %v2078_v9 = vpop.f32.mrf.mxu3  ;;  %1941 = vmatpush.bf16.msra.mxu2 %v3787_v7 }
 0x523   : > { %v2244_v10 = vpack.c.bf16 %v2078_v9, %v2078_v9  ;;  %v2306_v9 = vsel %vm1460_vm0, %v5625_v33, 0 }
 0x525   : > { %v2292_v12 = vunpack.c.l.b16 %v2244_v10  ;;  %v3782_v10 = vld [vmem:[%s5407_s19 + $0x90] sm:$0xf] }
 0x52a   : > { %v2080_v11 = vpop.f32.mrf.mxu3 }
 0x52b   : > { %v2245_v13 = vpack.c.bf16 %v2080_v11, %v2080_v11  ;;  %v4157_v11 = vld [vmem:[%s5407_s19 + $0x98] sm:$0xf0] }
 0x52d   : > { %v2293_v17 = vunpack.c.l.b16 %v2245_v13  ;;  %v3778_v13 = vld [vmem:[%s5407_s19 + $0x78] sm:$0xf] }
 0x52e   : > { %v3779_v16 = vor.u32 %v4154_v14, %v3778_v13 }
 0x52f   : > { %v5642_v15 = vpack.c.b16 %v2293_v17, %v2292_v12  ;;  %v3783_v12 = vor.u32 %v4157_v11, %v3782_v10  ;;  %v3774_v17 = vld [vmem:[%s5407_s19 + $0x60] sm:$0xf] }
 0x531   : > { %2361 = vrot.lane.b32.xlu0 %v5642_v15, %s4945_s30  ;;  %2419 = vrot.lane.b32.xlu2 %v5642_v15, %s4944_s4  ;;  %v2327_v22 = vsel %vm1460_vm0, %v5642_v15, 0 }
 0x532   : > { %2329 = vmatpush.bf16.xpose.msrb.mxu1 %v2327_v22  ;;  %1942 = vmatpush.bf16.msra.mxu2 %v3783_v12  ;;  %v4132_v22 = vld [vmem:[%s5358_s1 + $0x10] sm:$0xff] }
 0x536   : > { %1943 = vmatpush.bf16.msra.mxu2 %v3779_v16 }
 0x539   : > { %2357 = vrot.lane.b32.xlu0 %v5648_v20, %s4945_s30  ;;  %2417 = vrot.lane.b32.xlu2 %v2300_v8, %s4944_s4 }
 0x53a   : > { %2330 = vmatpush.bf16.xpose.msrb.mxu1 %v2324_v32 }
 0x541   : > { %2355 = vrot.lane.b32.xlu0 %v5639_v0, %s4945_s30  ;;  %2415 = vrot.lane.b32.xlu2 %v5648_v20, %s4944_s4 }
 0x542   : > { %2331 = vmatpush.bf16.xpose.msrb.mxu1 %v2321_v44  ;;  %v4135_v44 = vld [vmem:[%s5358_s1 + $0x28] sm:$0xff] }
 0x549   : > { %2475 = vrot.lane.b32.xlu0 %v2300_v8, %s4943_s26  ;;  %2413 = vrot.lane.b32.xlu2 %v5639_v0, %s4944_s4  ;;  %v4131_v8 = vld [vmem:[%s5358_s1 + $0x8] sm:$0xff]  ;;  %s6170_s1 = sld [smem:[#allocation56_spill]] }
 0x54a   : > { %2332 = vmatpush.bf16.xpose.msrb.mxu1 %v2318_v52 }
 0x54f   : > { %s6172_s23 = scalar_lea.vmem %s6171_s21, %s6170_s1  ;;  %s6183_s1 = sld [smem:[#allocation78_spill]] }
 0x551   : > { %2353 = vrot.lane.b32.xlu0 %v5637_v57, %s4945_s30  ;;  %2411 = vrot.lane.b32.xlu2 %v5637_v57, %s4944_s4 }
 0x552   : > { %2333 = vmatpush.bf16.xpose.msrb.mxu1 %v2315_v63 }
 0x559   : > { %2351 = vrot.lane.b32.xlu0 %v5631_v47, %s4945_s30  ;;  %2409 = vrot.lane.b32.xlu2 %v5631_v47, %s4944_s4 }
 0x55a   : > { %2334 = vmatpush.bf16.xpose.msrb.mxu1 %v2312_v3 }
 0x561   : > { %2349 = vrot.lane.b32.xlu0 %v5627_v37, %s4945_s30 }
 0x562   : > { %2335 = vmatpush.bf16.xpose.msrb.mxu1 %v2309_v4 }
 0x569   : > { %2347 = vrot.lane.b32.xlu0 %v5625_v33, %s4945_s30 }
 0x56a   : > { %2336 = vmatpush.bf16.xpose.msrb.mxu1 %v2306_v9  ;;  %v4348_v9 = vld [vmem:[%s6167_s20] ss:$0 sm:$0xff] }
 0x577   : > { %v1776_v51 = vpop.xlane.xlu2 %1775 }
 0x578   : > { %v1784_v55 = vmul.f32 %v5679_v50, %v1776_v51 }
 0x57a   : > { %v5691_v60 = vsub.f32 %v5634_v49, %v1784_v55  ;;  %v3887_v49 = vor.u32 %v4140_v1, %v3886_v42 }
 0x57c   : > { %v1786_v62 = vmul.f32 %v5691_v60, %v5691_v60  ;;  %2186 = vmatpush.bf16.msra.mxu0 %v3887_v49 }
 0x57e   : > { %1787 = vadd.xlane.f32.xlu1 %v1786_v62 }
 0x57f   : > { %2187 = vmatmul.bf16.vlgmr.msra.gmra.mxu0 %v4130_v2 }
 0x58f   : > { %2192 = vmatmul.bf16.gmra.mxu0 %v4131_v8 }
 0x597   : > { %2477 = vrot.lane.b32.xlu1 %v5642_v15, %s4943_s26  ;;  %v4151_v15 = vld [vmem:[%s5407_s19 + $0x68] sm:$0xf0]  ;;  %s6168_s19 = sld [smem:[#allocation66_spill]] }
 0x598   : > { %v3775_v18 = vor.u32 %v4151_v15, %v3774_v17 }
 0x59a   : > { %1944 = vmatpush.bf16.msra.mxu2 %v3775_v18 }
 0x59d   : > { %s6169_s18 = scalar_lea.vmem %s6168_s19, %s5453_s28  ;;  %s4788_s28 = scalar_lea.hbm %s6183_s1, 16 }
 0x59e   : > { %1945 = vmatpush.bf16.msra.mxu2 %v3771_v23  ;;  %v4349_v12 = vld [vmem:[%s6169_s18] ss:$0 sm:$0xff]  ;;  %v4401_v23 = vld [vmem:[#allocation8] sm:$0xff] }
 0x59f   : > { %2473 = vrot.lane.b32.xlu1 %v5648_v20, %s4943_s26  ;;  %2197 = vmatmul.bf16.gmra.mxu0 %v4132_v22  ;;  %v3767_v20 = vor.u32 %v4145_v25, %v3766_v24 }
 0x5a2   : > { %1946 = vmatpush.bf16.msra.mxu2 %v3767_v20 }
 0x5a6   : > { %1947 = vmatpush.bf16.msra.mxu2 %v3763_v28 }
 0x5a7   : > { %2471 = vrot.lane.b32.xlu1 %v5639_v0, %s4943_s26  ;;  %v2362_v0 = vpop.permute.xlu0 %2361 }
 0x5a8   : > { %v2388_v32 = vsel %vm1460_vm0, %v2362_v0, 0 }
 0x5aa   : > { %1948 = vmatpush.bf16.msra.mxu2 %v3759_v31 }
 0x5ae   : > { %2390 = vmatpush.bf16.xpose.msrb.mxu2 %v2388_v32 }
 0x5af   : > { %2469 = vrot.lane.b32.xlu1 %v5637_v57, %s4943_s26  ;;  %2202 = vmatmul.bf16.gmra.mxu0 %v4133_v34  ;;  %v2358_v35 = vpop.permute.xlu0 %2357  ;;  %v2360_v57 = vpop.permute.xlu2 %2359 }
 0x5b0   : > { %v2385_v36 = vsel %vm1460_vm0, %v2360_v57, 0 }
 0x5b6   : > { %2391 = vmatpush.bf16.xpose.msrb.mxu2 %v2385_v36 }
 0x5b7   : > { %2467 = vrot.lane.b32.xlu1 %v5631_v47, %s4943_s26  ;;  %v2356_v38 = vpop.permute.xlu0 %2355  ;;  %v2382_v47 = vsel %vm1460_vm0, %v2358_v35, 0  ;;  %v2420_v52 = vpop.permute.xlu2 %2419 }
 0x5b8   : > { %v2379_v41 = vsel %vm1460_vm0, %v2356_v38, 0  ;;  %v2446_v55 = vsel %vm1460_vm0, %v2420_v52, 0 }
 0x5b9   : > { %2448 = vmatpush.bf16.xpose.msra.mxu1 %v2446_v55 }
 0x5be   : > { %2392 = vmatpush.bf16.xpose.msrb.mxu2 %v2382_v47 }
 0x5bf   : > { %2465 = vrot.lane.b32.xlu1 %v5627_v37, %s4943_s26  ;;  %2207 = vmatmul.bf16.gmra.mxu0 %v4134_v39  ;;  %v5749_v40 = vpop.permute.xlu0 %2475  ;;  %v2418_v59 = vpop.permute.xlu2 %2417 }
 0x5c0   : > { %v2443_v62 = vsel %vm1460_vm0, %v2418_v59, 0  ;;  %v2501_v31 = vsel %vm1460_vm0, %v5749_v40, 0 }
 0x5c1   : > { %2449 = vmatpush.bf16.xpose.msra.mxu1 %v2443_v62 }
 0x5c6   : > { %2393 = vmatpush.bf16.xpose.msrb.mxu2 %v2379_v41 }
 0x5c7   : > { %2407 = vrot.lane.b32.xlu1 %v5627_v37, %s4944_s4  ;;  %v2354_v37 = vpop.permute.xlu0 %2353  ;;  %v2416_v3 = vpop.permute.xlu2 %2415 }
 0x5c8   : > { %v2376_v43 = vsel %vm1460_vm0, %v2354_v37, 0  ;;  %v2440_v6 = vsel %vm1460_vm0, %v2416_v3, 0 }
 0x5c9   : > { %2450 = vmatpush.bf16.xpose.msra.mxu1 %v2440_v6 }
 0x5ce   : > { %2394 = vmatpush.bf16.xpose.msrb.mxu2 %v2376_v43 }
 0x5cf   : > { %2212 = vmatmul.bf16.gmra.mxu0 %v4135_v44  ;;  %v2352_v45 = vpop.permute.xlu0 %2351  ;;  %v2414_v17 = vpop.permute.xlu2 %2413 }
 0x5d0   : > { %v2373_v46 = vsel %vm1460_vm0, %v2352_v45, 0  ;;  %v2437_v15 = vsel %vm1460_vm0, %v2414_v17, 0 }
 0x5d1   : > { %2451 = vmatpush.bf16.xpose.msra.mxu1 %v2437_v15 }
 0x5d6   : > { %2395 = vmatpush.bf16.xpose.msrb.mxu2 %v2373_v46 }
 0x5d7   : > { %v2350_v53 = vpop.permute.xlu0 %2349  ;;  %v2412_v28 = vpop.permute.xlu2 %2411 }
 0x5d8   : > { %v2370_v58 = vsel %vm1460_vm0, %v2350_v53, 0  ;;  %v2434_v29 = vsel %vm1460_vm0, %v2412_v28, 0 }
 0x5d9   : > { %2452 = vmatpush.bf16.xpose.msra.mxu1 %v2434_v29 }
 0x5de   : > { %2396 = vmatpush.bf16.xpose.msrb.mxu2 %v2370_v58 }
 0x5df   : > { %2217 = vmatmul.bf16.gmra.mxu0 %v4136_v54  ;;  %v2348_v61 = vpop.permute.xlu0 %2347  ;;  %v2410_v34 = vpop.permute.xlu2 %2409 }
 0x5e0   : > { %v2367_v42 = vsel %vm1460_vm0, %v2348_v61, 0  ;;  %v2431_v35 = vsel %vm1460_vm0, %v2410_v34, 0 }
 0x5e1   : > { %2453 = vmatpush.bf16.xpose.msra.mxu1 %v2431_v35 }
 0x5e6   : > { %2397 = vmatpush.bf16.xpose.msrb.mxu2 %v2367_v42 }
 0x5ef   : > { %2222 = vmatmul.bf16.gmra.mxu0 %v4137_v5 }
 0x5f1   : > { %v1788_v48 = vpop.xlane.xlu1 %1787 }
 0x5f2   : > { %v1789_v51 = vmul.f32 %v1788_v48, %v5679_v50 }
 0x5f4   : > { %v1790_v56 = vadd.f32 1e-05, %v1789_v51 }
 0x5f6   : > { %4375 = vrsqrt.f32 %v1790_v56  ;;  %vm1797_vm7 = vweird.f32 %v1790_v56 }
 0x5fc   : > { %v4376_v63 = vpop.eup %4375  ;;  %v2188_v7 = vpop.f32.mrf.mxu0 }
 0x5fd   : > { %v1792_v1 = vmul.f32 %v4376_v63, %v1790_v56  ;;  %vm1798_vm6 = vweird.f32 %v4376_v63  ;;  %v2246_v13 = vpack.c.bf16 %v2188_v7, %v2188_v7 }
 0x5fe   : > { %vm1799_vm8 = vmor %vm1797_vm7, %vm1798_vm6 }
 0x5ff   : > { %v1793_v49 = vmul.f32 %v4376_v63, %v1792_v1  ;;  %v2579_v21 = vunpack.c.l.b16 %v2246_v13 }
 0x601   : > { %v1794_v2 = vmul.f32 0.5, %v1793_v49 }
 0x603   : > { %v1795_v4 = vsub.f32 1.5, %v1794_v2 }
 0x604   : > { %v2190_v18 = vpop.f32.mrf.mxu0 }
 0x605   : > { %v1796_v8 = vmul.f32 %v4376_v63, %v1795_v4  ;;  %v2247_v22 = vpack.c.bf16 %v2190_v18, %v2190_v18 }
 0x607   : > { %v1800_v10 = vsel %vm1799_vm8, %v4376_v63, %v1796_v8  ;;  %v2580_v24 = vunpack.c.l.b16 %v2247_v22 }
 0x608   : > { %v1801_v11 = vmul.f32 %v1800_v10, %v5691_v60 }
 0x609   : > { %v2478_v14 = vpop.permute.xlu1 %2477  ;;  %v5776_v20 = vpack.c.b16 %v2580_v24, %v2579_v21 }
 0x60a   : > { %v1805_v16 = vmul.f32 %v4348_v9, %v1801_v11  ;;  %v2504_v26 = vsel %vm1460_vm0, %v2478_v14, 0 }
 0x60c   : > { %v5772_v19 = vadd.f32 %v4349_v12, %v1805_v16  ;;  %v2193_v30 = vpop.f32.mrf.mxu0 }
 0x60d   : > { %v2248_v0 = vpack.c.bf16 %v2193_v30, %v2193_v30 }
 0x60e   : > { %v1810_v60 = vadd.f32 %v4401_v23, %v5772_v19 }
 0x60f   : > { %v2581_v36 = vunpack.c.l.b16 %v2248_v0 }
 0x610   : > { %v1892_v25 = vpack.c.bf16 %v1810_v60, %v1810_v60 }
 0x611   : > { %v2474_v27 = vpop.permute.xlu1 %2473 }
 0x612   : > { %1949 = vmatmul.bf16.vlgmr.msra.gmra.mxu2 %v1892_v25  ;;  %v2498_v39 = vsel %vm1460_vm0, %v2474_v27, 0 }
 0x613   : > { %2506 = vmatpush.bf16.xpose.msra.mxu2 %v2504_v26 }
 0x614   : > { %v2195_v57 = vpop.f32.mrf.mxu0 }
 0x615   : > { %v2249_v38 = vpack.c.bf16 %v2195_v57, %v2195_v57 }
 0x617   : > { %v2582_v47 = vunpack.c.l.b16 %v2249_v38 }
 0x619   : > { %v2472_v32 = vpop.permute.xlu1 %2471  ;;  %v5783_v41 = vpack.c.b16 %v2582_v47, %v2581_v36 }
 0x61a   : > { %v2495_v40 = vsel %vm1460_vm0, %v2472_v32, 0 }
 0x61b   : > { %2507 = vmatpush.bf16.xpose.msra.mxu2 %v2501_v31 }
 0x61c   : > { %v2198_v43 = vpop.f32.mrf.mxu0 }
 0x61d   : > { %v2250_v44 = vpack.c.bf16 %v2198_v43, %v2198_v43 }
 0x61f   : > { %v2583_v48 = vunpack.c.l.b16 %v2250_v44  ;;  %v4350_v44 = vld [vmem:[%s6172_s23] ss:$0 sm:$0xff] }
 0x621   : > { %v2470_v37 = vpop.permute.xlu1 %2469 }
 0x622   : > { %v2492_v53 = vsel %vm1460_vm0, %v2470_v37, 0 }
 0x623   : > { %2508 = vmatpush.bf16.xpose.msra.mxu2 %v2498_v39 }
 0x624   : > { %v2200_v46 = vpop.f32.mrf.mxu0 }
 0x625   : > { %v2251_v51 = vpack.c.bf16 %v2200_v46, %v2200_v46 }
 0x627   : > { %v2584_v52 = vunpack.c.l.b16 %v2251_v51 }
 0x629   : > { %v2468_v45 = vpop.permute.xlu1 %2467  ;;  %v5787_v54 = vpack.c.b16 %v2584_v52, %v2583_v48 }
 0x62a   : > { %v2489_v56 = vsel %vm1460_vm0, %v2468_v45, 0 }
 0x62b   : > { %2509 = vmatpush.bf16.xpose.msra.mxu2 %v2495_v40 }
 0x62c   : > { %v2203_v62 = vpop.f32.mrf.mxu0 }
 0x62d   : > { %v2252_v63 = vpack.c.bf16 %v2203_v62, %v2203_v62 }
 0x62f   : > { %v2585_v1 = vunpack.c.l.b16 %v2252_v63 }
 0x631   : > { %v2466_v55 = vpop.permute.xlu1 %2465 }
 0x632   : > { %v2486_v61 = vsel %vm1460_vm0, %v2466_v55, 0 }
 0x633   : > { %2510 = vmatpush.bf16.xpose.msra.mxu2 %v2492_v53 }
 0x634   : > { %v2205_v42 = vpop.f32.mrf.mxu0 }
 0x635   : > { %v2253_v49 = vpack.c.bf16 %v2205_v42, %v2205_v42 }
 0x637   : > { %v2586_v2 = vunpack.c.l.b16 %v2253_v49 }
 0x639   : > { %v2408_v58 = vpop.permute.xlu1 %2407  ;;  %v5792_v3 = vpack.c.b16 %v2586_v2, %v2585_v1 }
 0x63a   : > { %v2428_v59 = vsel %vm1460_vm0, %v2408_v58, 0 }
 0x63b   : > { %2511 = vmatpush.bf16.xpose.msra.mxu2 %v2489_v56  ;;  %2454 = vmatpush.bf16.xpose.msra.mxu1 %v2428_v59 }
 0x63c   : > { %v2208_v4 = vpop.f32.mrf.mxu0 }
 0x63d   : > { %v2254_v24 = vpack.c.bf16 %v2208_v4, %v2208_v4 }
 0x63f   : > { %v2587_v0 = vunpack.c.l.b16 %v2254_v24 }
 0x643   : > { %2512 = vmatpush.bf16.xpose.msra.mxu2 %v2486_v61 }
 0x644   : > { %v2210_v5 = vpop.f32.mrf.mxu0 }
 0x645   : > { %v2255_v25 = vpack.c.bf16 %v2210_v5, %v2210_v5 }
 0x647   : > { %v2588_v32 = vunpack.c.l.b16 %v2255_v25 }
 0x649   : > { %v2599_v38 = vpack.c.b16 %v2588_v32, %v2587_v0 }
 0x64c   : > { %v2213_v6 = vpop.f32.mrf.mxu0 }
 0x64d   : > { %v2256_v18 = vpack.c.bf16 %v2213_v6, %v2213_v6 }
 0x64f   : > { %v2589_v27 = vunpack.c.l.b16 %v2256_v18 }
 0x654   : > { %v2215_v7 = vpop.f32.mrf.mxu0 }
 0x655   : > { %v2257_v21 = vpack.c.bf16 %v2215_v7, %v2215_v7 }
 0x657   : > { %v2590_v29 = vunpack.c.l.b16 %v2257_v21 }
 0x659   : > { %v2600_v35 = vpack.c.b16 %v2590_v29, %v2589_v27 }
 0x65c   : > { %v2218_v8 = vpop.f32.mrf.mxu0 }
 0x65d   : > { %v2258_v12 = vpack.c.bf16 %v2218_v8, %v2218_v8 }
 0x65f   : > { %v2591_v22 = vunpack.c.l.b16 %v2258_v12 }
 0x664   : > { %v2220_v9 = vpop.f32.mrf.mxu0 }
 0x665   : > { %v2259_v13 = vpack.c.bf16 %v2220_v9, %v2220_v9 }
 0x667   : > { %v2592_v23 = vunpack.c.l.b16 %v2259_v13 }
 0x669   : > { %v2601_v30 = vpack.c.b16 %v2592_v23, %v2591_v22 }
 0x66c   : > { %v2223_v10 = vpop.f32.mrf.mxu0 }
 0x66d   : > { %v2260_v14 = vpack.c.bf16 %v2223_v10, %v2223_v10 }
 0x66f   : > { %v2593_v17 = vunpack.c.l.b16 %v2260_v14 }
 0x674   : > { %v2225_v11 = vpop.f32.mrf.mxu0 }
 0x675   : > { %v2261_v16 = vpack.c.bf16 %v2225_v11, %v2225_v11 }
 0x677   : > { %v2594_v15 = vunpack.c.l.b16 %v2261_v16 }
 0x679   : > { %v2602_v60 = vpack.c.b16 %v2594_v15, %v2593_v17 }
 0x67b   : > { %2611 = vmatpush.bf16.msra.mxu3 %v2602_v60 }
 0x67f   : > { %2612 = vmatpush.bf16.msra.mxu3 %v2601_v30 }
 0x683   : > { %2613 = vmatpush.bf16.msra.mxu3 %v2600_v35 }
 0x687   : > { %2614 = vmatpush.bf16.msra.mxu3 %v2599_v38 }
 0x68b   : > { %2615 = vmatpush.bf16.msra.mxu3 %v5792_v3 }
 0x68f   : > { %2616 = vmatpush.bf16.msra.mxu3 %v5787_v54 }
 0x693   : > { %2617 = vmatpush.bf16.msra.mxu3 %v5783_v41 }
 0x695   : > { %v1950_v26 = vpop.f32.mrf.mxu2 }
 0x696   : > { %v2228_v28 = vmul.f32 0.17677669, %v1950_v26 }
 0x697   : > { %2618 = vmatpush.bf16.msra.mxu3 %v5776_v20 }
 0x698   : > { %v2229_v31 = vpack.c.bf16 %v2228_v28, %v2228_v28 }
 0x69a   : > { %v2343_v34 = vunpack.c.l.b16 %v2229_v31  ;;  %3916 = vmatmul.msk.bf16.vlgmr.msrb.gmra.mxu1 %vm1460_vm0, %v2229_v31 }
 0x69c   : > { %v2344_v57 = vpack.c.b16 %v2343_v34, %v2343_v34 }
 0x69d   : > { %v1952_v36 = vpop.f32.mrf.mxu2 }
 0x69e   : > { %2403 = vrot.lane.b32.xlu1 %v2344_v57, %s4944_s4  ;;  %2461 = vrot.lane.b32.xlu2 %v2344_v57, %s4943_s26 }
 0x69f   : > { %2345 = vrot.lane.b32.xlu0 %v2344_v57, %s4945_s30 }
 0x6a6   : > { %2713 = vrot.lane.b32.xlu1 %v2601_v30, %s4943_s26  ;;  %2715 = vrot.lane.b32.xlu2 %v2602_v60, %s4943_s26 }
 0x6a7   : > { %2463 = vrot.lane.b32.xlu0 %v5625_v33, %s4943_s26 }
 0x6ae   : > { %2637 = vrot.lane.b32.xlu1 %v2601_v30, %s4945_s30  ;;  %2677 = vrot.lane.b32.xlu2 %v2602_v60, %s4944_s4 }
 0x6af   : > { %2405 = vrot.lane.b32.xlu0 %v5625_v33, %s4944_s4 }
 0x6b6   : > { %2675 = vrot.lane.b32.xlu1 %v2601_v30, %s4944_s4  ;;  %2711 = vrot.lane.b32.xlu2 %v2600_v35, %s4943_s26 }
 0x6b7   : > { %2639 = vrot.lane.b32.xlu0 %v2602_v60, %s4945_s30 }
 0x6be   : > { %2709 = vrot.lane.b32.xlu1 %v2599_v38, %s4943_s26  ;;  %2635 = vrot.lane.b32.xlu2 %v2600_v35, %s4945_s30 }
 0x6bf   : > { %2631 = vrot.lane.b32.xlu0 %v5792_v3, %s4945_s30 }
 0x6c6   : > { %2633 = vrot.lane.b32.xlu1 %v2599_v38, %s4945_s30  ;;  %2673 = vrot.lane.b32.xlu2 %v2600_v35, %s4944_s4 }
 0x6ce   : > { %2707 = vrot.lane.b32.xlu2 %v5792_v3, %s4943_s26  ;;  %2671 = vrot.lane.b32.xlu1 %v2599_v38, %s4944_s4 }
 0x6d6   : > { %2629 = vrot.lane.b32.xlu2 %v5787_v54, %s4945_s30  ;;  %2705 = vrot.lane.b32.xlu1 %v5787_v54, %s4943_s26 }
 0x6de   : > { %2627 = vrot.lane.b32.xlu2 %v5783_v41, %s4945_s30  ;;  %2669 = vrot.lane.b32.xlu1 %v5792_v3, %s4944_s4 }
 0x6f8   : > { %v2462_v33 = vpop.permute.xlu2 %2461 }
 0x700   : > { %v2716_v47 = vpop.permute.xlu2 %2715 }
 0x708   : > { %v2678_v39 = vpop.permute.xlu2 %2677 }
 0x710   : > { %v2404_v37 = vpop.permute.xlu1 %2403  ;;  %v2712_v43 = vpop.permute.xlu2 %2711 }
 0x711   : > { %v2346_v40 = vpop.permute.xlu0 %2345 }
 0x712   : > { %3917 = vmatmul.msk.bf16.vlgmr.msrb.gmra.mxu2 %vm1460_vm0, %v2346_v40 }
 0x717   : > { %v2338_v45 = vpop.f32.mrf.mxu1 }
 0x718   : > { %v5836_v46 = vadd.f32 %v4350_v44, %v2338_v45  ;;  %v2714_v48 = vpop.permute.xlu1 %2713  ;;  %v2636_v53 = vpop.permute.xlu2 %2635 }
 0x719   : > { %v2464_v51 = vpop.permute.xlu0 %2463 }
 0x71a   : > { %v2483_v52 = vsel %vm1460_vm0, %v2464_v51, 0  ;;  %2526 = vmax.xlane.f32.xlu0 %v5836_v46 }
 0x71b   : > { %2513 = vmatpush.bf16.xpose.msra.mxu2 %v2483_v52 }
 0x71f   : > { %v2340_v55 = vpop.f32.mrf.mxu1 }
 0x720   : > { %v2638_v56 = vpop.permute.xlu1 %2637  ;;  %v2674_v61 = vpop.permute.xlu2 %2673 }
 0x721   : > { %v2406_v58 = vpop.permute.xlu0 %2405 }
 0x722   : > { %v2425_v59 = vsel %vm1460_vm0, %v2406_v58, 0  ;;  %3919 = vmatmul.msk.bf16.vlgmr.msra.gmra.mxu2 %vm1460_vm0, %v2462_v33 }
 0x723   : > { %2725 = vmatpush.bf16.msrb.mxu2 %v2716_v47  ;;  %2455 = vmatpush.bf16.xpose.msra.mxu1 %v2425_v59 }
 0x727   : > { %2726 = vmatpush.bf16.msrb.mxu2 %v2714_v48 }
 0x728   : > { %v2676_v62 = vpop.permute.xlu1 %2675  ;;  %v2708_v42 = vpop.permute.xlu2 %2707 }
 0x729   : > { %v2640_v63 = vpop.permute.xlu0 %2639 }
 0x72a   : > { %3918 = vmatmul.msk.bf16.vlgmr.msra.gmra.mxu1 %vm1460_vm0, %v2404_v37  ;;  %2649 = vmatpush.bf16.msrb.mxu0 %v2640_v63 }
 0x72b   : > { %2727 = vmatpush.bf16.msrb.mxu2 %v2712_v43  ;;  %2687 = vmatpush.bf16.msrb.mxu1 %v2678_v39 }
 0x72e   : > { %2650 = vmatpush.bf16.msrb.mxu0 %v2638_v56 }
 0x72f   : > { %2688 = vmatpush.bf16.msrb.mxu1 %v2676_v62 }
 0x730   : > { %v2710_v1 = vpop.permute.xlu1 %2709  ;;  %v2630_v2 = vpop.permute.xlu2 %2629 }
 0x731   : > { %2728 = vmatpush.bf16.msrb.mxu2 %v2710_v1  ;;  %v2632_v3 = vpop.permute.xlu0 %2631 }
 0x732   : > { %2651 = vmatpush.bf16.msrb.mxu0 %v2636_v53 }
 0x733   : > { %2689 = vmatpush.bf16.msrb.mxu1 %v2674_v61 }
 0x735   : > { %2729 = vmatpush.bf16.msrb.mxu2 %v2708_v42  ;;  %v4169_v42 = vld [vmem:[%s6173_s27 + $0x38] sm:$0xff] }
 0x736   : > { %2805 = vmatpush.bf16.msrb.mxu3 %v4169_v42  ;;  %v4173_v42 = vld [vmem:[%s6174_s3 + $0x14] sm:$0xf0] }
 0x738   : > { %v2634_v49 = vpop.permute.xlu1 %2633  ;;  %v2628_v5 = vpop.permute.xlu2 %2627 }
 0x739   : > { %2652 = vmatpush.bf16.msrb.mxu0 %v2634_v49  ;;  %v4168_v49 = vld [vmem:[%s6173_s27 + $0x30] sm:$0xff] }
 0x73a   : > { %2806 = vmatpush.bf16.msrb.mxu3 %v4168_v49 }
 0x73d   : > { %2653 = vmatpush.bf16.msrb.mxu0 %v2632_v3  ;;  %v4167_v3 = vld [vmem:[%s6173_s27 + $0x28] sm:$0xff] }
 0x73e   : > { %2807 = vmatpush.bf16.msrb.mxu3 %v4167_v3 }
 0x740   : > { %v2672_v4 = vpop.permute.xlu1 %2671 }
 0x741   : > { %2654 = vmatpush.bf16.msrb.mxu0 %v2630_v2  ;;  %2690 = vmatpush.bf16.msrb.mxu1 %v2672_v4  ;;  %v4166_v4 = vld [vmem:[%s6173_s27 + $0x20] sm:$0xff] }
 0x742   : > { %2808 = vmatpush.bf16.msrb.mxu3 %v4166_v4  ;;  %v3954_v4 = vld [vmem:[%s6174_s3] sm:$0xf] }
 0x745   : > { %2655 = vmatpush.bf16.msrb.mxu0 %v2628_v5  ;;  %v4165_v5 = vld [vmem:[%s6173_s27 + $0x18] sm:$0xff] }
 0x746   : > { %2809 = vmatpush.bf16.msrb.mxu3 %v4165_v5  ;;  %v4171_v5 = vld [vmem:[%s6174_s3 + $0x4] sm:$0xf0] }
 0x748   : > { %v2706_v6 = vpop.permute.xlu1 %2705 }
 0x749   : > { %2730 = vmatpush.bf16.msrb.mxu2 %v2706_v6  ;;  %v4164_v6 = vld [vmem:[%s6173_s27 + $0x10] sm:$0xff] }
 0x74a   : > { %2810 = vmatpush.bf16.msrb.mxu3 %v4164_v6  ;;  %v4170_v6 = vld [vmem:[%s6174_s3 + $0x4] sm:$0xf] }
 0x750   : > { %v2670_v7 = vpop.permute.xlu1 %2669 }
 0x751   : > { %2691 = vmatpush.bf16.msrb.mxu1 %v2670_v7  ;;  %v4163_v7 = vld [vmem:[%s6173_s27 + $0x8] sm:$0xff] }
 0x752   : > { %2811 = vmatpush.bf16.msrb.mxu3 %v4163_v7  ;;  %v3955_v7 = vor.u32 %v4171_v5, %v3954_v4 }
 0x78d   : > { %v2527_v15 = vpop.xlane.xlu0 %2526 }
 0x78e   : > { %v2534_v32 = vsub.f32 %v5836_v46, %v2527_v15 }
 0x790   : > { %v2538_v34 = vmul.f32 1.442695, %v2534_v32 }
 0x795   : > { %v2399_v8 = vpop.f32.mrf.mxu2 }
 0x796   : > { %v2523_v9 = vadd.f32 %v4350_v44, %v2399_v8  ;;  %v4162_v8 = vld [vmem:[%s6173_s27] sm:$0xff] }
 0x797   : > { %2812 = vmatpush.bf16.msrb.mxu3 %v4162_v8  ;;  %v3956_v8 = vld [vmem:[%s6174_s3 + $0x8] sm:$0xf0] }
 0x798   : > { %2528 = vmax.xlane.f32.xlu0 %v2523_v9 }
 0x79d   : > { %v2401_v10 = vpop.f32.mrf.mxu2 }
 0x7a5   : > { %v2515_v11 = vpop.f32.mrf.mxu2 }
 0x7a6   : > { %v2525_v12 = vadd.f32 %v4350_v44, %v2515_v11 }
 0x7a7   : > { %v2457_v13 = vpop.f32.mrf.mxu1 }
 0x7a8   : > { %v2524_v14 = vadd.f32 %v4350_v44, %v2457_v13  ;;  %2532 = vmax.xlane.f32.xlu2 %v2525_v12 }
 0x7aa   : > { %2530 = vmax.xlane.f32.xlu1 %v2524_v14 }
 0x7ac   : > { %2703 = vrot.lane.b32.xlu0 %v5783_v41, %s4943_s26 }
 0x7ad   : > { %v2517_v16 = vpop.f32.mrf.mxu2 }
 0x7af   : > { %v2459_v17 = vpop.f32.mrf.mxu1 }
 0x7b0   : > { %v4351_v17 = vld [vmem:[%s6176_s10] ss:$0 sm:$0xff] }
 0x7c0   : > { %2701 = vrot.lane.b32.xlu2 %v5776_v20, %s4943_s26 }
 0x7c3   : > { %2667 = vrot.lane.b32.xlu1 %v5787_v54, %s4944_s4 }
 0x80b   : > { %v2529_v18 = vpop.xlane.xlu0 %2528 }
 0x80c   : > { %v2535_v21 = vsub.f32 %v2523_v9, %v2529_v18 }
 0x80e   : > { %v2540_v22 = vmul.f32 1.442695, %v2535_v21 }
 0x810   : > { %4377 = vpow2.f32 %v2540_v22 }
 0x816   : > { %v4378_v23 = vpop.eup %4377 }
 0x817   : > { %2548 = vadd.xlane.f32.xlu0 %v4378_v23 }
 0x81b   : > { %v2533_v60 = vpop.xlane.xlu2 %2532 }
 0x81c   : > { %v2537_v24 = vsub.f32 %v2525_v12, %v2533_v60  ;;  %v4185_v60 = vld [vmem:[%s6174_s3 + $0x74] sm:$0xf0] }
 0x81d   : > { %v2531_v25 = vpop.xlane.xlu1 %2530 }
 0x81e   : > { %v2544_v26 = vmul.f32 1.442695, %v2537_v24  ;;  %v2536_v27 = vsub.f32 %v2524_v14, %v2531_v25  ;;  %v2704_v28 = vpop.permute.xlu0 %2703  ;;  %v4184_v24 = vld [vmem:[%s6174_s3 + $0x74] sm:$0xf] }
 0x81f   : > { %2731 = vmatpush.bf16.msrb.mxu2 %v2704_v28 }
 0x820   : > { %4379 = vpow2.f32 %v2544_v26  ;;  %v2542_v29 = vmul.f32 1.442695, %v2536_v27  ;;  %v4012_v26 = vld [vmem:[%s6174_s3 + $0x78] sm:$0xf0] }
 0x821   : > { %v4015_v27 = vor.u32 %v4184_v24, %v4012_v26 }
 0x822   : > { %4381 = vpow2.f32 %v2542_v29 }
 0x823   : > { %v2702_v30 = vpop.permute.xlu2 %2701  ;;  %4383 = vpow2.f32 %v2538_v34  ;;  %v4004_v34 = vld [vmem:[%s6174_s3 + $0x68] sm:$0xf0] }
 0x824   : > { %2732 = vmatpush.bf16.msrb.mxu2 %v2702_v30 }
 0x826   : > { %v4380_v54 = vpop.eup %4379 }
 0x827   : > { %2552 = vadd.xlane.f32.xlu2 %v4380_v54 }
 0x828   : > { %v4382_v31 = vpop.eup %4381 }
 0x829   : > { %2550 = vadd.xlane.f32.xlu1 %v4382_v31  ;;  %v4384_v35 = vpop.eup %4383 }
 0x82b   : > { %2625 = vrot.lane.b32.xlu0 %v5776_v20, %s4945_s30 }
 0x835   : > { %v2668_v0 = vpop.permute.xlu1 %2667 }
 0x836   : > { %2692 = vmatpush.bf16.msrb.mxu1 %v2668_v0  ;;  %v4182_v0 = vld [vmem:[%s6174_s3 + $0x64] sm:$0xf] }
 0x83f   : > { %2665 = vrot.lane.b32.xlu2 %v5783_v41, %s4944_s4 }
 0x842   : > { %2663 = vrot.lane.b32.xlu1 %v5776_v20, %s4944_s4 }
 0x868   : > { %2546 = vadd.xlane.f32.xlu2 %v4384_v35 }
 0x88a   : > { %v2549_v57 = vpop.xlane.xlu0 %2548 }
 0x88b   : > { %4385 = vrcp.f32 %v2549_v57  ;;  %v3994_v57 = vld [vmem:[%s6174_s3 + $0x50] sm:$0xf] }
 0x891   : > { %v4386_v36 = vpop.eup %4385 }
 0x892   : > { %v2559_v33 = vmul.f32 %v4386_v36, %v4378_v23  ;;  %v4010_v23 = vld [vmem:[%s6174_s3 + $0x70] sm:$0xf]  ;;  %v4181_v36 = vld [vmem:[%s6174_s3 + $0x54] sm:$0xf0] }
 0x893   : > { %v4011_v25 = vor.u32 %v4185_v60, %v4010_v23  ;;  %v4352_v23 = vld [vmem:[%s1213_s24] ss:$0 sm:$0xff] }
 0x894   : > { %v2624_v39 = vpack.c.bf16 %v2559_v33, %v2559_v33  ;;  %v3995_v33 = vor.u32 %v4181_v36, %v3994_v57  ;;  %v4196_v57 = vld [vmem:[%s6177_s11 + $0x50] sm:$0xff]  ;;  %v4187_v36 = vld [vmem:[%s6177_s11 + $0x8] sm:$0xff] }
 0x89a   : > { %v2553_v38 = vpop.xlane.xlu2 %2552 }
 0x89b   : > { %4387 = vrcp.f32 %v2553_v38  ;;  %v4180_v38 = vld [vmem:[%s6174_s3 + $0x54] sm:$0xf] }
 0x89c   : > { %v2551_v40 = vpop.xlane.xlu1 %2550 }
 0x89d   : > { %v2626_v47 = vpop.permute.xlu0 %2625  ;;  %4389 = vrcp.f32 %v2551_v40  ;;  %v3988_v40 = vld [vmem:[%s6174_s3 + $0x48] sm:$0xf0] }
 0x89e   : > { %2656 = vmatpush.bf16.msrb.mxu0 %v2626_v47  ;;  %v3996_v47 = vld [vmem:[%s6174_s3 + $0x58] sm:$0xf0] }
 0x8a1   : > { %v4388_v37 = vpop.eup %4387  ;;  %2657 = vmatmul.bf16.vlgmr.msrb.gmra.mxu0 %v2624_v39  ;;  %v3999_v39 = vor.u32 %v4180_v38, %v3996_v47  ;;  %v4195_v38 = vld [vmem:[%s6177_s11 + $0x48] sm:$0xff]  ;;  %v4194_v47 = vld [vmem:[%s6177_s11 + $0x40] sm:$0xff] }
 0x8a2   : > { %v2561_v41 = vmul.f32 %v4388_v37, %v4380_v54  ;;  %v2666_v43 = vpop.permute.xlu2 %2665  ;;  %2952 = vmatpush.bf16.msra.mxu0 %v4011_v25  ;;  %v4002_v54 = vld [vmem:[%s6174_s3 + $0x60] sm:$0xf] }
 0x8a3   : > { %2693 = vmatpush.bf16.msrb.mxu1 %v2666_v43  ;;  %v4390_v44 = vpop.eup %4389  ;;  %v3986_v37 = vld [vmem:[%s6174_s3 + $0x40] sm:$0xf]  ;;  %v4178_v43 = vld [vmem:[%s6174_s3 + $0x44] sm:$0xf] }
 0x8a4   : > { %v2700_v20 = vpack.c.bf16 %v2561_v41, %v2561_v41  ;;  %v2560_v45 = vmul.f32 %v4390_v44, %v4382_v31  ;;  %v4183_v31 = vld [vmem:[%s6174_s3 + $0x64] sm:$0xf0]  ;;  %v3991_v44 = vor.u32 %v4178_v43, %v3988_v40 }
 0x8a5   : > { %v4003_v32 = vor.u32 %v4183_v31, %v4002_v54  ;;  %v4179_v41 = vld [vmem:[%s6174_s3 + $0x44] sm:$0xf0] }
 0x8a6   : > { %2733 = vmatmul.bf16.vlgmr.msrb.gmra.mxu2 %v2700_v20  ;;  %v2662_v48 = vpack.c.bf16 %v2560_v45, %v2560_v45  ;;  %v3987_v20 = vor.u32 %v4179_v41, %v3986_v37  ;;  %v3978_v45 = vld [vmem:[%s6174_s3 + $0x30] sm:$0xf]  ;;  %v4191_v54 = vld [vmem:[%s6177_s11 + $0x28] sm:$0xff] }
 0x8a7   : > { %2953 = vmatpush.bf16.msra.mxu0 %v4003_v32  ;;  %v4199_v31 = vld [vmem:[%s6177_s11 + $0x68] sm:$0xff]  ;;  %v4189_v32 = vld [vmem:[%s6177_s11 + $0x18] sm:$0xff] }
 0x8ab   : > { %2954 = vmatpush.bf16.msra.mxu0 %v3995_v33  ;;  %v4186_v33 = vld [vmem:[%s6177_s11] sm:$0xff] }
 0x8af   : > { %2955 = vmatpush.bf16.msra.mxu0 %v3987_v20 }
 0x8b4   : > { %v2664_v46 = vpop.permute.xlu1 %2663 }
 0x8b5   : > { %2694 = vmatpush.bf16.msrb.mxu1 %v2664_v46  ;;  %v4177_v46 = vld [vmem:[%s6174_s3 + $0x34] sm:$0xf0] }
 0x8b8   : > { %2695 = vmatmul.bf16.vlgmr.msrb.gmra.mxu1 %v2662_v48  ;;  %v4176_v48 = vld [vmem:[%s6174_s3 + $0x34] sm:$0xf] }
 0x8b9   : > { %2965 = vmatpush.bf16.msra.mxu1 %v4015_v27 }
 0x8db   : > { %v2547_v51 = vpop.xlane.xlu2 %2546 }
 0x8dc   : > { %4391 = vrcp.f32 %v2547_v51  ;;  %v3979_v51 = vor.u32 %v4177_v46, %v3978_v45 }
 0x8de   : > { %2956 = vmatpush.bf16.msra.mxu0 %v3979_v51 }
 0x8e2   : > { %v4392_v52 = vpop.eup %4391 }
 0x8e3   : > { %v2558_v53 = vmul.f32 %v4392_v52, %v4384_v35  ;;  %v4007_v35 = vor.u32 %v4182_v0, %v4004_v34  ;;  %v3980_v52 = vld [vmem:[%s6174_s3 + $0x38] sm:$0xf0]  ;;  %v4198_v0 = vld [vmem:[%s6177_s11 + $0x60] sm:$0xff] }
 0x8e4   : > { %v4197_v34 = vld [vmem:[%s6177_s11 + $0x58] sm:$0xff] }
 0x8e5   : > { %v2562_v55 = vpack.c.bf16 %v2558_v53, %v2558_v53  ;;  %2966 = vmatpush.bf16.msra.mxu1 %v4007_v35  ;;  %v3983_v53 = vor.u32 %v4176_v48, %v3980_v52  ;;  %v4188_v35 = vld [vmem:[%s6177_s11 + $0x10] sm:$0xff] }
 0x8e7   : > { %2619 = vmatmul.bf16.vlgmr.msra.gmra.mxu3 %v2562_v55  ;;  %v3970_v55 = vld [vmem:[%s6174_s3 + $0x20] sm:$0xf] }
 0x8e9   : > { %2967 = vmatpush.bf16.msra.mxu1 %v3999_v39  ;;  %v2866_v39 = vld [vmem:[%s5475_s22] sm:$0x3] }
 0x8ea   : > { %v2868_v37 = vperm.slane %v2866_v39, 0  ;;  %v2869_v41 = vperm.slane %v2866_v39, 1 }
 0x8ed   : > { %2968 = vmatpush.bf16.msra.mxu1 %v3991_v44 }
 0x8f1   : > { %2969 = vmatpush.bf16.msra.mxu1 %v3983_v53 }
 0x91e   : > { %v2658_v56 = vpop.f32.mrf.mxu0 }
 0x91f   : > { %2739 = vrot.lane.b32.xlu0 %v2658_v56, %s4943_s26  ;;  %v4175_v56 = vld [vmem:[%s6174_s3 + $0x24] sm:$0xf0] }
 0x926   : > { %v2660_v58 = vpop.f32.mrf.mxu0 }
 0x927   : > { %v4174_v58 = vld [vmem:[%s6174_s3 + $0x24] sm:$0xf] }
 0x929   : > { %v2734_v59 = vpop.f32.mrf.mxu2 }
 0x92a   : > { %2747 = vrot.lane.b32.xlu0 %v2734_v59, %s4945_s30  ;;  %v3971_v59 = vor.u32 %v4175_v56, %v3970_v55  ;;  %s6179_s30 = scalar_lea.vmem [#allocation16], %s5373_s29 }
 0x92b   : > { %v4353_v24 = vld [vmem:[%s6179_s30] ss:$0 sm:$0xff] }
 0x92c   : > { %2957 = vmatpush.bf16.msra.mxu0 %v3971_v59 }
 0x931   : > { %v2736_v61 = vpop.f32.mrf.mxu2 }
 0x932   : > { %v3972_v61 = vld [vmem:[%s6174_s3 + $0x28] sm:$0xf0] }
 0x935   : > { %v2696_v62 = vpop.f32.mrf.mxu1 }
 0x936   : > { %2743 = vrot.lane.b32.xlu1 %v2696_v62, %s4944_s4  ;;  %v3975_v62 = vor.u32 %v4174_v58, %v3972_v61 }
 0x938   : > { %2970 = vmatpush.bf16.msra.mxu1 %v3975_v62 }
 0x93d   : > { %v2698_v63 = vpop.f32.mrf.mxu1 }
 0x93e   : > { %v3962_v63 = vld [vmem:[%s6174_s3 + $0x10] sm:$0xf] }
 0x93f   : > { %v3963_v49 = vor.u32 %v4173_v42, %v3962_v63 }
 0x941   : > { %2958 = vmatpush.bf16.msra.mxu0 %v3963_v49 }
 0x945   : > { %2959 = vmatpush.bf16.msra.mxu0 %v3955_v7 }
 0x96a   : > { %v2620_v1 = vpop.f32.mrf.mxu3 }
 0x972   : > { %v2622_v2 = vpop.f32.mrf.mxu3 }
 0x973   : > { %v3964_v2 = vld [vmem:[%s6174_s3 + $0x18] sm:$0xf0] }
 0x991   : > { %v2740_v9 = vpop.permute.xlu0 %2739 }
 0x992   : > { %v2750_v10 = vsel %vm1460_vm0, %v2620_v1, %v2740_v9  ;;  %v4172_v1 = vld [vmem:[%s6174_s3 + $0x14] sm:$0xf]  ;;  %v3959_v9 = vor.u32 %v4170_v6, %v3956_v8  ;;  %v4354_v8 = vld [vmem:[%s1220_s13] ss:$0 sm:$0xff]  ;;  %s4081_s13 = sshll.u32 %s6181_s9, 3  ;;  %s3201_s3 = sshll.u32 %s5491_s17, 4  ;;  %s3202_s3 = int_to_ptr.vmem [resolvable:$true] %s3201_s3 }
 0x993   : > { %v3967_v3 = vor.u32 %v4172_v1, %v3964_v2  ;;  %s3199_s0 = scalar_lea.hbm %s6183_s1, %s4081_s13 }
 0x994   : > { %s3203_s6 = sshll.u32 %s3199_s0, 4  ;;  %s3204_s6 = int_to_ptr.hbm [resolvable:$true] %s3203_s6 }
 0x995   : > { %2971 = vmatpush.bf16.msra.mxu1 %v3967_v3  ;;  %s4782_s16 = sshra.s32 %s3204_s6, 4  ;;  %s4783_s16 = int_to_ptr.hbm [resolvable:$true] %s4782_s16 }
 0x996   : > { %s4784_s8 = scalar_lea.hbm %s4783_s16, 8  ;;  %p4789_p2 = scmp.lt.s32.totalorder %s4783_s16, %s6183_s1 }
 0x997   : > { %p4785_p0 = scmp.ne.s32.totalorder %s4783_s16, %s4784_s8  ;;  %p4790_p9 = scmp.lt.s32.totalorder %s4788_s28, %s4784_s8 }
 0x999   : > { %2972 = vmatpush.bf16.msra.mxu1 %v3959_v9  ;;  %p4786_p5 = pnand %p4785_p0, %p5181_p8  ;;  %p4791_p7 = por %p4790_p9, %p4789_p2 }
 0x99b   : > { %p4787_p10 = pneg %p4786_p5 }
 0x99c   : > { %v2748_v12 = vpop.permute.xlu0 %2747 }
 0x99d   : > { %p4792_p11 = pnand %p4791_p7, %p4787_p10 }
 0x9a8   : > { %v2744_v11 = vpop.permute.xlu1 %2743 }
 0x9a9   : > { %v2751_v13 = vsel %vm1703_vm3, %v2750_v10, %v2744_v11  ;;  %v4193_v10 = vld [vmem:[%s6177_s11 + $0x38] sm:$0xff] }
 0x9aa   : > { %v2752_v14 = vsel %vm1705_vm4, %v2751_v13, %v2748_v12  ;;  %v4201_v11 = vld [vmem:[%s6177_s11 + $0x78] sm:$0xff]  ;;  %3130 = vmatpush.bf16.msra.mxu2 %v4193_v10 }
 0x9ab   : > { %v2753_v16 = vpack.c.bf16 %v2752_v14, %v2752_v14  ;;  %3143 = vmatpush.bf16.msra.mxu3 %v4201_v11 }
 0x9ad   : > { %2813 = vmatmul.bf16.vlgmr.msrb.gmra.mxu3 %v2753_v16 }
 0xa30   : > { %v2814_v15 = vpop.f32.mrf.mxu3 }
 0xa31   : > { %v2815_v18 = vadd.f32 %v4351_v17, %v2814_v15 }
 0xa33   : > { %v2820_v21 = vadd.f32 %v2815_v18, %v5772_v19 }
 0xa35   : > { %2821 = vadd.xlane.f32.xlu1 %v2820_v21 }
 0xa38   : > { %v2816_v22 = vpop.f32.mrf.mxu3 }
 0xaa8   : > { %v2822_v28 = vpop.xlane.xlu1 %2821 }
 0xaa9   : > { %v2823_v19 = vmul.f32 %v2822_v28, %v5679_v50 }
 0xaab   : > { %v5881_v29 = vsub.f32 %v2820_v21, %v2823_v19  ;;  %v4192_v19 = vld [vmem:[%s6177_s11 + $0x30] sm:$0xff] }
 0xaac   : > { %3131 = vmatpush.bf16.msra.mxu2 %v4192_v19 }
 0xaad   : > { %v2825_v30 = vmul.f32 %v5881_v29, %v5881_v29 }
 0xaaf   : > { %2826 = vadd.xlane.f32.xlu0 %v2825_v30  ;;  %v4200_v30 = vld [vmem:[%s6177_s11 + $0x70] sm:$0xff] }
 0xab0   : > { %3144 = vmatpush.bf16.msra.mxu3 %v4200_v30  ;;  %3132 = vmatpush.bf16.msra.mxu2 %v4191_v54 }
 0xab4   : > { %3145 = vmatpush.bf16.msra.mxu3 %v4199_v31  ;;  %v4356_v31 = vld [vmem:[%s1226_s14] ss:$0 sm:$0xff] }
 0xab8   : > { %3146 = vmatpush.bf16.msra.mxu3 %v4198_v0 }
 0xabc   : > { %3147 = vmatpush.bf16.msra.mxu3 %v4197_v34 }
 0xac0   : > { %3148 = vmatpush.bf16.msra.mxu3 %v4196_v57 }
 0xac4   : > { %3149 = vmatpush.bf16.msra.mxu3 %v4195_v38 }
 0xac8   : > { %3150 = vmatpush.bf16.msra.mxu3 %v4194_v47 }
 0xb22   : > { %v2827_v12 = vpop.xlane.xlu0 %2826 }
 0xb23   : > { %v2828_v13 = vmul.f32 %v2827_v12, %v5679_v50 }
 0xb25   : > { %v2829_v14 = vadd.f32 1e-05, %v2828_v13 }
 0xb27   : > { %4393 = vrsqrt.f32 %v2829_v14  ;;  %vm2836_vm10 = vweird.f32 %v2829_v14 }
 0xb2d   : > { %v4394_v16 = vpop.eup %4393 }
 0xb2e   : > { %v2831_v17 = vmul.f32 %v4394_v16, %v2829_v14  ;;  %vm2837_vm9 = vweird.f32 %v4394_v16 }
 0xb2f   : > { %vm2838_vm11 = vmor %vm2836_vm10, %vm2837_vm9 }
 0xb30   : > { %v2832_v15 = vmul.f32 %v4394_v16, %v2831_v17 }
 0xb32   : > { %v2833_v18 = vmul.f32 0.5, %v2832_v15 }
 0xb34   : > { %v2834_v21 = vsub.f32 1.5, %v2833_v18 }
 0xb36   : > { %v2835_v22 = vmul.f32 %v4394_v16, %v2834_v21 }
 0xb38   : > { %v2839_v60 = vsel %vm2838_vm11, %v4394_v16, %v2835_v22 }
 0xb39   : > { %v2840_v25 = vmul.f32 %v2839_v60, %v5881_v29  ;;  %v4190_v29 = vld [vmem:[%s6177_s11 + $0x20] sm:$0xff] }
 0xb3a   : > { %3133 = vmatpush.bf16.msra.mxu2 %v4190_v29 }
 0xb3b   : > { %v2844_v26 = vmul.f32 %v4352_v23, %v2840_v25 }
 0xb3d   : > { %v5924_v27 = vadd.f32 %v4353_v24, %v2844_v26 }
 0xb3e   : > { %3134 = vmatpush.bf16.msra.mxu2 %v4189_v32 }
 0xb3f   : > { %v2849_v28 = vpack.c.bf16 %v5924_v27, %v5924_v27 }
 0xb41   : > { %2960 = vmatmul.bf16.vlgmr.msra.gmra.mxu0 %v2849_v28  ;;  %2973 = vmatmul.bf16.vlgmr.msra.gmra.mxu1 %v2849_v28 }
 0xb42   : > { %3135 = vmatpush.bf16.msra.mxu2 %v4188_v35 }
 0xb46   : > { %3136 = vmatpush.bf16.msra.mxu2 %v4187_v36 }
 0xb4a   : > { %3137 = vmatpush.bf16.msra.mxu2 %v4186_v33 }
 0xbbe   : > { %v2961_v43 = vpop.f32.mrf.mxu0  ;;  %v2974_v20 = vpop.f32.mrf.mxu1 }
 0xbbf   : > { %v2962_v40 = vadd.f32 %v2961_v43, %v2868_v37  ;;  %v2975_v44 = vadd.f32 %v2974_v20, %v2869_v41 }
 0xbc1   : > { %v2978_v45 = vmul.f32 %v2962_v40, %v2962_v40  ;;  %v2979_v46 = vmul.f32 %v2975_v44, %v2975_v44 }
 0xbc3   : > { %v2980_v48 = vmul.f32 %v2978_v45, %v2962_v40  ;;  %v2981_v51 = vmul.f32 %v2979_v46, %v2975_v44 }
 0xbc5   : > { %v2982_v52 = vmul.f32 0.044715, %v2980_v48  ;;  %v2983_v53 = vmul.f32 0.044715, %v2981_v51 }
 0xbc6   : > { %v2963_v55 = vpop.f32.mrf.mxu0  ;;  %v2976_v56 = vpop.f32.mrf.mxu1 }
 0xbc7   : > { %v2984_v58 = vadd.f32 %v2982_v52, %v2962_v40  ;;  %v2985_v59 = vadd.f32 %v2983_v53, %v2975_v44 }
 0xbc9   : > { %v2986_v61 = vmul.f32 0.7978846, %v2984_v58  ;;  %v2987_v62 = vmul.f32 0.7978846, %v2985_v59 }
 0xbcb   : > { %4395 = vtanh.f32 %v2986_v61 }
 0xbcc   : > { %4397 = vtanh.f32 %v2987_v62 }
 0xbd1   : > { %v4396_v63 = vpop.eup %4395 }
 0xbd2   : > { %v4398_v42 = vpop.eup %4397  ;;  %v2990_v1 = vadd.f32 1.0, %v4396_v63 }
 0xbd3   : > { %v2991_v49 = vadd.f32 1.0, %v4398_v42 }
 0xbd4   : > { %v2992_v2 = vmul.f32 0.5, %v2990_v1 }
 0xbd5   : > { %v2993_v3 = vmul.f32 0.5, %v2991_v49 }
 0xbd6   : > { %v2994_v4 = vmul.f32 %v2992_v2, %v2962_v40 }
 0xbd7   : > { %v2995_v5 = vmul.f32 %v2993_v3, %v2975_v44 }
 0xbd8   : > { %v2996_v6 = vpack.c.bf16 %v2994_v4, %v2994_v4 }
 0xbd9   : > { %v2997_v7 = vpack.c.bf16 %v2995_v5, %v2995_v5 }
 0xbda   : > { %3138 = vmatmul.bf16.vlgmr.msra.gmra.mxu2 %v2996_v6 }
 0xbdb   : > { %3151 = vmatmul.bf16.vlgmr.msra.gmra.mxu3 %v2997_v7 }
 0xc5d   : > { %v3139_v9 = vpop.f32.mrf.mxu2 }
 0xc5e   : > { %v3140_v10 = vadd.f32 %v4354_v8, %v3139_v9  ;;  %v3152_v11 = vpop.f32.mrf.mxu3 }
 0xc60   : > { %v3153_v12 = vadd.f32 %v3152_v11, %v3140_v10 }
 0xc62   : > { %v3158_v13 = vadd.f32 %v3153_v12, %v5924_v27 }
 0xc64   : > { %3159 = vadd.xlane.f32.xlu2 %v3158_v13 }
 0xc65   : > { %v3141_v14 = vpop.f32.mrf.mxu2 }
 0xc66   : > { %v3154_v16 = vpop.f32.mrf.mxu3 }
 0xcd7   : > { %v3160_v17 = vpop.xlane.xlu2 %3159 }
 0xcd8   : > { %v3161_v15 = vmul.f32 %v3160_v17, %v5679_v50 }
 0xcda   : > { %v3162_v18 = vsub.f32 %v3158_v13, %v3161_v15 }
 0xcdc   : > { %v3163_v21 = vmul.f32 %v3162_v18, %v3162_v18 }
 0xcde   : > { %3164 = vadd.xlane.f32.xlu2 %v3163_v21 }
 0xd51   : > { %v3165_v22 = vpop.xlane.xlu2 %3164 }
 0xd52   : > { %v3166_v23 = vmul.f32 %v3165_v22, %v5679_v50  ;;  %v4355_v50 = vld [vmem:[%s1223_s7] ss:$0 sm:$0xff]  ;;  %s3189_s7 = scalar_lea.sflag [#allocation4], %s5340_s12 }
 0xd54   : > { %v3167_v60 = vadd.f32 1e-05, %v3166_v23 }
 0xd56   : > { %4399 = vrsqrt.f32 %v3167_v60  ;;  %vm3174_vm13 = vweird.f32 %v3167_v60 }
 0xd5c   : > { %v4400_v24 = vpop.eup %4399 }
 0xd5d   : > { %v3169_v25 = vmul.f32 %v4400_v24, %v3167_v60  ;;  %vm3175_vm12 = vweird.f32 %v4400_v24 }
 0xd5e   : > { %vm3176_vm14 = vmor %vm3174_vm13, %vm3175_vm12 }
 0xd5f   : > { %v3170_v26 = vmul.f32 %v4400_v24, %v3169_v25 }
 0xd61   : > { %v3171_v27 = vmul.f32 0.5, %v3170_v26 }
 0xd63   : > { %v3172_v28 = vsub.f32 1.5, %v3171_v27 }
 0xd65   : > { %v3173_v19 = vmul.f32 %v4400_v24, %v3172_v28 }
 0xd67   : > { %v3177_v30 = vsel %vm3176_vm14, %v4400_v24, %v3173_v19 }
 0xd68   : > { %v3178_v54 = vmul.f32 %v3177_v30, %v3162_v18 }
 0xd6a   : > { %v3182_v29 = vmul.f32 %v4355_v50, %v3178_v54 }
 0xd6c   : > { %v3186_v0 = vadd.f32 %v4356_v31, %v3182_v29 }
 0xd6e   : > { %3187 = vst [vmem:[%s5491_s17] sm:$0xff] %v3186_v0 }
 0xd6f   : > { %4795 = shalt.err (!%p4792_p11)
}
 0xd70   : > { %4235 = dma.vmem_to_hbm [thread:$0]  (%p5181_p8), %s3202_s3, 128, %s3204_s6, %s3189_s7  }
 0xd71 PF: > { %s6186_s12 = sld [smem:[#allocation42_spill]] }
 0xd72   : > { %s6187_s17 = sld [smem:[#allocation35_spill]] }
 0xd77   : > { %p4247_p1 = scmp.ge.s32.totalorder %s6186_s12, 2 }
 0xd78   : > { %s3215_s4 = sand.u32 1, %s6187_s17  }
 0xd79   : > { %p4242_p4 = pnand %p4247_p1, %p5188_p3  ;;  %s3216_s30 = scalar_lea.sflag [#allocation4], %s3215_s4 }
 0xd7b   : > { %p4243_p6 = pneg %p4242_p4 }
 0xd7d   : > { %4889 = dma.done.wait (%p4243_p6), %s3216_s30, 128  }
 0xd7e   : > { %4891 = vsyncadd (%p4243_p6), %s3216_s30, 4294967168  ;;  %s41_s5 = sadd.s32 1, %s6186_s12   ;;  %s6189_s2 = sld [smem:[#allocation33_spill]] }
 0xd7f   : > { %p38_p12 = scmp.ge.s32.totalorder %s41_s5, 6   ;;  %s6190_s25 = sld [smem:[#allocation34_spill]] }
 0xd80   : > { %s6191_s26 = sld [smem:[#allocation47_spill]] }
 0xd81   : > { %s6192_s27 = sld [smem:[#allocation36_spill]] }
 0xd82   : > { %s6193_s3 = sld [smem:[#allocation37_spill]] }
 0xd83   : > { %s6194_s28 = sld [smem:[#allocation48_spill]]  ;;  %40 = sbr.rel (!%p38_p12) target bundleno = 35 (0x23), region = 304 }
 0xd84   : > { %s6195_s29 = sld [smem:[#allocation40_spill]] }
 0xd85   : > { %s6196_s0 = sld [smem:[#allocation41_spill]] }
 0xd86   : > { %s6197_s4 = sld [smem:[#allocation44_spill]] }
 0xd87   : > { %s6198_s30 = sld [smem:[#allocation45_spill]] }
 0xd88   :  { %3222 = vsyncpa [#allocation3], 1 }
 0xd89   :  { %3224 = vsyncpa [#allocation3 + $0x1], 1 }
 0xd8a   :  { %3225 = vsyncpa [#allocation6], 1 }
 0xd8b   :  { %3227 = vsyncpa [#allocation6 + $0x1], 1 }
 0xd8c   :  { %3228 = vsyncpa [#allocation9], 1 }
 0xd8d   :  { %3229 = vsyncpa [#allocation4], 1 }
 0xd8e   :  { %3231 = vsyncpa [#allocation4 + $0x1], 1 }

</bundles_post_ra>
